<compile_context>
chip_gen: v7x
topology: tpu7x:2x2x1
jax: 0.10.0
libtpu: 0.0.40
codegen_flags: <defaults>
</compile_context>

<pallas_src>
import functools

import jax
import jax.numpy as jnp
from jax import lax
from jax.experimental import pallas as pl
from jax.experimental.pallas import tpu as pltpu

ENCODER_REGULAR_VTH = 0.999
NEURON_CDECAY = 1.0 / 2.0
NEURON_VDECAY = 3.0 / 4.0
NEURON_VTH = 0.5

_UNROLL_MAX_TS = 16   # fully unroll the time loop up to this many steps


def _round_up(x, m):
    return ((x + m - 1) // m) * m


def _actor_kernel(spike_ts,
                  obs_ref, enc_mean_ref, enc_c_ref,
                  w1t_ref, b1_ref, w2t_ref, b2_ref, wot_ref, bo_ref,
                  wdec_ref, bdec_ref,
                  mu_ref):
    """Feature-major fused forward: everything is (features, TB)."""
    f32 = jnp.float32
    HI = jax.lax.Precision.HIGHEST
    TB = obs_ref.shape[1]
    H1 = w1t_ref.shape[0]
    H2 = w2t_ref.shape[0]
    NO = wot_ref.shape[0]

    # --- encoder: gaussian population receptive fields --------------------
    # obs arrives already repeated over the population: (n_in, TB).
    # -0.5/std^2 precomputed in the wrapper -> multiply, no divide.
    diff = obs_ref[...] - enc_mean_ref[...]          # (n_in,1) lane-broadcast
    pop_act = jnp.exp(diff * diff * enc_c_ref[...])  # (n_in, TB)

    w1t = w1t_ref[...]
    w2t = w2t_ref[...]
    wot = wot_ref[...]
    # biases stay as (H, 1) columns; implicit lane broadcast is free.
    b1 = b1_ref[...]
    b2 = b2_ref[...]
    bo = bo_ref[...]

    z1 = jnp.zeros((H1, TB), f32)
    z2 = jnp.zeros((H2, TB), f32)
    zo = jnp.zeros((NO, TB), f32)

    def step(carry):
        pop_volt, c1, v1, s1, c2, v2, s2, co, vo, so, out_act = carry
        # regular-spike encoder
        pop_volt = pop_volt + pop_act
        spike_in = (pop_volt > ENCODER_REGULAR_VTH).astype(f32)
        pop_volt = pop_volt - spike_in * ENCODER_REGULAR_VTH
        # hidden LIF layer 1 (v*VDECAY*(1-s) -> vselect)
        c1 = c1 * NEURON_CDECAY + jnp.dot(
            w1t, spike_in, precision=HI, preferred_element_type=f32) + b1
        v1 = jnp.where(s1 > 0, 0.0, v1 * NEURON_VDECAY) + c1
        s1 = (v1 > NEURON_VTH).astype(f32)
        # hidden LIF layer 2
        c2 = c2 * NEURON_CDECAY + jnp.dot(
            w2t, s1, precision=HI, preferred_element_type=f32) + b2
        v2 = jnp.where(s2 > 0, 0.0, v2 * NEURON_VDECAY) + c2
        s2 = (v2 > NEURON_VTH).astype(f32)
        # output population LIF layer
        co = co * NEURON_CDECAY + jnp.dot(
            wot, s2, precision=HI, preferred_element_type=f32) + bo
        vo = jnp.where(so > 0, 0.0, vo * NEURON_VDECAY) + co
        so = (vo > NEURON_VTH).astype(f32)
        out_act = out_act + so
        return (pop_volt, c1, v1, s1, c2, v2, s2, co, vo, so, out_act)

    carry = (jnp.zeros_like(pop_act), z1, z1, z1, z2, z2, z2, zo, zo, zo, zo)
    if spike_ts <= _UNROLL_MAX_TS:
        # small static trip count: unroll (LLO scheduler visibility)
        for _ in range(spike_ts):
            carry = step(carry)
    else:
        # large trip count: rolled carry loop; low-vreg carry allows unroll=4
        carry = lax.fori_loop(0, spike_ts, lambda _, c: step(c), carry,
                              unroll=4)
    out_act = carry[-1] * (1.0 / float(spike_ts))     # (NO, TB)

    # --- decoder: grouped Conv1d over the population == block-diag matmul --
    raw = jnp.dot(wdec_ref[...], out_act,
                  precision=HI, preferred_element_type=f32) + bdec_ref[...]
    mu_ref[...] = jnp.tanh(raw)                       # (act_dim, TB) lane-dense


def pop_spike_actor_forward(obs, params, *, obs_dim, act_dim,
                            en_pop_dim, de_pop_dim, spike_ts,
                            batch_tile=512):
    """Returns (mu, std) matching PopSpikeActor.forward (decoder = PopSpikeDecoder)."""
    B = obs.shape[0]
    n_in = obs_dim * en_pop_dim
    n_out = act_dim * de_pop_dim
    f32 = jnp.float32
    obs = obs.astype(f32)

    # ---- batch tiling: batch rides the lane axis.  Per-tile VMEM is tiny
    # (~14 live (F, TB) f32 states ~ 1.8 MiB at TB=1024), so size tiles for
    # grid-overhead amortization and (on v7x) for >= 2 tiles across 2 TCs. ----
    if B <= 256:
        tb, Bp = B, B                         # single tile; block == full dims
    else:
        tb = max(128, min(batch_tile, _round_up(pl.cdiv(B, 2), 128)))
        Bp = _round_up(B, tb)
    grid = (Bp // tb,)

    if Bp != B:
        obs = jnp.pad(obs, ((0, Bp - B), (0, 0)))

    # ---- glue: layout only ----
    # feature-major obs, exactly repeated over the population (no MXU repeat,
    # so obs is never bf16-truncated): (n_in, Bp)
    obs_rep_t = jnp.repeat(obs.T, en_pop_dim, axis=0)

    enc_mean = params["enc_mean"].reshape(n_in, 1).astype(f32)
    enc_std = params["enc_std"].reshape(n_in, 1).astype(f32)
    enc_c = -0.5 / (enc_std * enc_std)                          # (n_in, 1)

    w1t = params["w1"].T.astype(f32)                            # (H1, n_in)
    b1c = params["b1"].reshape(-1, 1).astype(f32)               # (H1, 1)
    w2t = params["w2"].T.astype(f32)                            # (H2, H1)
    b2c = params["b2"].reshape(-1, 1).astype(f32)
    wot = params["wo"].T.astype(f32)                            # (n_out, H2)
    boc = params["bo"].reshape(-1, 1).astype(f32)               # (n_out, 1)

    # grouped Conv1d(kernel=de_pop, groups=act_dim) == block-diag matmul:
    # wdec[a, a*de_pop + p] = conv_w[a, p]
    conv_w = params["dec_w"].reshape(act_dim, de_pop_dim).astype(f32)
    wdec = (jnp.eye(act_dim, dtype=f32)[:, :, None] * conv_w[None, :, :]
            ).reshape(act_dim, n_out)                           # (act, n_out)
    bdec = params["dec_b"].reshape(act_dim, 1).astype(f32)      # (act, 1)

    inputs = (obs_rep_t, enc_mean, enc_c,
              w1t, b1c, w2t, b2c, wot, boc, wdec, bdec)

    # obs tiles over the batch grid (lane axis); everything else is
    # constant-indexed so it stays resident in VMEM across all grid steps.
    in_specs = [pl.BlockSpec((n_in, tb), lambda i: (0, i))]
    for a in inputs[1:]:
        in_specs.append(pl.BlockSpec(a.shape, lambda i: (0, 0)))
    out_specs = pl.BlockSpec((act_dim, tb), lambda i: (0, i))   # lane-dense

    mu_t = pl.pallas_call(
        functools.partial(_actor_kernel, spike_ts),
        out_shape=jax.ShapeDtypeStruct((act_dim, Bp), f32),
        grid=grid,
        in_specs=in_specs,
        out_specs=out_specs,
        compiler_params=pltpu.CompilerParams(
            dimension_semantics=("parallel",)),   # v7x: shard batch tiles over 2 TCs
    )(*inputs)

    mu = mu_t.T[:B]                               # back to (B, act_dim)
    std = jnp.exp(params["log_std"])
    return mu, std


# ------------------------- pure-JAX reference -------------------------
def _reference_forward(obs, params, *, obs_dim, act_dim,
                       en_pop_dim, de_pop_dim, spike_ts):
    hp = jax.lax.Precision.HIGHEST
    B = obs.shape[0]
    n_in = obs_dim * en_pop_dim
    n_out = act_dim * de_pop_dim
    o = obs.reshape(B, obs_dim, 1)
    # exp(-(x-mean)^2 / (2 std^2)), written with the same precomputed
    # coefficient form as the kernel (algebraically identical to the module).
    coeff = -0.5 / (params["enc_std"] ** 2)
    diff = o - params["enc_mean"]
    pop_act = jnp.exp(diff * diff * coeff).reshape(B, n_in)
    pop_volt = jnp.zeros((B, n_in))
    c1 = v1 = s1 = jnp.zeros((B, params["w1"].shape[1]))
    c2 = v2 = s2 = jnp.zeros((B, params["w2"].shape[1]))
    co = vo = so = jnp.zeros((B, n_out))
    out_act = jnp.zeros((B, n_out))
    for _ in range(spike_ts):
        pop_volt = pop_volt + pop_act
        sp = (pop_volt > ENCODER_REGULAR_VTH).astype(jnp.float32)
        pop_volt = pop_volt - sp * ENCODER_REGULAR_VTH
        c1 = c1 * NEURON_CDECAY + jnp.dot(sp, params["w1"], precision=hp) + params["b1"]
        v1 = v1 * NEURON_VDECAY * (1 - s1) + c1
        s1 = (v1 > NEURON_VTH).astype(jnp.float32)
        c2 = c2 * NEURON_CDECAY + jnp.dot(s1, params["w2"], precision=hp) + params["b2"]
        v2 = v2 * NEURON_VDECAY * (1 - s2) + c2
        s2 = (v2 > NEURON_VTH).astype(jnp.float32)
        co = co * NEURON_CDECAY + jnp.dot(s2, params["wo"], precision=hp) + params["bo"]
        vo = vo * NEURON_VDECAY * (1 - so) + co
        so = (vo > NEURON_VTH).astype(jnp.float32)
        out_act = out_act + so
    out_act = out_act / spike_ts
    pa = out_act.reshape(B, act_dim, de_pop_dim)
    raw = jnp.sum(pa * params["dec_w"].reshape(1, act_dim, de_pop_dim),
                  axis=-1) + params["dec_b"]
    return jnp.tanh(raw), jnp.exp(params["log_std"])


if __name__ == "__main__":
    # small shapes consistent with the module
    B, OBS, ACT = 2, 4, 2
    EN_POP, DE_POP = 8, 4
    HIDDEN = (32, 32)
    SPIKE_TS = 5
    MEAN_RANGE = (-3.0, 3.0)
    ENC_STD = 0.5

    key = jax.random.PRNGKey(0)
    ks = jax.random.split(key, 10)

    def lin_init(kw, kb, fan_in, fan_out):
        bound = 1.0 / jnp.sqrt(fan_in)
        w = jax.random.uniform(kw, (fan_in, fan_out), jnp.float32, -bound, bound)
        b = jax.random.uniform(kb, (fan_out,), jnp.float32, -bound, bound)
        return w, b

    n_in = OBS * EN_POP
    n_out = ACT * DE_POP
    delta = (MEAN_RANGE[1] - MEAN_RANGE[0]) / (EN_POP - 1)
    enc_mean = (MEAN_RANGE[0] + delta * jnp.arange(EN_POP, dtype=jnp.float32)
                )[None, None, :].repeat(OBS, axis=1)           # (1, OBS, EN_POP)
    enc_std = jnp.full((1, OBS, EN_POP), ENC_STD, jnp.float32)

    w1, b1 = lin_init(ks[0], ks[1], n_in, HIDDEN[0])
    w2, b2 = lin_init(ks[2], ks[3], HIDDEN[0], HIDDEN[1])
    wo, bo = lin_init(ks[4], ks[5], HIDDEN[1], n_out)
    # Conv1d(act, act, de_pop, groups=act): weight (act, 1, de_pop), bias (act,)
    cbound = 1.0 / jnp.sqrt(DE_POP)
    dec_w = jax.random.uniform(ks[6], (ACT, 1, DE_POP), jnp.float32, -cbound, cbound)
    dec_b = jax.random.uniform(ks[7], (ACT,), jnp.float32, -cbound, cbound)
    log_std = -0.5 * jnp.ones((ACT,), jnp.float32)

    params = dict(enc_mean=enc_mean, enc_std=enc_std,
                  w1=w1, b1=b1, w2=w2, b2=b2, wo=wo, bo=bo,
                  dec_w=dec_w, dec_b=dec_b, log_std=log_std)

    obs = jax.random.normal(ks[8], (B, OBS), jnp.float32) * 2.0

    mu, std = pop_spike_actor_forward(
        obs, params, obs_dim=OBS, act_dim=ACT,
        en_pop_dim=EN_POP, de_pop_dim=DE_POP, spike_ts=SPIKE_TS)
    jax.block_until_ready((mu, std))

    mu_ref, std_ref = _reference_forward(
        obs, params, obs_dim=OBS, act_dim=ACT,
        en_pop_dim=EN_POP, de_pop_dim=DE_POP, spike_ts=SPIKE_TS)
    assert mu.shape == (B, ACT) and std.shape == (ACT,)
    assert jnp.allclose(mu, mu_ref, atol=1e-5), (mu, mu_ref)
    assert jnp.allclose(std, std_ref, atol=1e-6)

    print("KERNEL_OK")
</pallas_src>

<mosaic_0001>
module attributes {stable_mosaic.version = 11 : i64} {
  func.func @_actor_kernel(%arg0: i32, %arg1: memref<32x2xf32, #tpu.memory_space<vmem>>, %arg2: memref<32x1xf32, #tpu.memory_space<vmem>>, %arg3: memref<32x1xf32, #tpu.memory_space<vmem>>, %arg4: memref<32x32xf32, #tpu.memory_space<vmem>>, %arg5: memref<32x1xf32, #tpu.memory_space<vmem>>, %arg6: memref<32x32xf32, #tpu.memory_space<vmem>>, %arg7: memref<32x1xf32, #tpu.memory_space<vmem>>, %arg8: memref<8x32xf32, #tpu.memory_space<vmem>>, %arg9: memref<8x1xf32, #tpu.memory_space<vmem>>, %arg10: memref<2x8xf32, #tpu.memory_space<vmem>>, %arg11: memref<2x1xf32, #tpu.memory_space<vmem>>, %arg12: memref<2x2xf32, #tpu.memory_space<vmem>>) attributes {dimension_semantics = [#tpu.dimension_semantics<parallel>], iteration_bounds = array<i64: 1>, scalar_prefetch = 0 : i64, scratch_operands = 0 : i64, tpu.core_type = #tpu.core_type<tc>, window_params = [{transform_indices = @transform_0, window_bounds = array<i64: 32, 2>}, {pipeline_mode = #tpu.pipeline_mode<synchronous>, transform_indices = @transform_1, window_bounds = array<i64: 32, 1>}, {pipeline_mode = #tpu.pipeline_mode<synchronous>, transform_indices = @transform_2, window_bounds = array<i64: 32, 1>}, {pipeline_mode = #tpu.pipeline_mode<synchronous>, transform_indices = @transform_3, window_bounds = array<i64: 32, 32>}, {pipeline_mode = #tpu.pipeline_mode<synchronous>, transform_indices = @transform_4, window_bounds = array<i64: 32, 1>}, {pipeline_mode = #tpu.pipeline_mode<synchronous>, transform_indices = @transform_5, window_bounds = array<i64: 32, 32>}, {pipeline_mode = #tpu.pipeline_mode<synchronous>, transform_indices = @transform_6, window_bounds = array<i64: 32, 1>}, {pipeline_mode = #tpu.pipeline_mode<synchronous>, transform_indices = @transform_7, window_bounds = array<i64: 8, 32>}, {pipeline_mode = #tpu.pipeline_mode<synchronous>, transform_indices = @transform_8, window_bounds = array<i64: 8, 1>}, {pipeline_mode = #tpu.pipeline_mode<synchronous>, transform_indices = @transform_9, window_bounds = array<i64: 2, 8>}, {pipeline_mode = #tpu.pipeline_mode<synchronous>, transform_indices = @transform_10, window_bounds = array<i64: 2, 1>}, {transform_indices = @transform_11, window_bounds = array<i64: 2, 2>}]} {
    %c0 = arith.constant 0 : index
    %c0_0 = arith.constant 0 : index
    %0 = vector.load %arg1[%c0, %c0_0] : memref<32x2xf32, #tpu.memory_space<vmem>>, vector<32x2xf32>
    %c0_1 = arith.constant 0 : index
    %c0_2 = arith.constant 0 : index
    %1 = vector.load %arg2[%c0_1, %c0_2] : memref<32x1xf32, #tpu.memory_space<vmem>>, vector<32x1xf32>
    %2 = vector.broadcast %1 : vector<32x1xf32> to vector<32x2xf32>
    %3 = arith.subf %0, %2 : vector<32x2xf32>
    %4 = arith.mulf %3, %3 : vector<32x2xf32>
    %c0_3 = arith.constant 0 : index
    %c0_4 = arith.constant 0 : index
    %5 = vector.load %arg3[%c0_3, %c0_4] : memref<32x1xf32, #tpu.memory_space<vmem>>, vector<32x1xf32>
    %6 = vector.broadcast %5 : vector<32x1xf32> to vector<32x2xf32>
    %7 = arith.mulf %4, %6 : vector<32x2xf32>
    %8 = math.exp %7 : vector<32x2xf32>
    %c0_5 = arith.constant 0 : index
    %c0_6 = arith.constant 0 : index
    %9 = vector.load %arg4[%c0_5, %c0_6] : memref<32x32xf32, #tpu.memory_space<vmem>>, vector<32x32xf32>
    %c0_7 = arith.constant 0 : index
    %c0_8 = arith.constant 0 : index
    %10 = vector.load %arg6[%c0_7, %c0_8] : memref<32x32xf32, #tpu.memory_space<vmem>>, vector<32x32xf32>
    %c0_9 = arith.constant 0 : index
    %c0_10 = arith.constant 0 : index
    %11 = vector.load %arg8[%c0_9, %c0_10] : memref<8x32xf32, #tpu.memory_space<vmem>>, vector<8x32xf32>
    %c0_11 = arith.constant 0 : index
    %c0_12 = arith.constant 0 : index
    %12 = vector.load %arg5[%c0_11, %c0_12] : memref<32x1xf32, #tpu.memory_space<vmem>>, vector<32x1xf32>
    %c0_13 = arith.constant 0 : index
    %c0_14 = arith.constant 0 : index
    %13 = vector.load %arg7[%c0_13, %c0_14] : memref<32x1xf32, #tpu.memory_space<vmem>>, vector<32x1xf32>
    %c0_15 = arith.constant 0 : index
    %c0_16 = arith.constant 0 : index
    %14 = vector.load %arg9[%c0_15, %c0_16] : memref<8x1xf32, #tpu.memory_space<vmem>>, vector<8x1xf32>
    %cst = arith.constant 0.000000e+00 : f32
    %15 = vector.broadcast %cst : f32 to vector<32x2xf32>
    %cst_17 = arith.constant 0.000000e+00 : f32
    %16 = vector.broadcast %cst_17 : f32 to vector<32x2xf32>
    %cst_18 = arith.constant 0.000000e+00 : f32
    %17 = vector.broadcast %cst_18 : f32 to vector<8x2xf32>
    %cst_19 = arith.constant 0.000000e+00 : f32
    %18 = vector.broadcast %cst_19 : f32 to vector<32x2xf32>
    %19 = arith.addf %18, %8 : vector<32x2xf32>
    %cst_20 = arith.constant 9.990000e-01 : f32
    %20 = vector.broadcast %cst_20 : f32 to vector<32x2xf32>
    %21 = arith.cmpf ogt, %19, %20 : vector<32x2xf32>
    %22 = arith.extui %21 : vector<32x2xi1> to vector<32x2xi32>
    %23 = arith.sitofp %22 : vector<32x2xi32> to vector<32x2xf32>
    %cst_21 = arith.constant 9.990000e-01 : f32
    %24 = vector.broadcast %cst_21 : f32 to vector<32x2xf32>
    %25 = arith.mulf %23, %24 : vector<32x2xf32>
    %26 = arith.subf %19, %25 : vector<32x2xf32>
    %cst_22 = arith.constant 5.000000e-01 : f32
    %27 = vector.broadcast %cst_22 : f32 to vector<32x2xf32>
    %28 = arith.mulf %15, %27 : vector<32x2xf32>
    %cst_23 = arith.constant dense<0.000000e+00> : vector<32x2xf32>
    %29 = tpu.matmul %9, %23, %cst_23 {dimension_numbers = #tpu.dot_dimension_numbers<[1], [0], [0], [1], [0, 0, 1, 1], [], []>, precision = #tpu.contract_precision<fp32>} : vector<32x32xf32>, vector<32x2xf32>, vector<32x2xf32> -> vector<32x2xf32>
    %30 = arith.addf %28, %29 : vector<32x2xf32>
    %31 = vector.broadcast %12 : vector<32x1xf32> to vector<32x2xf32>
    %32 = arith.addf %30, %31 : vector<32x2xf32>
    %cst_24 = arith.constant 0.000000e+00 : f32
    %33 = vector.broadcast %cst_24 : f32 to vector<32x2xf32>
    %34 = arith.cmpf ogt, %15, %33 : vector<32x2xf32>
    %cst_25 = arith.constant 7.500000e-01 : f32
    %35 = vector.broadcast %cst_25 : f32 to vector<32x2xf32>
    %36 = arith.mulf %15, %35 : vector<32x2xf32>
    %cst_26 = arith.constant 0.000000e+00 : f32
    %37 = vector.broadcast %cst_26 : f32 to vector<32x2xf32>
    %38 = arith.select %34, %37, %36 : vector<32x2xi1>, vector<32x2xf32>
    %39 = arith.addf %38, %32 : vector<32x2xf32>
    %cst_27 = arith.constant 5.000000e-01 : f32
    %40 = vector.broadcast %cst_27 : f32 to vector<32x2xf32>
    %41 = arith.cmpf ogt, %39, %40 : vector<32x2xf32>
    %42 = arith.extui %41 : vector<32x2xi1> to vector<32x2xi32>
    %43 = arith.sitofp %42 : vector<32x2xi32> to vector<32x2xf32>
    %cst_28 = arith.constant 5.000000e-01 : f32
    %44 = vector.broadcast %cst_28 : f32 to vector<32x2xf32>
    %45 = arith.mulf %16, %44 : vector<32x2xf32>
    %cst_29 = arith.constant dense<0.000000e+00> : vector<32x2xf32>
    %46 = tpu.matmul %10, %43, %cst_29 {dimension_numbers = #tpu.dot_dimension_numbers<[1], [0], [0], [1], [0, 0, 1, 1], [], []>, precision = #tpu.contract_precision<fp32>} : vector<32x32xf32>, vector<32x2xf32>, vector<32x2xf32> -> vector<32x2xf32>
    %47 = arith.addf %45, %46 : vector<32x2xf32>
    %48 = vector.broadcast %13 : vector<32x1xf32> to vector<32x2xf32>
    %49 = arith.addf %47, %48 : vector<32x2xf32>
    %cst_30 = arith.constant 0.000000e+00 : f32
    %50 = vector.broadcast %cst_30 : f32 to vector<32x2xf32>
    %51 = arith.cmpf ogt, %16, %50 : vector<32x2xf32>
    %cst_31 = arith.constant 7.500000e-01 : f32
    %52 = vector.broadcast %cst_31 : f32 to vector<32x2xf32>
    %53 = arith.mulf %16, %52 : vector<32x2xf32>
    %cst_32 = arith.constant 0.000000e+00 : f32
    %54 = vector.broadcast %cst_32 : f32 to vector<32x2xf32>
    %55 = arith.select %51, %54, %53 : vector<32x2xi1>, vector<32x2xf32>
    %56 = arith.addf %55, %49 : vector<32x2xf32>
    %cst_33 = arith.constant 5.000000e-01 : f32
    %57 = vector.broadcast %cst_33 : f32 to vector<32x2xf32>
    %58 = arith.cmpf ogt, %56, %57 : vector<32x2xf32>
    %59 = arith.extui %58 : vector<32x2xi1> to vector<32x2xi32>
    %60 = arith.sitofp %59 : vector<32x2xi32> to vector<32x2xf32>
    %cst_34 = arith.constant 5.000000e-01 : f32
    %61 = vector.broadcast %cst_34 : f32 to vector<8x2xf32>
    %62 = arith.mulf %17, %61 : vector<8x2xf32>
    %cst_35 = arith.constant dense<0.000000e+00> : vector<8x2xf32>
    %63 = tpu.matmul %11, %60, %cst_35 {dimension_numbers = #tpu.dot_dimension_numbers<[1], [0], [0], [1], [0, 0, 1, 1], [], []>, precision = #tpu.contract_precision<fp32>} : vector<8x32xf32>, vector<32x2xf32>, vector<8x2xf32> -> vector<8x2xf32>
    %64 = arith.addf %62, %63 : vector<8x2xf32>
    %65 = vector.broadcast %14 : vector<8x1xf32> to vector<8x2xf32>
    %66 = arith.addf %64, %65 : vector<8x2xf32>
    %cst_36 = arith.constant 0.000000e+00 : f32
    %67 = vector.broadcast %cst_36 : f32 to vector<8x2xf32>
    %68 = arith.cmpf ogt, %17, %67 : vector<8x2xf32>
    %cst_37 = arith.constant 7.500000e-01 : f32
    %69 = vector.broadcast %cst_37 : f32 to vector<8x2xf32>
    %70 = arith.mulf %17, %69 : vector<8x2xf32>
    %cst_38 = arith.constant 0.000000e+00 : f32
    %71 = vector.broadcast %cst_38 : f32 to vector<8x2xf32>
    %72 = arith.select %68, %71, %70 : vector<8x2xi1>, vector<8x2xf32>
    %73 = arith.addf %72, %66 : vector<8x2xf32>
    %cst_39 = arith.constant 5.000000e-01 : f32
    %74 = vector.broadcast %cst_39 : f32 to vector<8x2xf32>
    %75 = arith.cmpf ogt, %73, %74 : vector<8x2xf32>
    %76 = arith.extui %75 : vector<8x2xi1> to vector<8x2xi32>
    %77 = arith.sitofp %76 : vector<8x2xi32> to vector<8x2xf32>
    %78 = arith.addf %17, %77 : vector<8x2xf32>
    %79 = arith.addf %26, %8 : vector<32x2xf32>
    %cst_40 = arith.constant 9.990000e-01 : f32
    %80 = vector.broadcast %cst_40 : f32 to vector<32x2xf32>
    %81 = arith.cmpf ogt, %79, %80 : vector<32x2xf32>
    %82 = arith.extui %81 : vector<32x2xi1> to vector<32x2xi32>
    %83 = arith.sitofp %82 : vector<32x2xi32> to vector<32x2xf32>
    %cst_41 = arith.constant 9.990000e-01 : f32
    %84 = vector.broadcast %cst_41 : f32 to vector<32x2xf32>
    %85 = arith.mulf %83, %84 : vector<32x2xf32>
    %86 = arith.subf %79, %85 : vector<32x2xf32>
    %cst_42 = arith.constant 5.000000e-01 : f32
    %87 = vector.broadcast %cst_42 : f32 to vector<32x2xf32>
    %88 = arith.mulf %32, %87 : vector<32x2xf32>
    %cst_43 = arith.constant dense<0.000000e+00> : vector<32x2xf32>
    %89 = tpu.matmul %9, %83, %cst_43 {dimension_numbers = #tpu.dot_dimension_numbers<[1], [0], [0], [1], [0, 0, 1, 1], [], []>, precision = #tpu.contract_precision<fp32>} : vector<32x32xf32>, vector<32x2xf32>, vector<32x2xf32> -> vector<32x2xf32>
    %90 = arith.addf %88, %89 : vector<32x2xf32>
    %91 = vector.broadcast %12 : vector<32x1xf32> to vector<32x2xf32>
    %92 = arith.addf %90, %91 : vector<32x2xf32>
    %cst_44 = arith.constant 0.000000e+00 : f32
    %93 = vector.broadcast %cst_44 : f32 to vector<32x2xf32>
    %94 = arith.cmpf ogt, %43, %93 : vector<32x2xf32>
    %cst_45 = arith.constant 7.500000e-01 : f32
    %95 = vector.broadcast %cst_45 : f32 to vector<32x2xf32>
    %96 = arith.mulf %39, %95 : vector<32x2xf32>
    %cst_46 = arith.constant 0.000000e+00 : f32
    %97 = vector.broadcast %cst_46 : f32 to vector<32x2xf32>
    %98 = arith.select %94, %97, %96 : vector<32x2xi1>, vector<32x2xf32>
    %99 = arith.addf %98, %92 : vector<32x2xf32>
    %cst_47 = arith.constant 5.000000e-01 : f32
    %100 = vector.broadcast %cst_47 : f32 to vector<32x2xf32>
    %101 = arith.cmpf ogt, %99, %100 : vector<32x2xf32>
    %102 = arith.extui %101 : vector<32x2xi1> to vector<32x2xi32>
    %103 = arith.sitofp %102 : vector<32x2xi32> to vector<32x2xf32>
    %cst_48 = arith.constant 5.000000e-01 : f32
    %104 = vector.broadcast %cst_48 : f32 to vector<32x2xf32>
    %105 = arith.mulf %49, %104 : vector<32x2xf32>
    %cst_49 = arith.constant dense<0.000000e+00> : vector<32x2xf32>
    %106 = tpu.matmul %10, %103, %cst_49 {dimension_numbers = #tpu.dot_dimension_numbers<[1], [0], [0], [1], [0, 0, 1, 1], [], []>, precision = #tpu.contract_precision<fp32>} : vector<32x32xf32>, vector<32x2xf32>, vector<32x2xf32> -> vector<32x2xf32>
    %107 = arith.addf %105, %106 : vector<32x2xf32>
    %108 = vector.broadcast %13 : vector<32x1xf32> to vector<32x2xf32>
    %109 = arith.addf %107, %108 : vector<32x2xf32>
    %cst_50 = arith.constant 0.000000e+00 : f32
    %110 = vector.broadcast %cst_50 : f32 to vector<32x2xf32>
    %111 = arith.cmpf ogt, %60, %110 : vector<32x2xf32>
    %cst_51 = arith.constant 7.500000e-01 : f32
    %112 = vector.broadcast %cst_51 : f32 to vector<32x2xf32>
    %113 = arith.mulf %56, %112 : vector<32x2xf32>
    %cst_52 = arith.constant 0.000000e+00 : f32
    %114 = vector.broadcast %cst_52 : f32 to vector<32x2xf32>
    %115 = arith.select %111, %114, %113 : vector<32x2xi1>, vector<32x2xf32>
    %116 = arith.addf %115, %109 : vector<32x2xf32>
    %cst_53 = arith.constant 5.000000e-01 : f32
    %117 = vector.broadcast %cst_53 : f32 to vector<32x2xf32>
    %118 = arith.cmpf ogt, %116, %117 : vector<32x2xf32>
    %119 = arith.extui %118 : vector<32x2xi1> to vector<32x2xi32>
    %120 = arith.sitofp %119 : vector<32x2xi32> to vector<32x2xf32>
    %cst_54 = arith.constant 5.000000e-01 : f32
    %121 = vector.broadcast %cst_54 : f32 to vector<8x2xf32>
    %122 = arith.mulf %66, %121 : vector<8x2xf32>
    %cst_55 = arith.constant dense<0.000000e+00> : vector<8x2xf32>
    %123 = tpu.matmul %11, %120, %cst_55 {dimension_numbers = #tpu.dot_dimension_numbers<[1], [0], [0], [1], [0, 0, 1, 1], [], []>, precision = #tpu.contract_precision<fp32>} : vector<8x32xf32>, vector<32x2xf32>, vector<8x2xf32> -> vector<8x2xf32>
    %124 = arith.addf %122, %123 : vector<8x2xf32>
    %125 = vector.broadcast %14 : vector<8x1xf32> to vector<8x2xf32>
    %126 = arith.addf %124, %125 : vector<8x2xf32>
    %cst_56 = arith.constant 0.000000e+00 : f32
    %127 = vector.broadcast %cst_56 : f32 to vector<8x2xf32>
    %128 = arith.cmpf ogt, %77, %127 : vector<8x2xf32>
    %cst_57 = arith.constant 7.500000e-01 : f32
    %129 = vector.broadcast %cst_57 : f32 to vector<8x2xf32>
    %130 = arith.mulf %73, %129 : vector<8x2xf32>
    %cst_58 = arith.constant 0.000000e+00 : f32
    %131 = vector.broadcast %cst_58 : f32 to vector<8x2xf32>
    %132 = arith.select %128, %131, %130 : vector<8x2xi1>, vector<8x2xf32>
    %133 = arith.addf %132, %126 : vector<8x2xf32>
    %cst_59 = arith.constant 5.000000e-01 : f32
    %134 = vector.broadcast %cst_59 : f32 to vector<8x2xf32>
    %135 = arith.cmpf ogt, %133, %134 : vector<8x2xf32>
    %136 = arith.extui %135 : vector<8x2xi1> to vector<8x2xi32>
    %137 = arith.sitofp %136 : vector<8x2xi32> to vector<8x2xf32>
    %138 = arith.addf %78, %137 : vector<8x2xf32>
    %139 = arith.addf %86, %8 : vector<32x2xf32>
    %cst_60 = arith.constant 9.990000e-01 : f32
    %140 = vector.broadcast %cst_60 : f32 to vector<32x2xf32>
    %141 = arith.cmpf ogt, %139, %140 : vector<32x2xf32>
    %142 = arith.extui %141 : vector<32x2xi1> to vector<32x2xi32>
    %143 = arith.sitofp %142 : vector<32x2xi32> to vector<32x2xf32>
    %cst_61 = arith.constant 9.990000e-01 : f32
    %144 = vector.broadcast %cst_61 : f32 to vector<32x2xf32>
    %145 = arith.mulf %143, %144 : vector<32x2xf32>
    %146 = arith.subf %139, %145 : vector<32x2xf32>
    %cst_62 = arith.constant 5.000000e-01 : f32
    %147 = vector.broadcast %cst_62 : f32 to vector<32x2xf32>
    %148 = arith.mulf %92, %147 : vector<32x2xf32>
    %cst_63 = arith.constant dense<0.000000e+00> : vector<32x2xf32>
    %149 = tpu.matmul %9, %143, %cst_63 {dimension_numbers = #tpu.dot_dimension_numbers<[1], [0], [0], [1], [0, 0, 1, 1], [], []>, precision = #tpu.contract_precision<fp32>} : vector<32x32xf32>, vector<32x2xf32>, vector<32x2xf32> -> vector<32x2xf32>
    %150 = arith.addf %148, %149 : vector<32x2xf32>
    %151 = vector.broadcast %12 : vector<32x1xf32> to vector<32x2xf32>
    %152 = arith.addf %150, %151 : vector<32x2xf32>
    %cst_64 = arith.constant 0.000000e+00 : f32
    %153 = vector.broadcast %cst_64 : f32 to vector<32x2xf32>
    %154 = arith.cmpf ogt, %103, %153 : vector<32x2xf32>
    %cst_65 = arith.constant 7.500000e-01 : f32
    %155 = vector.broadcast %cst_65 : f32 to vector<32x2xf32>
    %156 = arith.mulf %99, %155 : vector<32x2xf32>
    %cst_66 = arith.constant 0.000000e+00 : f32
    %157 = vector.broadcast %cst_66 : f32 to vector<32x2xf32>
    %158 = arith.select %154, %157, %156 : vector<32x2xi1>, vector<32x2xf32>
    %159 = arith.addf %158, %152 : vector<32x2xf32>
    %cst_67 = arith.constant 5.000000e-01 : f32
    %160 = vector.broadcast %cst_67 : f32 to vector<32x2xf32>
    %161 = arith.cmpf ogt, %159, %160 : vector<32x2xf32>
    %162 = arith.extui %161 : vector<32x2xi1> to vector<32x2xi32>
    %163 = arith.sitofp %162 : vector<32x2xi32> to vector<32x2xf32>
    %cst_68 = arith.constant 5.000000e-01 : f32
    %164 = vector.broadcast %cst_68 : f32 to vector<32x2xf32>
    %165 = arith.mulf %109, %164 : vector<32x2xf32>
    %cst_69 = arith.constant dense<0.000000e+00> : vector<32x2xf32>
    %166 = tpu.matmul %10, %163, %cst_69 {dimension_numbers = #tpu.dot_dimension_numbers<[1], [0], [0], [1], [0, 0, 1, 1], [], []>, precision = #tpu.contract_precision<fp32>} : vector<32x32xf32>, vector<32x2xf32>, vector<32x2xf32> -> vector<32x2xf32>
    %167 = arith.addf %165, %166 : vector<32x2xf32>
    %168 = vector.broadcast %13 : vector<32x1xf32> to vector<32x2xf32>
    %169 = arith.addf %167, %168 : vector<32x2xf32>
    %cst_70 = arith.constant 0.000000e+00 : f32
    %170 = vector.broadcast %cst_70 : f32 to vector<32x2xf32>
    %171 = arith.cmpf ogt, %120, %170 : vector<32x2xf32>
    %cst_71 = arith.constant 7.500000e-01 : f32
    %172 = vector.broadcast %cst_71 : f32 to vector<32x2xf32>
    %173 = arith.mulf %116, %172 : vector<32x2xf32>
    %cst_72 = arith.constant 0.000000e+00 : f32
    %174 = vector.broadcast %cst_72 : f32 to vector<32x2xf32>
    %175 = arith.select %171, %174, %173 : vector<32x2xi1>, vector<32x2xf32>
    %176 = arith.addf %175, %169 : vector<32x2xf32>
    %cst_73 = arith.constant 5.000000e-01 : f32
    %177 = vector.broadcast %cst_73 : f32 to vector<32x2xf32>
    %178 = arith.cmpf ogt, %176, %177 : vector<32x2xf32>
    %179 = arith.extui %178 : vector<32x2xi1> to vector<32x2xi32>
    %180 = arith.sitofp %179 : vector<32x2xi32> to vector<32x2xf32>
    %cst_74 = arith.constant 5.000000e-01 : f32
    %181 = vector.broadcast %cst_74 : f32 to vector<8x2xf32>
    %182 = arith.mulf %126, %181 : vector<8x2xf32>
    %cst_75 = arith.constant dense<0.000000e+00> : vector<8x2xf32>
    %183 = tpu.matmul %11, %180, %cst_75 {dimension_numbers = #tpu.dot_dimension_numbers<[1], [0], [0], [1], [0, 0, 1, 1], [], []>, precision = #tpu.contract_precision<fp32>} : vector<8x32xf32>, vector<32x2xf32>, vector<8x2xf32> -> vector<8x2xf32>
    %184 = arith.addf %182, %183 : vector<8x2xf32>
    %185 = vector.broadcast %14 : vector<8x1xf32> to vector<8x2xf32>
    %186 = arith.addf %184, %185 : vector<8x2xf32>
    %cst_76 = arith.constant 0.000000e+00 : f32
    %187 = vector.broadcast %cst_76 : f32 to vector<8x2xf32>
    %188 = arith.cmpf ogt, %137, %187 : vector<8x2xf32>
    %cst_77 = arith.constant 7.500000e-01 : f32
    %189 = vector.broadcast %cst_77 : f32 to vector<8x2xf32>
    %190 = arith.mulf %133, %189 : vector<8x2xf32>
    %cst_78 = arith.constant 0.000000e+00 : f32
    %191 = vector.broadcast %cst_78 : f32 to vector<8x2xf32>
    %192 = arith.select %188, %191, %190 : vector<8x2xi1>, vector<8x2xf32>
    %193 = arith.addf %192, %186 : vector<8x2xf32>
    %cst_79 = arith.constant 5.000000e-01 : f32
    %194 = vector.broadcast %cst_79 : f32 to vector<8x2xf32>
    %195 = arith.cmpf ogt, %193, %194 : vector<8x2xf32>
    %196 = arith.extui %195 : vector<8x2xi1> to vector<8x2xi32>
    %197 = arith.sitofp %196 : vector<8x2xi32> to vector<8x2xf32>
    %198 = arith.addf %138, %197 : vector<8x2xf32>
    %199 = arith.addf %146, %8 : vector<32x2xf32>
    %cst_80 = arith.constant 9.990000e-01 : f32
    %200 = vector.broadcast %cst_80 : f32 to vector<32x2xf32>
    %201 = arith.cmpf ogt, %199, %200 : vector<32x2xf32>
    %202 = arith.extui %201 : vector<32x2xi1> to vector<32x2xi32>
    %203 = arith.sitofp %202 : vector<32x2xi32> to vector<32x2xf32>
    %cst_81 = arith.constant 9.990000e-01 : f32
    %204 = vector.broadcast %cst_81 : f32 to vector<32x2xf32>
    %205 = arith.mulf %203, %204 : vector<32x2xf32>
    %206 = arith.subf %199, %205 : vector<32x2xf32>
    %cst_82 = arith.constant 5.000000e-01 : f32
    %207 = vector.broadcast %cst_82 : f32 to vector<32x2xf32>
    %208 = arith.mulf %152, %207 : vector<32x2xf32>
    %cst_83 = arith.constant dense<0.000000e+00> : vector<32x2xf32>
    %209 = tpu.matmul %9, %203, %cst_83 {dimension_numbers = #tpu.dot_dimension_numbers<[1], [0], [0], [1], [0, 0, 1, 1], [], []>, precision = #tpu.contract_precision<fp32>} : vector<32x32xf32>, vector<32x2xf32>, vector<32x2xf32> -> vector<32x2xf32>
    %210 = arith.addf %208, %209 : vector<32x2xf32>
    %211 = vector.broadcast %12 : vector<32x1xf32> to vector<32x2xf32>
    %212 = arith.addf %210, %211 : vector<32x2xf32>
    %cst_84 = arith.constant 0.000000e+00 : f32
    %213 = vector.broadcast %cst_84 : f32 to vector<32x2xf32>
    %214 = arith.cmpf ogt, %163, %213 : vector<32x2xf32>
    %cst_85 = arith.constant 7.500000e-01 : f32
    %215 = vector.broadcast %cst_85 : f32 to vector<32x2xf32>
    %216 = arith.mulf %159, %215 : vector<32x2xf32>
    %cst_86 = arith.constant 0.000000e+00 : f32
    %217 = vector.broadcast %cst_86 : f32 to vector<32x2xf32>
    %218 = arith.select %214, %217, %216 : vector<32x2xi1>, vector<32x2xf32>
    %219 = arith.addf %218, %212 : vector<32x2xf32>
    %cst_87 = arith.constant 5.000000e-01 : f32
    %220 = vector.broadcast %cst_87 : f32 to vector<32x2xf32>
    %221 = arith.cmpf ogt, %219, %220 : vector<32x2xf32>
    %222 = arith.extui %221 : vector<32x2xi1> to vector<32x2xi32>
    %223 = arith.sitofp %222 : vector<32x2xi32> to vector<32x2xf32>
    %cst_88 = arith.constant 5.000000e-01 : f32
    %224 = vector.broadcast %cst_88 : f32 to vector<32x2xf32>
    %225 = arith.mulf %169, %224 : vector<32x2xf32>
    %cst_89 = arith.constant dense<0.000000e+00> : vector<32x2xf32>
    %226 = tpu.matmul %10, %223, %cst_89 {dimension_numbers = #tpu.dot_dimension_numbers<[1], [0], [0], [1], [0, 0, 1, 1], [], []>, precision = #tpu.contract_precision<fp32>} : vector<32x32xf32>, vector<32x2xf32>, vector<32x2xf32> -> vector<32x2xf32>
    %227 = arith.addf %225, %226 : vector<32x2xf32>
    %228 = vector.broadcast %13 : vector<32x1xf32> to vector<32x2xf32>
    %229 = arith.addf %227, %228 : vector<32x2xf32>
    %cst_90 = arith.constant 0.000000e+00 : f32
    %230 = vector.broadcast %cst_90 : f32 to vector<32x2xf32>
    %231 = arith.cmpf ogt, %180, %230 : vector<32x2xf32>
    %cst_91 = arith.constant 7.500000e-01 : f32
    %232 = vector.broadcast %cst_91 : f32 to vector<32x2xf32>
    %233 = arith.mulf %176, %232 : vector<32x2xf32>
    %cst_92 = arith.constant 0.000000e+00 : f32
    %234 = vector.broadcast %cst_92 : f32 to vector<32x2xf32>
    %235 = arith.select %231, %234, %233 : vector<32x2xi1>, vector<32x2xf32>
    %236 = arith.addf %235, %229 : vector<32x2xf32>
    %cst_93 = arith.constant 5.000000e-01 : f32
    %237 = vector.broadcast %cst_93 : f32 to vector<32x2xf32>
    %238 = arith.cmpf ogt, %236, %237 : vector<32x2xf32>
    %239 = arith.extui %238 : vector<32x2xi1> to vector<32x2xi32>
    %240 = arith.sitofp %239 : vector<32x2xi32> to vector<32x2xf32>
    %cst_94 = arith.constant 5.000000e-01 : f32
    %241 = vector.broadcast %cst_94 : f32 to vector<8x2xf32>
    %242 = arith.mulf %186, %241 : vector<8x2xf32>
    %cst_95 = arith.constant dense<0.000000e+00> : vector<8x2xf32>
    %243 = tpu.matmul %11, %240, %cst_95 {dimension_numbers = #tpu.dot_dimension_numbers<[1], [0], [0], [1], [0, 0, 1, 1], [], []>, precision = #tpu.contract_precision<fp32>} : vector<8x32xf32>, vector<32x2xf32>, vector<8x2xf32> -> vector<8x2xf32>
    %244 = arith.addf %242, %243 : vector<8x2xf32>
    %245 = vector.broadcast %14 : vector<8x1xf32> to vector<8x2xf32>
    %246 = arith.addf %244, %245 : vector<8x2xf32>
    %cst_96 = arith.constant 0.000000e+00 : f32
    %247 = vector.broadcast %cst_96 : f32 to vector<8x2xf32>
    %248 = arith.cmpf ogt, %197, %247 : vector<8x2xf32>
    %cst_97 = arith.constant 7.500000e-01 : f32
    %249 = vector.broadcast %cst_97 : f32 to vector<8x2xf32>
    %250 = arith.mulf %193, %249 : vector<8x2xf32>
    %cst_98 = arith.constant 0.000000e+00 : f32
    %251 = vector.broadcast %cst_98 : f32 to vector<8x2xf32>
    %252 = arith.select %248, %251, %250 : vector<8x2xi1>, vector<8x2xf32>
    %253 = arith.addf %252, %246 : vector<8x2xf32>
    %cst_99 = arith.constant 5.000000e-01 : f32
    %254 = vector.broadcast %cst_99 : f32 to vector<8x2xf32>
    %255 = arith.cmpf ogt, %253, %254 : vector<8x2xf32>
    %256 = arith.extui %255 : vector<8x2xi1> to vector<8x2xi32>
    %257 = arith.sitofp %256 : vector<8x2xi32> to vector<8x2xf32>
    %258 = arith.addf %198, %257 : vector<8x2xf32>
    %259 = arith.addf %206, %8 : vector<32x2xf32>
    %cst_100 = arith.constant 9.990000e-01 : f32
    %260 = vector.broadcast %cst_100 : f32 to vector<32x2xf32>
    %261 = arith.cmpf ogt, %259, %260 : vector<32x2xf32>
    %262 = arith.extui %261 : vector<32x2xi1> to vector<32x2xi32>
    %263 = arith.sitofp %262 : vector<32x2xi32> to vector<32x2xf32>
    %cst_101 = arith.constant 5.000000e-01 : f32
    %264 = vector.broadcast %cst_101 : f32 to vector<32x2xf32>
    %265 = arith.mulf %212, %264 : vector<32x2xf32>
    %cst_102 = arith.constant dense<0.000000e+00> : vector<32x2xf32>
    %266 = tpu.matmul %9, %263, %cst_102 {dimension_numbers = #tpu.dot_dimension_numbers<[1], [0], [0], [1], [0, 0, 1, 1], [], []>, precision = #tpu.contract_precision<fp32>} : vector<32x32xf32>, vector<32x2xf32>, vector<32x2xf32> -> vector<32x2xf32>
    %267 = arith.addf %265, %266 : vector<32x2xf32>
    %268 = vector.broadcast %12 : vector<32x1xf32> to vector<32x2xf32>
    %269 = arith.addf %267, %268 : vector<32x2xf32>
    %cst_103 = arith.constant 0.000000e+00 : f32
    %270 = vector.broadcast %cst_103 : f32 to vector<32x2xf32>
    %271 = arith.cmpf ogt, %223, %270 : vector<32x2xf32>
    %cst_104 = arith.constant 7.500000e-01 : f32
    %272 = vector.broadcast %cst_104 : f32 to vector<32x2xf32>
    %273 = arith.mulf %219, %272 : vector<32x2xf32>
    %cst_105 = arith.constant 0.000000e+00 : f32
    %274 = vector.broadcast %cst_105 : f32 to vector<32x2xf32>
    %275 = arith.select %271, %274, %273 : vector<32x2xi1>, vector<32x2xf32>
    %276 = arith.addf %275, %269 : vector<32x2xf32>
    %cst_106 = arith.constant 5.000000e-01 : f32
    %277 = vector.broadcast %cst_106 : f32 to vector<32x2xf32>
    %278 = arith.cmpf ogt, %276, %277 : vector<32x2xf32>
    %279 = arith.extui %278 : vector<32x2xi1> to vector<32x2xi32>
    %280 = arith.sitofp %279 : vector<32x2xi32> to vector<32x2xf32>
    %cst_107 = arith.constant 5.000000e-01 : f32
    %281 = vector.broadcast %cst_107 : f32 to vector<32x2xf32>
    %282 = arith.mulf %229, %281 : vector<32x2xf32>
    %cst_108 = arith.constant dense<0.000000e+00> : vector<32x2xf32>
    %283 = tpu.matmul %10, %280, %cst_108 {dimension_numbers = #tpu.dot_dimension_numbers<[1], [0], [0], [1], [0, 0, 1, 1], [], []>, precision = #tpu.contract_precision<fp32>} : vector<32x32xf32>, vector<32x2xf32>, vector<32x2xf32> -> vector<32x2xf32>
    %284 = arith.addf %282, %283 : vector<32x2xf32>
    %285 = vector.broadcast %13 : vector<32x1xf32> to vector<32x2xf32>
    %286 = arith.addf %284, %285 : vector<32x2xf32>
    %cst_109 = arith.constant 0.000000e+00 : f32
    %287 = vector.broadcast %cst_109 : f32 to vector<32x2xf32>
    %288 = arith.cmpf ogt, %240, %287 : vector<32x2xf32>
    %cst_110 = arith.constant 7.500000e-01 : f32
    %289 = vector.broadcast %cst_110 : f32 to vector<32x2xf32>
    %290 = arith.mulf %236, %289 : vector<32x2xf32>
    %cst_111 = arith.constant 0.000000e+00 : f32
    %291 = vector.broadcast %cst_111 : f32 to vector<32x2xf32>
    %292 = arith.select %288, %291, %290 : vector<32x2xi1>, vector<32x2xf32>
    %293 = arith.addf %292, %286 : vector<32x2xf32>
    %cst_112 = arith.constant 5.000000e-01 : f32
    %294 = vector.broadcast %cst_112 : f32 to vector<32x2xf32>
    %295 = arith.cmpf ogt, %293, %294 : vector<32x2xf32>
    %296 = arith.extui %295 : vector<32x2xi1> to vector<32x2xi32>
    %297 = arith.sitofp %296 : vector<32x2xi32> to vector<32x2xf32>
    %cst_113 = arith.constant 5.000000e-01 : f32
    %298 = vector.broadcast %cst_113 : f32 to vector<8x2xf32>
    %299 = arith.mulf %246, %298 : vector<8x2xf32>
    %cst_114 = arith.constant dense<0.000000e+00> : vector<8x2xf32>
    %300 = tpu.matmul %11, %297, %cst_114 {dimension_numbers = #tpu.dot_dimension_numbers<[1], [0], [0], [1], [0, 0, 1, 1], [], []>, precision = #tpu.contract_precision<fp32>} : vector<8x32xf32>, vector<32x2xf32>, vector<8x2xf32> -> vector<8x2xf32>
    %301 = arith.addf %299, %300 : vector<8x2xf32>
    %302 = vector.broadcast %14 : vector<8x1xf32> to vector<8x2xf32>
    %303 = arith.addf %301, %302 : vector<8x2xf32>
    %cst_115 = arith.constant 0.000000e+00 : f32
    %304 = vector.broadcast %cst_115 : f32 to vector<8x2xf32>
    %305 = arith.cmpf ogt, %257, %304 : vector<8x2xf32>
    %cst_116 = arith.constant 7.500000e-01 : f32
    %306 = vector.broadcast %cst_116 : f32 to vector<8x2xf32>
    %307 = arith.mulf %253, %306 : vector<8x2xf32>
    %cst_117 = arith.constant 0.000000e+00 : f32
    %308 = vector.broadcast %cst_117 : f32 to vector<8x2xf32>
    %309 = arith.select %305, %308, %307 : vector<8x2xi1>, vector<8x2xf32>
    %310 = arith.addf %309, %303 : vector<8x2xf32>
    %cst_118 = arith.constant 5.000000e-01 : f32
    %311 = vector.broadcast %cst_118 : f32 to vector<8x2xf32>
    %312 = arith.cmpf ogt, %310, %311 : vector<8x2xf32>
    %313 = arith.extui %312 : vector<8x2xi1> to vector<8x2xi32>
    %314 = arith.sitofp %313 : vector<8x2xi32> to vector<8x2xf32>
    %315 = arith.addf %258, %314 : vector<8x2xf32>
    %cst_119 = arith.constant 2.000000e-01 : f32
    %316 = vector.broadcast %cst_119 : f32 to vector<8x2xf32>
    %317 = arith.mulf %315, %316 : vector<8x2xf32>
    %c0_120 = arith.constant 0 : index
    %c0_121 = arith.constant 0 : index
    %318 = vector.load %arg10[%c0_120, %c0_121] : memref<2x8xf32, #tpu.memory_space<vmem>>, vector<2x8xf32>
    %cst_122 = arith.constant dense<0.000000e+00> : vector<2x2xf32>
    %319 = tpu.matmul %318, %317, %cst_122 {dimension_numbers = #tpu.dot_dimension_numbers<[1], [0], [0], [1], [0, 0, 1, 1], [], []>, precision = #tpu.contract_precision<fp32>} : vector<2x8xf32>, vector<8x2xf32>, vector<2x2xf32> -> vector<2x2xf32>
    %c0_123 = arith.constant 0 : index
    %c0_124 = arith.constant 0 : index
    %320 = vector.load %arg11[%c0_123, %c0_124] : memref<2x1xf32, #tpu.memory_space<vmem>>, vector<2x1xf32>
    %321 = vector.broadcast %320 : vector<2x1xf32> to vector<2x2xf32>
    %322 = arith.addf %319, %321 : vector<2x2xf32>
    %323 = math.tanh %322 : vector<2x2xf32>
    %c0_125 = arith.constant 0 : index
    %c0_126 = arith.constant 0 : index
    %324 = vector.load %arg12[%c0_125, %c0_126] : memref<2x2xf32, #tpu.memory_space<vmem>>, vector<2x2xf32>
    tpu.vector_store %arg12[%c0_125, %c0_126], %323 {strides = array<i32>} : memref<2x2xf32, #tpu.memory_space<vmem>>, vector<2x2xf32>,
    return
  }
  func.func @transform_0(%arg0: i32) -> (i32, i32) {
    %c0_i32 = arith.constant 0 : i32
    %c0_i32_0 = arith.constant 0 : i32
    return %c0_i32, %arg0 : i32, i32
  }
  func.func @transform_1(%arg0: i32) -> (i32, i32) {
    %c0_i32 = arith.constant 0 : i32
    %c0_i32_0 = arith.constant 0 : i32
    %c0_i32_1 = arith.constant 0 : i32
    return %c0_i32, %c0_i32_0 : i32, i32
  }
  func.func @transform_2(%arg0: i32) -> (i32, i32) {
    %c0_i32 = arith.constant 0 : i32
    %c0_i32_0 = arith.constant 0 : i32
    %c0_i32_1 = arith.constant 0 : i32
    return %c0_i32, %c0_i32_0 : i32, i32
  }
  func.func @transform_3(%arg0: i32) -> (i32, i32) {
    %c0_i32 = arith.constant 0 : i32
    %c0_i32_0 = arith.constant 0 : i32
    %c0_i32_1 = arith.constant 0 : i32
    return %c0_i32, %c0_i32_0 : i32, i32
  }
  func.func @transform_4(%arg0: i32) -> (i32, i32) {
    %c0_i32 = arith.constant 0 : i32
    %c0_i32_0 = arith.constant 0 : i32
    %c0_i32_1 = arith.constant 0 : i32
    return %c0_i32, %c0_i32_0 : i32, i32
  }
  func.func @transform_5(%arg0: i32) -> (i32, i32) {
    %c0_i32 = arith.constant 0 : i32
    %c0_i32_0 = arith.constant 0 : i32
    %c0_i32_1 = arith.constant 0 : i32
    return %c0_i32, %c0_i32_0 : i32, i32
  }
  func.func @transform_6(%arg0: i32) -> (i32, i32) {
    %c0_i32 = arith.constant 0 : i32
    %c0_i32_0 = arith.constant 0 : i32
    %c0_i32_1 = arith.constant 0 : i32
    return %c0_i32, %c0_i32_0 : i32, i32
  }
  func.func @transform_7(%arg0: i32) -> (i32, i32) {
    %c0_i32 = arith.constant 0 : i32
    %c0_i32_0 = arith.constant 0 : i32
    %c0_i32_1 = arith.constant 0 : i32
    return %c0_i32, %c0_i32_0 : i32, i32
  }
  func.func @transform_8(%arg0: i32) -> (i32, i32) {
    %c0_i32 = arith.constant 0 : i32
    %c0_i32_0 = arith.constant 0 : i32
    %c0_i32_1 = arith.constant 0 : i32
    return %c0_i32, %c0_i32_0 : i32, i32
  }
  func.func @transform_9(%arg0: i32) -> (i32, i32) {
    %c0_i32 = arith.constant 0 : i32
    %c0_i32_0 = arith.constant 0 : i32
    %c0_i32_1 = arith.constant 0 : i32
    return %c0_i32, %c0_i32_0 : i32, i32
  }
  func.func @transform_10(%arg0: i32) -> (i32, i32) {
    %c0_i32 = arith.constant 0 : i32
    %c0_i32_0 = arith.constant 0 : i32
    %c0_i32_1 = arith.constant 0 : i32
    return %c0_i32, %c0_i32_0 : i32, i32
  }
  func.func @transform_11(%arg0: i32) -> (i32, i32) {
    %c0_i32 = arith.constant 0 : i32
    %c0_i32_0 = arith.constant 0 : i32
    return %c0_i32, %arg0 : i32, i32
  }
}

</mosaic_0001>

<bundles_post_ra>
// kernel: tpu_custom_call.1
= control target key start
LH: loop header
LB: loop body
LE: loop exit
PB: predicated region body
PF: predicated region fallthrough
CT: control target
= control target key end

     0   :  { %v12773_v2 = vmov 0   ;;  %s14622_s0 = inlined_call_operand.vmem [shape: f32[32,2], index: 0, kind: input, shape index: {}]   ;;  %s14623_s1 = inlined_call_operand.vmem [shape: f32[32,1], index: 1, kind: input, shape index: {}]   ;;  %s14624_s2 = inlined_call_operand.vmem [shape: f32[32,1], index: 2, kind: input, shape index: {}]   ;;  %s14625_s3 = inlined_call_operand.vmem [shape: f32[32,32], index: 3, kind: input, shape index: {}]   ;;  %s14626_s4 = inlined_call_operand.vmem [shape: f32[32,1], index: 4, kind: input, shape index: {}]   ;;  %s14627_s5 = inlined_call_operand.vmem [shape: f32[32,32], index: 5, kind: input, shape index: {}]   ;;  %s14628_s6 = inlined_call_operand.vmem [shape: f32[32,1], index: 6, kind: input, shape index: {}]   ;;  %s14629_s7 = inlined_call_operand.vmem [shape: f32[8,32], index: 7, kind: input, shape index: {}]   ;;  %s14630_s8 = inlined_call_operand.vmem [shape: f32[8,1], index: 8, kind: input, shape index: {}]   ;;  %s14631_s9 = inlined_call_operand.vmem [shape: f32[2,8], index: 9, kind: input, shape index: {}]   ;;  %s14632_s10 = inlined_call_operand.vmem [shape: f32[2,1], index: 10, kind: input, shape index: {}]   ;;  %s14633_s11 = inlined_call_operand.hbm [shape: f32[2,2], index: 11, kind: output, shape index: {}]  }
   0x1   :  { %v45_v0 = vld [vmem:[%s14623_s1 + $0x10] sm:$0xff]  ;;  %v43_v1 = vld [vmem:[%s14623_s1] sm:$0xff]  ;;  %12738 = vset.pattern.permute.xlu1 %v12773_v2  ;;  %12737 = vset.pattern.permute.xlu0 %v12773_v2  ;;  %v46_v3 = vld [vmem:[%s14623_s1 + $0x18] sm:$0xff] }
   0x2   :  { %59 = vperm.xlu1 %12738, %v45_v0   ;;  %49 = vperm.xlu0 %12737, %v43_v1   ;;  %v44_v4 = vld [vmem:[%s14623_s1 + $0x8] sm:$0xff]  ;;  %v75_v6 = vld [vmem:[%s14624_s2] sm:$0xff] }
   0x3   :  { %v76_v5 = vld [vmem:[%s14624_s2 + $0x8] sm:$0xff] }
   0x6   :  { %64 = vperm.xlu1 %12738, %v46_v3   ;;  %54 = vperm.xlu0 %12737, %v44_v4  }
   0x7   :  { %16 = vsyncpa [#allocation3], 0  ;;  %v78_v7 = vld [vmem:[%s14624_s2 + $0x18] sm:$0xff]  ;;  %v77_v8 = vld [vmem:[%s14624_s2 + $0x10] sm:$0xff]  ;;  %vm173_vm0 = vcmask 261120  }
   0x8   :  { %v121_v9 = vld [vmem:[%s14626_s4 + $0x8] sm:$0xff]  ;;  %v120_v10 = vld [vmem:[%s14626_s4] sm:$0xff]  ;;  %v123_v11 = vld [vmem:[%s14626_s4 + $0x18] sm:$0xff] }
   0x9   :  { %v122_v12 = vld [vmem:[%s14626_s4 + $0x10] sm:$0xff]  ;;  %v125_v13 = vld [vmem:[%s14628_s6 + $0x8] sm:$0xff]  ;;  %v124_v14 = vld [vmem:[%s14628_s6] sm:$0xff] }
   0xa   :  { %86 = vperm.xlu1 %12738, %v76_v5   ;;  %81 = vperm.xlu0 %12737, %v75_v6   ;;  %v111_v15 = vld [vmem:[%s14625_s3] sm:$0xff]  ;;  %v127_v18 = vld [vmem:[%s14628_s6 + $0x18] sm:$0xff]  ;;  %v126_v19 = vld [vmem:[%s14628_s6 + $0x10] sm:$0xff] }
   0xb   :  { %v175_v16 = vsel %vm173_vm0, %v111_v15, 0  ;;  %v9282_v22 = vld [vmem:[%s14632_s10] sm:$0x3]  ;;  %v40_v29 = vld [vmem:[%s14622_s0 + $0x8] sm:$0xff]  ;;  %v41_v31 = vld [vmem:[%s14622_s0 + $0x10] sm:$0xff] }
   0xc   :  { %v12885_v17 = vand.u32 4294901760, %v175_v16  ;;  %v128_v23 = vld [vmem:[%s14630_s8] sm:$0xff]  ;;  %v42_v33 = vld [vmem:[%s14622_s0 + $0x18] sm:$0xff]  ;;  %v112_v44 = vld [vmem:[%s14625_s3 + $0x8] sm:$0xff] }
   0xd   :  { %v39_v28 = vld [vmem:[%s14622_s0] sm:$0xff]  ;;  %v113_v45 = vld [vmem:[%s14625_s3 + $0x10] sm:$0xff]  ;;  %v114_v46 = vld [vmem:[%s14625_s3 + $0x18] sm:$0xff]  ;;  %v178_v53 = vsel %vm173_vm0, %v112_v44, 0 }
   0xe   :  { %96 = vperm.xlu1 %12738, %v78_v7   ;;  %91 = vperm.xlu0 %12737, %v77_v8   ;;  %14744 = vst [vmem:[#allocation5_spill] sm:$0xff] %v12885_v17  ;;  %v12894_v20 = vsub.f32 %v175_v16, %v12885_v17  ;;  %v181_v54 = vsel %vm173_vm0, %v113_v45, 0  ;;  %v184_v57 = vsel %vm173_vm0, %v114_v46, 0  ;;  %v12935_v60 = vand.u32 4294901760, %v178_v53 }
   0xf   :  { %10664 = vmatprep.mubr.f32.mxu0 %v12885_v17  ;;  %v12937_v61 = vand.u32 4294901760, %v181_v54  ;;  %v12939_v62 = vand.u32 4294901760, %v184_v57  ;;  %v14634_v7 = vmov 0.0  }
  0x10   :  { %14745 = vst [vmem:[#allocation6_spill] sm:$0xff] %v12894_v20  ;;  %v12898_v21 = vand.u32 4294901760, %v12894_v20  ;;  %14747 = vst [vmem:[#allocation8_spill] sm:$0xff] %v12935_v60  ;;  %v12942_v63 = vsub.f32 %v178_v53, %v12935_v60 }
  0x11   :  { %14748 = vst [vmem:[#allocation9_spill] sm:$0xff] %v12937_v61  ;;  %14749 = vst [vmem:[#allocation10_spill] sm:$0xff] %v12939_v62  ;;  %v12945_v0 = vsub.f32 %v181_v54, %v12937_v61  ;;  %v12948_v1 = vsub.f32 %v184_v57, %v12939_v62 }
  0x12   :  { %160 = vperm.xlu1 %12738, %v121_v9   ;;  %155 = vperm.xlu0 %12737, %v120_v10   ;;  %14746 = vst [vmem:[#allocation7_spill] sm:$0xff] %v12898_v21  ;;  %v258_v24 = vsub.f32 %v12894_v20, %v12898_v21  ;;  %14750 = vst [vmem:[#allocation11_spill] sm:$0xff] %v12942_v63  ;;  %v12953_v3 = vand.u32 4294901760, %v12942_v63 }
  0x13   :  { %14751 = vst [vmem:[#allocation12_spill] sm:$0xff] %v12945_v0  ;;  %14752 = vst [vmem:[#allocation13_spill] sm:$0xff] %v12948_v1  ;;  %v12956_v4 = vand.u32 4294901760, %v12945_v0  ;;  %v12962_v6 = vand.u32 4294901760, %v12948_v1 }
  0x14   :  { %v12908_v25 = vand.u32 4294901760, %v258_v24  ;;  %14753 = vst [vmem:[#allocation14_spill] sm:$0xff] %v12953_v3  ;;  %v268_v15 = vsub.f32 %v12942_v63, %v12953_v3 }
  0x15   :  { %14754 = vst [vmem:[#allocation15_spill] sm:$0xff] %v12956_v4  ;;  %14755 = vst [vmem:[#allocation16_spill] sm:$0xff] %v12962_v6 }
  0x16   :  { %170 = vperm.xlu1 %12738, %v123_v11   ;;  %165 = vperm.xlu0 %12737, %v122_v12  }
  0x17   :  { %10650 = vmatprep.mubr.f32.mxu1 %v12908_v25 }
  0x1a   :  { %823 = vperm.xlu1 %12738, %v125_v13   ;;  %818 = vperm.xlu0 %12737, %v124_v14   ;;  %v14636_v14 = vmov 1.0|1.0  }
  0x1e   :  { %833 = vperm.xlu1 %12738, %v127_v18   ;;  %828 = vperm.xlu0 %12737, %v126_v19   ;;  %v278_v19 = vsub.f32 %v12945_v0, %v12956_v4 }
  0x22   :  { %9285 = vperm.xlu1 %12738, %v9282_v22   ;;  %1480 = vperm.xlu0 %12737, %v128_v23  }
  0x81   :  { %v60_v26 = vpop.permute.xlu1 %59  ;;  %v50_v27 = vpop.permute.xlu0 %49 }
  0x82   :  { %v67_v30 = vsub.f32 %v39_v28, %v50_v27  ;;  %v69_v36 = vsub.f32 %v41_v31, %v60_v26  ;;  %v288_v26 = vsub.f32 %v12948_v1, %v12962_v6 }
  0x84   :  { %v71_v37 = vmul.f32 %v67_v30, %v67_v30  ;;  %v73_v47 = vmul.f32 %v69_v36, %v69_v36  ;;  %v13011_v36 = vand.u32 4294901760, %v268_v15  ;;  %v13025_v44 = vand.u32 4294901760, %v288_v26 }
  0x85   :  { %v65_v32 = vpop.permute.xlu1 %64  ;;  %v55_v34 = vpop.permute.xlu0 %54 }
  0x86   :  { %v68_v35 = vsub.f32 %v40_v29, %v55_v34  ;;  %v70_v38 = vsub.f32 %v42_v33, %v65_v32  ;;  %14760 = vst [vmem:[#allocation17_spill] sm:$0xff] %v13025_v44 }
  0x88   :  { %v72_v39 = vmul.f32 %v68_v35, %v68_v35  ;;  %v74_v48 = vmul.f32 %v70_v38, %v70_v38 }
  0x89   :  { %v87_v40 = vpop.permute.xlu1 %86  ;;  %v82_v41 = vpop.permute.xlu0 %81 }
  0x8a   :  { %v100_v42 = vmul.f32 %v87_v40, %v72_v39  ;;  %v99_v43 = vmul.f32 %v82_v41, %v71_v37  ;;  %v13021_v40 = vand.u32 4294901760, %v278_v19 }
  0x8c   :  { %v105_v49 = vmul.f32 1.442695, %v100_v42  ;;  %v103_v50 = vmul.f32 1.442695, %v99_v43 }
  0x8d   :  { %v97_v51 = vpop.permute.xlu1 %96  ;;  %v92_v52 = vpop.permute.xlu0 %91 }
  0x8e   :  { %12739 = vpow2.f32 %v105_v49  ;;  %v102_v55 = vmul.f32 %v97_v51, %v74_v48  ;;  %v101_v56 = vmul.f32 %v92_v52, %v73_v47 }
  0x8f   :  { %12741 = vpow2.f32 %v103_v50 }
  0x90   :  { %v109_v58 = vmul.f32 1.442695, %v102_v55  ;;  %v107_v59 = vmul.f32 1.442695, %v101_v56  ;;  %v14685_v56 = vmov 0.0|0.0  }
  0x92   :  { %12743 = vpow2.f32 %v109_v58 }
  0x93   :  { %12745 = vpow2.f32 %v107_v59 }
  0x98   :  { %v12950_v2 = vpop.eup %12739 }
  0x99   :  { %v12958_v5 = vpop.eup %12741  ;;  %vm134_vm1 = vcmp.gt.f32.partialorder %v12950_v2, 0.999 }
  0x9a   :  { %vm133_vm2 = vcmp.gt.f32.partialorder %v12958_v5, 0.999  ;;  %v9756_v8 = vsel %vm134_vm1, 1.0, %v14634_v7 }
  0x9b   :  { %vm12966_vm3 = vmpackc.low %vm134_vm1, %vm133_vm2  ;;  %v9755_v10 = vsel %vm133_vm2, 1.0, %v14634_v7  ;;  %v146_v11 = vmul.f32 0.999, %v9756_v8  ;;  %v12971_v12 = vsub.f32 %v9756_v8, %v9756_v8 }
  0x9c   :  { %v12973_v13 = vpop.eup %12743  ;;  %11843 = vmatprep.subr.msk.bf16.mxu1 %vm12966_vm3, %v14636_v14  ;;  %v145_v16 = vmul.f32 0.999, %v9755_v10  ;;  %v12980_v18 = vsub.f32 %v9755_v10, %v9755_v10 }
  0x9d   :  { %v12984_v22 = vpop.eup %12745  ;;  %11845 = vmatpush3.bf16.msk.msra.mxu1 %vm12966_vm3, %v14636_v14  ;;  %vm136_vm4 = vcmp.gt.f32.partialorder %v12973_v13, 0.999  ;;  %v150_v23 = vsub.f32 %v12950_v2, %v146_v11  ;;  %v305_v24 = vand.u32 4294901760, %v12971_v12 }
  0x9e   :  { %vm135_vm5 = vcmp.gt.f32.partialorder %v12984_v22, 0.999  ;;  %v9758_v27 = vsel %vm136_vm4, 1.0, %v14634_v7  ;;  %v149_v28 = vsub.f32 %v12958_v5, %v145_v16  ;;  %v298_v29 = vand.u32 4294901760, %v12980_v18 }
  0x9f   :  { %v9757_v30 = vsel %vm135_vm5, 1.0, %v14634_v7  ;;  %v148_v31 = vmul.f32 0.999, %v9758_v27  ;;  %vm12999_vm6 = vmpackc.low %vm136_vm4, %vm135_vm5  ;;  %v306_v33 = vsub.f32 %v12971_v12, %v305_v24  ;;  %v13006_v34 = vsub.f32 %v9758_v27, %v9758_v27 }
  0xa0   :  { %v147_v35 = vmul.f32 0.999, %v9757_v30  ;;  %11847 = vmatprep.subr.msk.bf16.mxu1 %vm12999_vm6, %v14636_v14  ;;  %v299_v37 = vsub.f32 %v12980_v18, %v298_v29  ;;  %v13016_v38 = vsub.f32 %v9757_v30, %v9757_v30  ;;  %v1976_v42 = vadd.f32 %v12958_v5, %v149_v28  ;;  %v119_v30 = vld [vmem:[%s14629_s7] sm:$0xff] }
  0xa1   :  { %11849 = vmatpush3.bf16.msk.msra.mxu1 %vm12999_vm6, %v14636_v14  ;;  %v307_v39 = vand.u32 4294901760, %v306_v33  ;;  %v319_v41 = vand.u32 4294901760, %v13006_v34  ;;  %v1977_v46 = vadd.f32 %v12950_v2, %v150_v23  ;;  %v152_v49 = vsub.f32 %v12973_v13, %v148_v31 }
  0xa2   :  { %v300_v43 = vand.u32 4294901760, %v299_v37  ;;  %v312_v45 = vand.u32 4294901760, %v13016_v38  ;;  %vm1980_vm7 = vcmp.gt.f32.partialorder %v1976_v42, 0.999  ;;  %v151_v48 = vsub.f32 %v12984_v22, %v147_v35 }
  0xa3   :  { %v320_v47 = vsub.f32 %v13006_v34, %v319_v41  ;;  %v11858_v52 = vpack.c.bf16 %v12971_v12, %v12980_v18  ;;  %vm1981_vm8 = vcmp.gt.f32.partialorder %v1977_v46, 0.999  ;;  %v9804_v54 = vsel %vm1980_vm7, 1.0, %v14634_v7 }
  0xa4   :  { %10651 = vmatmul.mubr.f32.vlgmr.msra.gmra.mrb[0].mxu1 %v13011_v36  ;;  %v11850_v50 = vpack.c.bf16 %v307_v39, %v300_v43  ;;  %v313_v51 = vsub.f32 %v13016_v38, %v312_v45  ;;  %v9805_v55 = vsel %vm1981_vm8, 1.0, %v14634_v7  ;;  %vm13043_vm9 = vmpackc.low %vm1981_vm8, %vm1980_vm7  ;;  %v1978_v57 = vadd.f32 %v12984_v22, %v151_v48 }
  0xa5   :  { %10653 = vmatprep.mubr.f32.mxu1 %v13021_v40  ;;  %v321_v53 = vand.u32 4294901760, %v320_v47  ;;  %v13050_v59 = vpack.c.bf16 %v13006_v34, %v13016_v38  ;;  %v1992_v8 = vmul.f32 0.999, %v9804_v54  ;;  %v1979_v10 = vadd.f32 %v12973_v13, %v152_v49 }
  0xa6   :  { %11851 = vmatprep.subr.bf16.mxu0 %v11850_v50  ;;  %v314_v58 = vand.u32 4294901760, %v313_v51  ;;  %v1993_v11 = vmul.f32 0.999, %v9805_v55  ;;  %vm1982_vm10 = vcmp.gt.f32.partialorder %v1978_v57, 0.999  ;;  %v2115_v15 = vsub.f32 %v9804_v54, %v9804_v54 }
  0xa7   :  { %11853 = vmatpush3.bf16.msra.mxu0 %v11850_v50  ;;  %v2122_v16 = vsub.f32 %v9805_v55, %v9805_v55  ;;  %vm1983_vm11 = vcmp.gt.f32.partialorder %v1979_v10, 0.999  ;;  %v9806_v23 = vsel %vm1982_vm10, 1.0, %v14634_v7  ;;  %v1996_v26 = vsub.f32 %v1976_v42, %v1992_v8 }
  0xa8   :  { %10654 = vmatmul.mubr.f32.gmra.mrb[2].mxu1 %v13025_v44  ;;  %v11854_v19 = vpack.c.bf16 %v321_v53, %v314_v58  ;;  %v9807_v27 = vsel %vm1983_vm11, 1.0, %v14634_v7  ;;  %v1994_v28 = vmul.f32 0.999, %v9806_v23  ;;  %vm13056_vm12 = vmpackc.low %vm1983_vm11, %vm1982_vm10  ;;  %v2116_v31 = vand.u32 4294901760, %v2115_v15 }
  0xa9   :  { %v2123_v33 = vand.u32 4294901760, %v2122_v16  ;;  %v1995_v35 = vmul.f32 0.999, %v9807_v27  ;;  %v2129_v37 = vsub.f32 %v9806_v23, %v9806_v23  ;;  %v2136_v39 = vsub.f32 %v9807_v27, %v9807_v27 }
  0xaa   :  { %11855 = vmatprep.subr.bf16.mxu0 %v11854_v19  ;;  %v13060_v43 = vpack.c.bf16 %v2122_v16, %v2115_v15  ;;  %v2117_v47 = vsub.f32 %v2115_v15, %v2116_v31  ;;  %v1997_v42 = vsub.f32 %v1977_v46, %v1993_v11  ;;  %v3804_v54 = vadd.f32 %v12958_v5, %v1996_v26 }
  0xab   :  { %11857 = vmatpush3.bf16.msra.mxu0 %v11854_v19  ;;  %v2124_v48 = vsub.f32 %v2122_v16, %v2123_v33  ;;  %v13062_v49 = vpack.c.bf16 %v2123_v33, %v2116_v31  ;;  %v2130_v50 = vand.u32 4294901760, %v2129_v37  ;;  %v2137_v51 = vand.u32 4294901760, %v2136_v39 }
  0xac   :  { %11859 = vmatprep.subr.bf16.mxu0 %v11858_v52  ;;  %v13064_v53 = vpack.c.bf16 %v2136_v39, %v2129_v37  ;;  %v2118_v55 = vand.u32 4294901760, %v2117_v47  ;;  %v3805_v8 = vadd.f32 %v12950_v2, %v1997_v42  ;;  %v1998_v23 = vsub.f32 %v1978_v57, %v1994_v28 }
  0xad   :  { %v2125_v58 = vand.u32 4294901760, %v2124_v48  ;;  %v2131_v19 = vsub.f32 %v2129_v37, %v2130_v50  ;;  %v2138_v15 = vsub.f32 %v2136_v39, %v2137_v51  ;;  %v13069_v16 = vpack.c.bf16 %v2137_v51, %v2130_v50 }
  0xae   :  { %10665 = vmatmul.mubr.f32.vlgmr.msra.gmra.mrb[0].mxu0 %v12935_v60  ;;  %vm3808_vm13 = vcmp.gt.f32.partialorder %v3804_v54, 0.999  ;;  %vm3809_vm14 = vcmp.gt.f32.partialorder %v3805_v8, 0.999  ;;  %v1999_v26 = vsub.f32 %v1979_v10, %v1995_v35  ;;  %v14765_v33 = vmov 0 }
  0xaf   :  { %11861 = vmatpush3.bf16.msra.mxu0 %v11858_v52  ;;  %10667 = vmatprep.mubr.f32.mxu0 %v12937_v61  ;;  %v13072_v46 = vpack.c.bf16 %v2125_v58, %v2118_v55  ;;  %v9853_v11 = vsel %vm3808_vm13, 1.0, %v14634_v7  ;;  %v2132_v27 = vand.u32 4294901760, %v2131_v19  ;;  %v2139_v57 = vand.u32 4294901760, %v2138_v15  ;;  %vm13077_vm15 = vmpackc.low %vm3809_vm14, %vm3808_vm13 }
  0xb0   :  { %11863 = vmatprep.subr.bf16.mxu0 %v13050_v59  ;;  %v9854_v28 = vsel %vm3809_vm14, 1.0, %v14634_v7  ;;  %v3820_v31 = vmul.f32 0.999, %v9853_v11  ;;  %v14766_v33 = vsel %vm13077_vm15, 4294967295, %v14765_v33  ;;  %v3806_v37 = vadd.f32 %v12984_v22, %v1998_v23 }
  0xb1   :  { %14767 = vst [vmem:[#allocation18_spill] sm:$0xff] %v14766_v33  ;;  %v3821_v52 = vmul.f32 0.999, %v9854_v28  ;;  %v3807_v39 = vadd.f32 %v12973_v13, %v1999_v26  ;;  %v3943_v47 = vsub.f32 %v9853_v11, %v9853_v11  ;;  %v13088_v10 = vpack.c.bf16 %v305_v24, %v298_v29 }
  0xb2   :  { %10668 = vmatmul.mubr.f32.gmra.mrb[2].mxu0 %v12939_v62  ;;  %v13090_v35 = vpack.c.bf16 %v2139_v57, %v2132_v27  ;;  %v3950_v48 = vsub.f32 %v9854_v28, %v9854_v28  ;;  %v3824_v42 = vsub.f32 %v3804_v54, %v3820_v31  ;;  %vm3810_vm1 = vcmp.gt.f32.partialorder %v3806_v37, 0.999 }
  0xb3   :  { %11865 = vmatpush3.bf16.msra.mxu0 %v13050_v59  ;;  %10678 = vmatprep.mubr.f32.mxu0 %v12894_v20  ;;  %vm3811_vm2 = vcmp.gt.f32.partialorder %v3807_v39, 0.999  ;;  %v3944_v50 = vand.u32 4294901760, %v3943_v47  ;;  %v3825_v51 = vsub.f32 %v3805_v8, %v3821_v52  ;;  %v9855_v12 = vsel %vm3810_vm1, 1.0, %v14634_v7 }
  0xb4   :  { %11867 = vmatprep.subr.msk.bf16.mxu0 %vm12966_vm3, %v14636_v14  ;;  %v9856_v18 = vsel %vm3811_vm2, 1.0, %v14634_v7  ;;  %vm13099_vm4 = vmpackc.low %vm3811_vm2, %vm3810_vm1  ;;  %v14768_v24 = vmov 0  ;;  %v3951_v29 = vand.u32 4294901760, %v3950_v48  ;;  %v13103_v59 = vpack.c.bf16 %v3950_v48, %v3943_v47 }
  0xb5   :  { %v14769_v24 = vsel %vm13099_vm4, 4294967295, %v14768_v24  ;;  %v3822_v54 = vmul.f32 0.999, %v9855_v12  ;;  %v3823_v55 = vmul.f32 0.999, %v9856_v18  ;;  %v3945_v58 = vsub.f32 %v3943_v47, %v3944_v50 }
  0xb6   :  { %14770 = vst [vmem:[#allocation19_spill] sm:$0xff] %v14769_v24  ;;  %14771 = vst [vmem:[#allocation20_spill] sm:$0xff] %v13103_v59  ;;  %v3957_v23 = vsub.f32 %v9855_v12, %v9855_v12  ;;  %10679 = vmatmul.mubr.f32.vlgmr.msra.gmra.mrb[0].mxu0 %v12942_v63  ;;  %v3952_v8 = vsub.f32 %v3950_v48, %v3951_v29  ;;  %v3964_v19 = vsub.f32 %v9856_v18, %v9856_v18  ;;  %v14780_v34 = vmov 0 }
  0xb7   :  { %v13106_v15 = vpack.c.bf16 %v3951_v29, %v3944_v50  ;;  %v5632_v11 = vadd.f32 %v12958_v5, %v3824_v42  ;;  %11869 = vmatpush3.bf16.msk.msra.mxu0 %vm12966_vm3, %v14636_v14  ;;  %10681 = vmatprep.mubr.f32.mxu0 %v12945_v0  ;;  %v3946_v26 = vand.u32 4294901760, %v3945_v58  ;;  %v5633_v57 = vadd.f32 %v12950_v2, %v3825_v51 }
  0xb8   :  { %v3958_v27 = vand.u32 4294901760, %v3957_v23  ;;  %v3826_v28 = vsub.f32 %v3806_v37, %v3822_v54  ;;  %11871 = vmatprep.subr.msk.bf16.mxu0 %vm12999_vm6, %v14636_v14  ;;  %v3953_v31 = vand.u32 4294901760, %v3952_v8  ;;  %v3965_v52 = vand.u32 4294901760, %v3964_v19 }
  0xb9   :  { %14772 = vst [vmem:[#allocation21_spill] sm:$0xff] %v13106_v15  ;;  %v13117_v47 = vpack.c.bf16 %v3964_v19, %v3957_v23  ;;  %vm5636_vm5 = vcmp.gt.f32.partialorder %v5632_v11, 0.999  ;;  %vm5637_vm7 = vcmp.gt.f32.partialorder %v5633_v57, 0.999  ;;  %v3827_v50 = vsub.f32 %v3807_v39, %v3823_v55 }
  0xba   :  { %v3959_v48 = vsub.f32 %v3957_v23, %v3958_v27  ;;  %v9902_v42 = vsel %vm5636_vm5, 1.0, %v14634_v7  ;;  %10682 = vmatmul.mubr.f32.gmra.mrb[2].mxu0 %v12948_v1  ;;  %v13121_v12 = vpack.c.bf16 %v3953_v31, %v3946_v26  ;;  %v3966_v51 = vsub.f32 %v3964_v19, %v3965_v52  ;;  %vm13126_vm8 = vmpackc.low %vm5637_vm7, %vm5636_vm5 }
  0xbb   :  { %14773 = vst [vmem:[#allocation22_spill] sm:$0xff] %v13117_v47  ;;  %v13123_v37 = vpack.c.bf16 %v3965_v52, %v3958_v27  ;;  %v9903_v18 = vsel %vm5637_vm7, 1.0, %v14634_v7  ;;  %v14776_v29 = vmov 0  ;;  %11873 = vmatpush3.bf16.msk.msra.mxu0 %vm12999_vm6, %v14636_v14  ;;  %10692 = vmatprep.mubr.f32.mxu0 %v12898_v21  ;;  %v5648_v54 = vmul.f32 0.999, %v9902_v42 }
  0xbc   :  { %14774 = vst [vmem:[#allocation23_spill] sm:$0xff] %v13121_v12  ;;  %v14777_v29 = vsel %vm13126_vm8, 4294967295, %v14776_v29  ;;  %v3960_v39 = vand.u32 4294901760, %v3959_v48  ;;  %v5649_v55 = vmul.f32 0.999, %v9903_v18  ;;  %v5634_v58 = vadd.f32 %v12984_v22, %v3826_v28  ;;  %11875 = vmatprep.subr.bf16.mxu0 %v13088_v10 }
  0xbd   :  { %14775 = vst [vmem:[#allocation24_spill] sm:$0xff] %v13123_v37  ;;  %14778 = vst [vmem:[#allocation25_spill] sm:$0xff] %v14777_v29  ;;  %v3967_v23 = vand.u32 4294901760, %v3966_v51  ;;  %v5635_v8 = vadd.f32 %v12973_v13, %v3827_v50  ;;  %v5771_v19 = vsub.f32 %v9902_v42, %v9902_v42  ;;  %v5778_v26 = vsub.f32 %v9903_v18, %v9903_v18 }
  0xbe   :  { %v11878_v27 = vpack.c.bf16 %v319_v41, %v312_v45  ;;  %vm5638_vm10 = vcmp.gt.f32.partialorder %v5634_v58, 0.999  ;;  %v5652_v31 = vsub.f32 %v5632_v11, %v5648_v54  ;;  %v5653_v52 = vsub.f32 %v5633_v57, %v5649_v55  ;;  %10693 = vmatmul.mubr.f32.vlgmr.msra.gmra.mrb[0].mxu0 %v12953_v3 }
  0xbf   :  { %v13142_v48 = vpack.c.bf16 %v3967_v23, %v3960_v39  ;;  %vm5639_vm11 = vcmp.gt.f32.partialorder %v5635_v8, 0.999  ;;  %v9904_v28 = vsel %vm5638_vm10, 1.0, %v14634_v7  ;;  %v5772_v51 = vand.u32 4294901760, %v5771_v19  ;;  %11877 = vmatpush3.bf16.msra.mxu0 %v13088_v10  ;;  %10695 = vmatprep.mubr.f32.mxu0 %v12956_v4 }
  0xc0   :  { %v9905_v38 = vsel %vm5639_vm11, 1.0, %v14634_v7  ;;  %v5650_v42 = vmul.f32 0.999, %v9904_v28  ;;  %vm13148_vm13 = vmpackc.low %vm5639_vm11, %vm5638_vm10  ;;  %v5779_v41 = vand.u32 4294901760, %v5778_v26  ;;  %v5785_v45 = vsub.f32 %v9904_v28, %v9904_v28  ;;  %11879 = vmatprep.subr.bf16.mxu0 %v11878_v27 }
  0xc1   :  { %14779 = vst [vmem:[#allocation26_spill] sm:$0xff] %v13142_v48  ;;  %v14781_v34 = vsel %vm13148_vm13, 4294967295, %v14780_v34  ;;  %v5651_v11 = vmul.f32 0.999, %v9905_v38  ;;  %v5773_v57 = vsub.f32 %v5771_v19, %v5772_v51  ;;  %v5792_v50 = vsub.f32 %v9905_v38, %v9905_v38 }
  0xc2   :  { %14782 = vst [vmem:[#allocation27_spill] sm:$0xff] %v14781_v34  ;;  %v13152_v18 = vpack.c.bf16 %v5778_v26, %v5771_v19  ;;  %v5780_v39 = vsub.f32 %v5778_v26, %v5779_v41  ;;  %v5786_v54 = vand.u32 4294901760, %v5785_v45  ;;  %v13154_v10 = vpack.c.bf16 %v5779_v41, %v5772_v51  ;;  %10696 = vmatmul.mubr.f32.gmra.mrb[2].mxu0 %v12962_v6 }
  0xc3   :  { %v7460_v55 = vadd.f32 %v12958_v5, %v5652_v31  ;;  %v5774_v23 = vand.u32 4294901760, %v5773_v57  ;;  %v5793_v7 = vand.u32 4294901760, %v5792_v50  ;;  %v13158_v14 = vpack.c.bf16 %v5792_v50, %v5785_v45  ;;  %11881 = vmatpush3.bf16.msra.mxu0 %v11878_v27  ;;  %10706 = vmatprep.mubr.f32.mxu0 %v12885_v17 }
  0xc4   :  { %14783 = vst [vmem:[#allocation28_spill] sm:$0xff] %v13152_v18  ;;  %14784 = vst [vmem:[#allocation29_spill] sm:$0xff] %v13154_v10  ;;  %v7461_v28 = vadd.f32 %v12950_v2, %v5653_v52  ;;  %v5781_v38 = vand.u32 4294901760, %v5780_v39  ;;  %v5787_v19 = vsub.f32 %v5785_v45, %v5786_v54  ;;  %v5654_v26 = vsub.f32 %v5634_v58, %v5650_v42 }
  0xc5   :  { %14785 = vst [vmem:[#allocation30_spill] sm:$0xff] %v13158_v14  ;;  %vm7464_vm14 = vcmp.gt.f32.partialorder %v7460_v55, 0.999  ;;  %v14786_v18 = vmov 1.0|1.0   ;;  %v5794_v5 = vsub.f32 %v5792_v50, %v5793_v7  ;;  %v13165_v31 = vpack.c.bf16 %v5793_v7, %v5786_v54 }
  0xc6   :  { %11883 = vmatprep.subr.msk.bf16.mxu0 %vm12966_vm3, %v14786_v18  ;;  %vm7465_vm1 = vcmp.gt.f32.partialorder %v7461_v28, 0.999  ;;  %v14788_v51 = vmov 0.0   ;;  %v13168_v57 = vpack.c.bf16 %v5781_v38, %v5774_v23  ;;  %v5788_v2 = vand.u32 4294901760, %v5787_v19  ;;  %10707 = vmatmul.mubr.f32.vlgmr.msra.gmra.mrb[0].mxu0 %v12935_v60 }
  0xc7   :  { %14787 = vst [vmem:[#allocation31_spill] sm:$0xff] %v13165_v31  ;;  %v9951_v41 = vsel %vm7464_vm14, 1.0, %v14788_v51  ;;  %v9952_v27 = vsel %vm7465_vm1, 1.0, %v14788_v51  ;;  %vm13171_vm2 = vmpackc.low %vm7465_vm1, %vm7464_vm14  ;;  %v14790_v52 = vmov 0  ;;  %v5795_v42 = vand.u32 4294901760, %v5794_v5  ;;  %11885 = vmatpush3.bf16.msk.msra.mxu0 %vm12966_vm3, %v14786_v18  ;;  %10709 = vmatprep.mubr.f32.mxu0 %v12937_v61 }
  0xc8   :  { %14789 = vst [vmem:[#allocation32_spill] sm:$0xff] %v13168_v57  ;;  %v14791_v52 = vsel %vm13171_vm2, 4294967295, %v14790_v52  ;;  %v7591_v58 = vsub.f32 %v9951_v41, %v9951_v41  ;;  %v7598_v45 = vsub.f32 %v9952_v27, %v9952_v27  ;;  %v5655_v50 = vsub.f32 %v5635_v8, %v5651_v11  ;;  %11887 = vmatprep.subr.msk.bf16.mxu0 %vm12999_vm6, %v14786_v18 }
  0xc9   :  { %14792 = vst [vmem:[#allocation33_spill] sm:$0xff] %v14791_v52  ;;  %v7462_v7 = vadd.f32 %v12984_v22, %v5654_v26  ;;  %v13184_v54 = vpack.c.bf16 %v5795_v42, %v5788_v2  ;;  %v14796_v19 = vmov 0 }
  0xca   :  { %v7592_v39 = vand.u32 4294901760, %v7591_v58  ;;  %v7463_v55 = vadd.f32 %v12973_v13, %v5655_v50  ;;  %v7599_v23 = vand.u32 4294901760, %v7598_v45  ;;  %v13188_v11 = vpack.c.bf16 %v7598_v45, %v7591_v58  ;;  %10710 = vmatmul.mubr.f32.gmra.mrb[2].mxu0 %v12939_v62 }
  0xcb   :  { %14793 = vst [vmem:[#allocation34_spill] sm:$0xff] %v13184_v54  ;;  %vm7466_vm5 = vcmp.gt.f32.partialorder %v7462_v7, 0.999  ;;  %11889 = vmatpush3.bf16.msk.msra.mxu0 %vm12999_vm6, %v14786_v18  ;;  %10720 = vmatprep.mubr.f32.mxu0 %v12885_v17 }
  0xcc   :  { %v9953_v8 = vsel %vm7466_vm5, 1.0, %v14788_v51  ;;  %v7593_v22 = vsub.f32 %v7591_v58, %v7592_v39  ;;  %14794 = vst [vmem:[#allocation35_spill] sm:$0xff] %v13188_v11  ;;  %vm7467_vm3 = vcmp.gt.f32.partialorder %v7463_v55, 0.999  ;;  %v7600_v28 = vsub.f32 %v7598_v45, %v7599_v23  ;;  %11938 = vmatprep.subr.bf16.mxu0 %v14685_v56 }
  0xcd   :  { %v7605_v9 = vsub.f32 %v9953_v8, %v9953_v8  ;;  %v13191_v38 = vpack.c.bf16 %v7599_v23, %v7592_v39  ;;  %v9954_v13 = vsel %vm7467_vm3, 1.0, %v14788_v51  ;;  %vm13198_vm7 = vmpackc.low %vm7467_vm3, %vm7466_vm5  ;;  %v115_v23 = vld [vmem:[%s14627_s5] sm:$0xff] }
  0xce   :  { %v14797_v19 = vsel %vm13198_vm7, 4294967295, %v14796_v19  ;;  %v7594_v26 = vand.u32 4294901760, %v7593_v22  ;;  %v7612_v5 = vsub.f32 %v9954_v13, %v9954_v13  ;;  %v7601_v41 = vand.u32 4294901760, %v7600_v28  ;;  %10721 = vmatmul.mubr.f32.vlgmr.msra.gmra.mrb[0].mxu0 %v12935_v60 }
  0xcf   :  { %14795 = vst [vmem:[#allocation36_spill] sm:$0xff] %v13191_v38  ;;  %14798 = vst [vmem:[#allocation37_spill] sm:$0xff] %v14797_v19  ;;  %v7606_v2 = vand.u32 4294901760, %v7605_v9  ;;  %10723 = vmatprep.mubr.f32.mxu0 %v12937_v61  ;;  %v837_v8 = vsel %vm173_vm0, %v115_v23, 0 }
  0xd0   :  { %v13203_v27 = vpack.c.bf16 %v7601_v41, %v7594_v26  ;;  %v7613_v42 = vand.u32 4294901760, %v7612_v5  ;;  %v13205_v32 = vpack.c.bf16 %v7612_v5, %v7605_v9  ;;  %v13217_v22 = vand.u32 4294901760, %v837_v8 }
  0xd1   :  { %v7607_v58 = vsub.f32 %v7605_v9, %v7606_v2 }
  0xd2   :  { %14799 = vst [vmem:[#allocation38_spill] sm:$0xff] %v13203_v27  ;;  %14800 = vst [vmem:[#allocation39_spill] sm:$0xff] %v13205_v32  ;;  %v7614_v50 = vsub.f32 %v7612_v5, %v7613_v42  ;;  %v13208_v7 = vpack.c.bf16 %v7613_v42, %v7606_v2  ;;  %10724 = vmatmul.mubr.f32.gmra.mrb[2].mxu0 %v12939_v62  ;;  %v13220_v9 = vsub.f32 %v837_v8, %v13217_v22  ;;  %v116_v42 = vld [vmem:[%s14627_s5 + $0x8] sm:$0xff]  ;;  %v118_v8 = vld [vmem:[%s14627_s5 + $0x18] sm:$0xff] }
  0xd3   :  { %v7608_v45 = vand.u32 4294901760, %v7607_v58  ;;  %v846_v38 = vsel %vm173_vm0, %v118_v8, 0 }
  0xd4   :  { %14801 = vst [vmem:[#allocation40_spill] sm:$0xff] %v13208_v7  ;;  %v7615_v39 = vand.u32 4294901760, %v7614_v50  ;;  %v13223_v28 = vand.u32 4294901760, %v13220_v9  ;;  %v117_v50 = vld [vmem:[%s14627_s5 + $0x10] sm:$0xff]  ;;  %v13252_v32 = vand.u32 4294901760, %v846_v38 }
  0xd5   :  { %v843_v23 = vsel %vm173_vm0, %v117_v50, 0  ;;  %v13257_v50 = vpop.permute.xlu1 %160 }
  0xd6   :  { %v13211_v55 = vpack.c.bf16 %v7615_v39, %v7608_v45  ;;  %v920_v13 = vsub.f32 %v13220_v9, %v13223_v28  ;;  %v840_v45 = vsel %vm173_vm0, %v116_v42, 0  ;;  %v13246_v7 = vand.u32 4294901760, %v843_v23  ;;  %14804 = vst [vmem:[#allocation43_spill] sm:$0xff] %v13257_v50 }
  0xd7   :  { %v13237_v39 = vand.u32 4294901760, %v840_v45  ;;  %v13264_v27 = vsub.f32 %v846_v38, %v13252_v32 }
  0xd8   :  { %14802 = vst [vmem:[#allocation41_spill] sm:$0xff] %v13211_v55  ;;  %v13227_v26 = vand.u32 4294901760, %v920_v13  ;;  %v13255_v11 = vsub.f32 %v843_v23, %v13246_v7  ;;  %v13259_v55 = vpop.permute.xlu0 %155 }
  0xd9   :  { %v13244_v13 = vsub.f32 %v840_v45, %v13237_v39  ;;  %14805 = vst [vmem:[#allocation44_spill] sm:$0xff] %v13259_v55  ;;  %v13273_v14 = vpop.permute.xlu1 %170  ;;  %v13280_v38 = vand.u32 4294901760, %v13264_v27 }
  0xda   :  { %14803 = vst [vmem:[#allocation42_spill] sm:$0xff] %v13227_v26  ;;  %10734 = vmatprep.mubr.f32.mxu1 %v13227_v26  ;;  %v13268_v19 = vand.u32 4294901760, %v13255_v11  ;;  %14807 = vst [vmem:[#allocation46_spill] sm:$0xff] %v13273_v14 }
  0xdb   :  { %v13250_v42 = vand.u32 4294901760, %v13244_v13 }
  0xdc   :  { %v13282_v34 = vpop.permute.xlu0 %165 }
  0xdd   :  { %v930_v45 = vsub.f32 %v13244_v13, %v13250_v42  ;;  %14809 = vst [vmem:[#allocation48_spill] sm:$0xff] %v13282_v34 }
  0xdf   :  { %v13277_v57 = vand.u32 4294901760, %v930_v45 }
  0xe0   :  { %v13474_v24 = vpop.permute.xlu0 %818 }
  0xe1   :  { %14821 = vst [vmem:[#allocation54_spill] sm:$0xff] %v13474_v24 }
 0x177   :  { %v10652_v5 = vpop.f32.mrb[0].mxu1 }
 0x178   :  { %v261_v41 = vpop.f32.mrb[1].mxu1  ;;  %v272_v8 = vadd.f32 %v10652_v5, %v13257_v50 }
 0x179   :  { %v262_v52 = vadd.f32 %v261_v41, %v13259_v55 }
 0x17b   :  { %v10655_v2 = vpop.f32.mrb[2].mxu1 }
 0x17c   :  { %v281_v58 = vpop.f32.mrb[3].mxu1  ;;  %v292_v5 = vadd.f32 %v10655_v2, %v13273_v14 }
 0x1a1   :  { %v10722_v31 = vpop.f32.mrb[0].mxu0 }
 0x1a2   :  { %v13271_v23 = vadd.f32 %v10722_v31, %v272_v8  ;;  %v778_v10 = vpop.f32.mrb[1].mxu0  ;;  %v940_v31 = vsub.f32 %v13255_v11, %v13268_v19  ;;  %v282_v8 = vadd.f32 %v281_v58, %v13282_v34 }
 0x1a3   :  { %v13275_v54 = vadd.f32 %v778_v10, %v262_v52 }
 0x1a4   :  { %14806 = vst [vmem:[#allocation45_spill] sm:$0xff] %v13271_v23  ;;  %vm805_vm6 = vcmp.gt.f32.partialorder %v13271_v23, 0.5  ;;  %v2631_v41 = vmul.f32 0.75, %v13271_v23  ;;  %v13330_v55 = vand.u32 4294901760, %v940_v31 }
 0x1a5   :  { %14808 = vst [vmem:[#allocation47_spill] sm:$0xff] %v13275_v54  ;;  %v9772_v10 = vsel %vm805_vm6, 1.0, %v14788_v51  ;;  %vm804_vm10 = vcmp.gt.f32.partialorder %v13275_v54, 0.5  ;;  %v2630_v52 = vmul.f32 0.75, %v13275_v54  ;;  %v10725_v45 = vpop.f32.mrb[2].mxu0 }
 0x1a6   :  { %v966_v29 = vsub.f32 %v9772_v10, %v9772_v10  ;;  %v9771_v37 = vsel %vm804_vm10, 1.0, %v14788_v51  ;;  %vm13294_vm11 = vmpackc.low %vm805_vm6, %vm804_vm10  ;;  %v13298_v15 = vadd.f32 %v10725_v45, %v292_v5  ;;  %v790_v47 = vpop.f32.mrb[3].mxu0  ;;  %vm2627_vm14 = vcmp.gt.f32.partialorder %v9772_v10, 0.0 }
 0x1a7   :  { %v959_v59 = vsub.f32 %v9771_v37, %v9771_v37  ;;  %v13300_v58 = vadd.f32 %v790_v47, %v282_v8  ;;  %11891 = vmatprep.subr.msk.bf16.mxu1 %vm13294_vm11, %v14786_v18  ;;  %v13305_v48 = vsel %vm2627_vm14, 0.0, %v2631_v41  ;;  %vm2626_vm1 = vcmp.gt.f32.partialorder %v9771_v37, 0.0 }
 0x1a8   :  { %14812 = vst [vmem:[#allocation49_spill] sm:$0xff] %v13298_v15  ;;  %14814 = vst [vmem:[#allocation51_spill] sm:$0xff] %v13305_v48  ;;  %vm807_vm5 = vcmp.gt.f32.partialorder %v13298_v15, 0.5  ;;  %11893 = vmatpush3.bf16.msk.msra.mxu1 %vm13294_vm11, %v14786_v18  ;;  %v967_v5 = vand.u32 4294901760, %v966_v29  ;;  %v950_v10 = vsub.f32 %v13264_v27, %v13280_v38  ;;  %v13313_v45 = vsel %vm2626_vm1, 0.0, %v2630_v52 }
 0x1a9   :  { %14813 = vst [vmem:[#allocation50_spill] sm:$0xff] %v13300_v58  ;;  %14815 = vst [vmem:[#allocation52_spill] sm:$0xff] %v13313_v45  ;;  %v9774_v47 = vsel %vm807_vm5, 1.0, %v14788_v51  ;;  %v2633_v8 = vmul.f32 0.75, %v13298_v15  ;;  %vm806_vm3 = vcmp.gt.f32.partialorder %v13300_v58, 0.5  ;;  %v960_v41 = vand.u32 4294901760, %v959_v59 }
 0x1aa   :  { %v980_v37 = vsub.f32 %v9774_v47, %v9774_v47  ;;  %v9773_v12 = vsel %vm806_vm3, 1.0, %v14788_v51  ;;  %vm13319_vm6 = vmpackc.low %vm807_vm5, %vm806_vm3  ;;  %v968_v33 = vsub.f32 %v966_v29, %v967_v5  ;;  %v11906_v26 = vpack.c.bf16 %v966_v29, %v959_v59 }
 0x1ab   :  { %v973_v34 = vsub.f32 %v9773_v12, %v9773_v12  ;;  %v2632_v52 = vmul.f32 0.75, %v13300_v58  ;;  %11895 = vmatprep.subr.msk.bf16.mxu1 %vm13319_vm6, %v14786_v18  ;;  %v961_v14 = vsub.f32 %v959_v59, %v960_v41  ;;  %v11922_v45 = vpack.c.bf16 %v967_v5, %v960_v41 }
 0x1ac   :  { %11897 = vmatpush3.bf16.msk.msra.mxu1 %vm13319_vm6, %v14786_v18  ;;  %v969_v48 = vand.u32 4294901760, %v968_v33  ;;  %v981_v15 = vand.u32 4294901760, %v980_v37  ;;  %vm2629_vm10 = vcmp.gt.f32.partialorder %v9774_v47, 0.0  ;;  %v13334_v58 = vand.u32 4294901760, %v950_v10  ;;  %v13494_v47 = vpop.permute.xlu0 %828 }
 0x1ad   :  { %v962_v50 = vand.u32 4294901760, %v961_v14  ;;  %v974_v29 = vand.u32 4294901760, %v973_v34  ;;  %v11910_v54 = vpack.c.bf16 %v980_v37, %v973_v34  ;;  %v13332_v23 = vsel %vm2629_vm10, 0.0, %v2633_v8  ;;  %14825 = vst [vmem:[#allocation58_spill] sm:$0xff] %v13494_v47 }
 0x1ae   :  { %v982_v51 = vsub.f32 %v980_v37, %v981_v15  ;;  %vm2628_vm14 = vcmp.gt.f32.partialorder %v9773_v12, 0.0 }
 0x1af   :  { %10735 = vmatmul.mubr.f32.vlgmr.msra.gmra.mrb[4].mxu1 %v13277_v57  ;;  %v11898_v59 = vpack.c.bf16 %v969_v48, %v962_v50  ;;  %v975_v5 = vsub.f32 %v973_v34, %v974_v29  ;;  %v11926_v41 = vpack.c.bf16 %v981_v15, %v974_v29  ;;  %v13337_v6 = vsel %vm2628_vm14, 0.0, %v2632_v52 }
 0x1b0   :  { %10737 = vmatprep.mubr.f32.mxu1 %v13330_v55  ;;  %v983_v33 = vand.u32 4294901760, %v982_v51 }
 0x1b1   :  { %11899 = vmatprep.subr.bf16.mxu1 %v11898_v59  ;;  %v976_v14 = vand.u32 4294901760, %v975_v5 }
 0x1b2   :  { %11901 = vmatpush3.bf16.msra.mxu1 %v11898_v59 }
 0x1b3   :  { %10738 = vmatmul.mubr.f32.gmra.mrb[6].mxu1 %v13334_v58  ;;  %v11902_v31 = vpack.c.bf16 %v983_v33, %v976_v14 }
 0x1b4   :  { %10748 = vmatprep.mubr.f32.mxu1 %v13217_v22 }
 0x1b5   :  { %11903 = vmatprep.subr.bf16.mxu1 %v11902_v31 }
 0x1b6   :  { %11905 = vmatpush3.bf16.msra.mxu1 %v11902_v31 }
 0x1b7   :  { %11907 = vmatprep.subr.bf16.mxu1 %v11906_v26 }
 0x1b9   :  { %10749 = vmatmul.mubr.f32.vlgmr.msra.gmra.mrb[4].mxu1 %v13237_v39 }
 0x1ba   :  { %11909 = vmatpush3.bf16.msra.mxu1 %v11906_v26  ;;  %10751 = vmatprep.mubr.f32.mxu1 %v13246_v7 }
 0x1bb   :  { %11911 = vmatprep.subr.bf16.mxu1 %v11910_v54 }
 0x1bd   :  { %10752 = vmatmul.mubr.f32.gmra.mrb[6].mxu1 %v13252_v32 }
 0x1be   :  { %11913 = vmatpush3.bf16.msra.mxu1 %v11910_v54  ;;  %10762 = vmatprep.mubr.f32.mxu1 %v13220_v9 }
 0x1bf   :  { %11915 = vmatprep.subr.msk.bf16.mxu1 %vm13294_vm11, %v14786_v18 }
 0x1c1   :  { %10763 = vmatmul.mubr.f32.vlgmr.msra.gmra.mrb[4].mxu1 %v13244_v13 }
 0x1c2   :  { %11917 = vmatpush3.bf16.msk.msra.mxu1 %vm13294_vm11, %v14786_v18  ;;  %10765 = vmatprep.mubr.f32.mxu1 %v13255_v11 }
 0x1c3   :  { %11919 = vmatprep.subr.msk.bf16.mxu1 %vm13319_vm6, %v14786_v18 }
 0x1c5   :  { %10766 = vmatmul.mubr.f32.gmra.mrb[6].mxu1 %v13264_v27 }
 0x1c6   :  { %11921 = vmatpush3.bf16.msk.msra.mxu1 %vm13319_vm6, %v14786_v18  ;;  %10776 = vmatprep.mubr.f32.mxu1 %v13223_v28 }
 0x1c7   :  { %11923 = vmatprep.subr.bf16.mxu1 %v11922_v45 }
 0x1c9   :  { %10777 = vmatmul.mubr.f32.vlgmr.msra.gmra.mrb[4].mxu1 %v13250_v42 }
 0x1ca   :  { %11925 = vmatpush3.bf16.msra.mxu1 %v11922_v45  ;;  %10779 = vmatprep.mubr.f32.mxu1 %v13268_v19 }
 0x1cb   :  { %11927 = vmatprep.subr.bf16.mxu1 %v11926_v41 }
 0x1cd   :  { %10780 = vmatmul.mubr.f32.gmra.mrb[6].mxu1 %v13280_v38 }
 0x1ce   :  { %11929 = vmatpush3.bf16.msra.mxu1 %v11926_v41  ;;  %10790 = vmatprep.mubr.f32.mxu1 %v13217_v22 }
 0x1cf   :  { %11931 = vmatprep.subr.msk.bf16.mxu1 %vm13294_vm11, %v14786_v18 }
 0x1d1   :  { %10791 = vmatmul.mubr.f32.vlgmr.msra.gmra.mrb[4].mxu1 %v13237_v39 }
 0x1d2   :  { %11933 = vmatpush3.bf16.msk.msra.mxu1 %vm13294_vm11, %v14786_v18  ;;  %10793 = vmatprep.mubr.f32.mxu1 %v13246_v7 }
 0x1d3   :  { %11935 = vmatprep.subr.msk.bf16.mxu1 %vm13319_vm6, %v14786_v18 }
 0x1d5   :  { %10794 = vmatmul.mubr.f32.gmra.mrb[6].mxu1 %v13252_v32 }
 0x1d6   :  { %11937 = vmatpush3.bf16.msk.msra.mxu1 %vm13319_vm6, %v14786_v18  ;;  %10804 = vmatprep.mubr.f32.mxu1 %v13217_v22 }
 0x1d7   :  { %11975 = vmatprep.subr.msk.bf16.mxu1 %vm13043_vm9, %v14786_v18 }
 0x1d9   :  { %10805 = vmatmul.mubr.f32.vlgmr.msra.gmra.mrb[4].mxu1 %v13237_v39 }
 0x1da   :  { %11977 = vmatpush3.bf16.msk.msra.mxu1 %vm13043_vm9, %v14786_v18  ;;  %10807 = vmatprep.mubr.f32.mxu1 %v13246_v7 }
 0x1db   :  { %11979 = vmatprep.subr.msk.bf16.mxu1 %vm13056_vm12, %v14786_v18 }
 0x1dd   :  { %10808 = vmatmul.mubr.f32.gmra.mrb[6].mxu1 %v13252_v32 }
 0x1de   :  { %11981 = vmatpush3.bf16.msk.msra.mxu1 %vm13056_vm12, %v14786_v18  ;;  %10884 = vmatprep.mubr.f32.mxu1 %v12908_v25 }
 0x1df   :  { %11983 = vmatprep.subr.bf16.mxu1 %v13072_v46 }
 0x1e1   :  { %10885 = vmatmul.mubr.f32.vlgmr.msra.gmra.mrb[8].mxu1 %v13011_v36 }
 0x1e2   :  { %11985 = vmatpush3.bf16.msra.mxu1 %v13072_v46  ;;  %10887 = vmatprep.mubr.f32.mxu1 %v13021_v40 }
 0x1e3   :  { %11987 = vmatprep.subr.bf16.mxu1 %v13090_v35 }
 0x1e5   :  { %10888 = vmatmul.mubr.f32.gmra.mrb[10].mxu1 %v13025_v44 }
 0x1e6   :  { %11989 = vmatpush3.bf16.msra.mxu1 %v13090_v35  ;;  %10898 = vmatprep.mubr.f32.mxu1 %v12885_v17  ;;  %v13472_v35 = vpop.permute.xlu1 %823 }
 0x1e7   :  { %11991 = vmatprep.subr.bf16.mxu1 %v13060_v43  ;;  %14820 = vst [vmem:[#allocation53_spill] sm:$0xff] %v13472_v35 }
 0x1e9   :  { %10899 = vmatmul.mubr.f32.vlgmr.msra.gmra.mrb[8].mxu1 %v12935_v60 }
 0x1ea   :  { %11993 = vmatpush3.bf16.msra.mxu1 %v13060_v43  ;;  %10901 = vmatprep.mubr.f32.mxu1 %v12937_v61  ;;  %v14818_v43 = vld [vmem:[#allocation16_spill] sm:$0xff]  ;;  %v13489_v50 = vpop.permute.xlu1 %833 }
 0x1eb   :  { %11995 = vmatprep.subr.bf16.mxu1 %v13064_v53  ;;  %14824 = vst [vmem:[#allocation57_spill] sm:$0xff] %v13489_v50 }
 0x1ed   :  { %10902 = vmatmul.mubr.f32.gmra.mrb[10].mxu1 %v12939_v62 }
 0x1ee   :  { %11997 = vmatpush3.bf16.msra.mxu1 %v13064_v53  ;;  %10912 = vmatprep.mubr.f32.mxu1 %v12894_v20  ;;  %v1484_v53 = vsel %vm173_vm0, %v119_v30, 0 }
 0x1ef   :  { %11999 = vmatprep.subr.msk.bf16.mxu1 %vm13043_vm9, %v14786_v18 }
 0x1f1   :  { %10913 = vmatmul.mubr.f32.vlgmr.msra.gmra.mrb[8].mxu1 %v12942_v63 }
 0x1f2   :  { %12001 = vmatpush3.bf16.msk.msra.mxu1 %vm13043_vm9, %v14786_v18  ;;  %10915 = vmatprep.mubr.f32.mxu1 %v12945_v0 }
 0x1f3   :  { %12003 = vmatprep.subr.msk.bf16.mxu1 %vm13056_vm12, %v14786_v18 }
 0x1f5   :  { %10916 = vmatmul.mubr.f32.gmra.mrb[10].mxu1 %v12948_v1 }
 0x1f6   :  { %12005 = vmatpush3.bf16.msk.msra.mxu1 %vm13056_vm12, %v14786_v18  ;;  %10926 = vmatprep.mubr.f32.mxu1 %v12898_v21 }
 0x1f7   :  { %12007 = vmatprep.subr.bf16.mxu1 %v13062_v49 }
 0x1f9   :  { %10927 = vmatmul.mubr.f32.vlgmr.msra.gmra.mrb[8].mxu1 %v12953_v3 }
 0x1fa   :  { %12009 = vmatpush3.bf16.msra.mxu1 %v13062_v49  ;;  %10929 = vmatprep.mubr.f32.mxu1 %v12956_v4  ;;  %v14819_v49 = vmov 0.0  }
 0x1fb   :  { %12011 = vmatprep.subr.bf16.mxu1 %v13069_v16 }
 0x1fd   :  { %10930 = vmatmul.mubr.f32.gmra.mrb[10].mxu1 %v14818_v43 }
 0x1fe   :  { %12013 = vmatpush3.bf16.msra.mxu1 %v13069_v16  ;;  %10940 = vmatprep.mubr.f32.mxu1 %v12885_v17  ;;  %v13467_v16 = vand.u32 4294901760, %v1484_v53 }
 0x1ff   :  { %12015 = vmatprep.subr.msk.bf16.mxu1 %vm13043_vm9, %v14786_v18 }
 0x200   :  { %v13470_v46 = vsub.f32 %v1484_v53, %v13467_v16 }
 0x201   :  { %10941 = vmatmul.mubr.f32.vlgmr.msra.gmra.mrb[8].mxu1 %v12935_v60 }
 0x202   :  { %12017 = vmatpush3.bf16.msk.msra.mxu1 %vm13043_vm9, %v14786_v18  ;;  %10943 = vmatprep.mubr.f32.mxu1 %v12937_v61  ;;  %vm12777_vm9 = vmmov 0   ;;  %v13477_v15 = vand.u32 4294901760, %v13470_v46 }
 0x203   :  { %12019 = vmatprep.subr.msk.bf16.mxu1 %vm13056_vm12, %v14786_v18  ;;  %10818 = vmatprep.mubr.msk.f32.mxu0 %vm12777_vm9, %v14819_v49 }
 0x204   :  { %v1558_v26 = vsub.f32 %v13470_v46, %v13477_v15 }
 0x205   :  { %10944 = vmatmul.mubr.f32.gmra.mrb[10].mxu1 %v12939_v62 }
 0x206   :  { %12021 = vmatpush3.bf16.msk.msra.mxu1 %vm13056_vm12, %v14786_v18  ;;  %10954 = vmatprep.mubr.f32.mxu1 %v12885_v17  ;;  %v13514_v31 = vand.u32 4294901760, %v1558_v26 }
 0x207   :  { %12070 = vmatprep.subr.bf16.mxu1 %v14685_v56 }
 0x209   :  { %10955 = vmatmul.mubr.f32.vlgmr.msra.gmra.mrb[8].mxu1 %v12935_v60 }
 0x20a   :  { %10957 = vmatprep.mubr.f32.mxu1 %v12937_v61 }
 0x20d   :  { %10958 = vmatmul.mubr.f32.gmra.mrb[10].mxu1 %v12939_v62 }
 0x20e   :  { %11052 = vmatprep.mubr.msk.f32.mxu1 %vm12777_vm9, %v14819_v49 }
 0x2ac   :  { %v10806_v12 = vpop.f32.mrb[4].mxu1 }
 0x2ad   :  { %v13480_v48 = vadd.f32 %v10806_v12, %v13472_v35  ;;  %v1440_v34 = vpop.f32.mrb[5].mxu1 }
 0x2ae   :  { %v13483_v51 = vadd.f32 %v1440_v34, %v13474_v24 }
 0x2af   :  { %14822 = vst [vmem:[#allocation55_spill] sm:$0xff] %v13480_v48  ;;  %vm1467_vm0 = vcmp.gt.f32.partialorder %v13480_v48, 0.5  ;;  %v3285_v54 = vmul.f32 0.75, %v13480_v48 }
 0x2b0   :  { %14823 = vst [vmem:[#allocation56_spill] sm:$0xff] %v13483_v51  ;;  %v9788_v2 = vsel %vm1467_vm0, 1.0, %v14819_v49  ;;  %vm1466_vm12 = vcmp.gt.f32.partialorder %v13483_v51, 0.5  ;;  %v3284_v10 = vmul.f32 0.75, %v13483_v51  ;;  %v10809_v45 = vpop.f32.mrb[6].mxu1 }
 0x2b1   :  { %v1574_v8 = vsub.f32 %v9788_v2, %v9788_v2  ;;  %v9787_v37 = vsel %vm1466_vm12, 1.0, %v14819_v49  ;;  %v13498_v52 = vadd.f32 %v10809_v45, %v13489_v50  ;;  %v1452_v29 = vpop.f32.mrb[7].mxu1  ;;  %vm13500_vm11 = vmpackc.low %vm1467_vm0, %vm1466_vm12  ;;  %vm3281_vm1 = vcmp.gt.f32.partialorder %v9788_v2, 0.0 }
 0x2b2   :  { %v1567_v5 = vsub.f32 %v9787_v37, %v9787_v37  ;;  %v13505_v41 = vadd.f32 %v1452_v29, %v13494_v47  ;;  %11940 = vmatpush3.bf16.msk.msra.mxu0 %vm13500_vm11, %v14786_v18  ;;  %v13510_v33 = vsel %vm3281_vm1, 0.0, %v3285_v54  ;;  %vm3280_vm5 = vcmp.gt.f32.partialorder %v9787_v37, 0.0 }
 0x2b3   :  { %14826 = vst [vmem:[#allocation59_spill] sm:$0xff] %v13498_v52  ;;  %14830 = vst [vmem:[#allocation61_spill] sm:$0xff] %v13510_v33  ;;  %v1575_v14 = vand.u32 4294901760, %v1574_v8  ;;  %vm1469_vm3 = vcmp.gt.f32.partialorder %v13498_v52, 0.5  ;;  %11941 = vmatprep.subr.bf16.mxu0 %v14685_v56  ;;  %v13516_v30 = vsel %vm3280_vm5, 0.0, %v3284_v10  ;;  %v3287_v34 = vmul.f32 0.75, %v13498_v52 }
 0x2b4   :  { %14829 = vst [vmem:[#allocation60_spill] sm:$0xff] %v13505_v41  ;;  %14831 = vst [vmem:[#allocation62_spill] sm:$0xff] %v13516_v30  ;;  %v1568_v53 = vand.u32 4294901760, %v1567_v5  ;;  %v9790_v12 = vsel %vm1469_vm3, 1.0, %v14819_v49  ;;  %vm1468_vm6 = vcmp.gt.f32.partialorder %v13505_v41, 0.5  ;;  %v11951_v29 = vpack.c.bf16 %v1574_v8, %v1567_v5 }
 0x2b5   :  { %v1588_v2 = vsub.f32 %v9790_v12, %v9790_v12  ;;  %v9789_v54 = vsel %vm1468_vm6, 1.0, %v14819_v49  ;;  %vm13522_vm10 = vmpackc.low %vm1469_vm3, %vm1468_vm6  ;;  %v1576_v37 = vsub.f32 %v1574_v8, %v1575_v14  ;;  %v3286_v10 = vmul.f32 0.75, %v13505_v41 }
 0x2b6   :  { %v1581_v26 = vsub.f32 %v9789_v54, %v9789_v54  ;;  %11943 = vmatpush3.bf16.msk.msra.mxu0 %vm13522_vm10, %v14786_v18  ;;  %v1569_v56 = vsub.f32 %v1567_v5, %v1568_v53  ;;  %v11963_v47 = vpack.c.bf16 %v1575_v14, %v1568_v53  ;;  %v14834_v30 = vmov 0.0|0.0  }
 0x2b7   :  { %v1589_v50 = vand.u32 4294901760, %v1588_v2  ;;  %11944 = vmatprep.subr.bf16.mxu0 %v14834_v30  ;;  %v1577_v33 = vand.u32 4294901760, %v1576_v37  ;;  %vm3283_vm14 = vcmp.gt.f32.partialorder %v9790_v12, 0.0  ;;  %vm3282_vm0 = vcmp.gt.f32.partialorder %v9789_v54, 0.0  ;;  %v14839_v54 = vld [vmem:[#allocation49_spill] sm:$0xff] }
 0x2b8   :  { %v1582_v24 = vand.u32 4294901760, %v1581_v26  ;;  %v1570_v52 = vand.u32 4294901760, %v1569_v56  ;;  %v11954_v35 = vpack.c.bf16 %v1588_v2, %v1581_v26  ;;  %v13531_v51 = vsel %vm3283_vm14, 0.0, %v3287_v34  ;;  %v14837_v34 = vld [vmem:[#allocation43_spill] sm:$0xff] }
 0x2b9   :  { %10819 = vmatmul.mubr.f32.vlgmr.msra.gmra.mrb[4].mxu0 %v13514_v31  ;;  %v1590_v8 = vsub.f32 %v1588_v2, %v1589_v50  ;;  %v13536_v14 = vsel %vm3282_vm0, 0.0, %v3286_v10  ;;  %v2003_v37 = vmul.f32 0.5, %v14839_v54  ;;  %v14842_v10 = vld [vmem:[#allocation50_spill] sm:$0xff] }
 0x2ba   :  { %v11945_v41 = vpack.c.bf16 %v1577_v33, %v1570_v52  ;;  %v1583_v48 = vsub.f32 %v1581_v26, %v1582_v24  ;;  %10829 = vmatprep.mubr.msk.f32.mxu0 %vm12777_vm9, %v14819_v49  ;;  %v11966_v5 = vpack.c.bf16 %v1589_v50, %v1582_v24  ;;  %v14836_v50 = vld [vmem:[#allocation47_spill] sm:$0xff] }
 0x2bb   :  { %v1591_v53 = vand.u32 4294901760, %v1590_v8  ;;  %v2000_v52 = vmul.f32 0.5, %v14836_v50  ;;  %v2002_v8 = vmul.f32 0.5, %v14842_v10 }
 0x2bc   :  { %11946 = vmatpush3.bf16.msra.mxu0 %v11945_v41  ;;  %v1584_v12 = vand.u32 4294901760, %v1583_v48 }
 0x2bd   :  { %11947 = vmatprep.subr.bf16.mxu0 %v14834_v30 }
 0x2be   :  { %v11948_v56 = vpack.c.bf16 %v1591_v53, %v1584_v12 }
 0x2c0   :  { %11949 = vmatpush3.bf16.msra.mxu0 %v11948_v56 }
 0x2c1   :  { %11950 = vmatprep.subr.bf16.mxu0 %v14834_v30 }
 0x2c3   :  { %10830 = vmatmul.mubr.f32.vlgmr.msra.gmra.mrb[4].mxu0 %v13467_v16 }
 0x2c4   :  { %11952 = vmatpush3.bf16.msra.mxu0 %v11951_v29  ;;  %10840 = vmatprep.mubr.msk.f32.mxu0 %vm12777_vm9, %v14819_v49  ;;  %v14840_v29 = vld [vmem:[#allocation44_spill] sm:$0xff] }
 0x2c5   :  { %11953 = vmatprep.subr.bf16.mxu0 %v14834_v30 }
 0x2c8   :  { %11955 = vmatpush3.bf16.msra.mxu0 %v11954_v35  ;;  %v14835_v35 = vld [vmem:[#allocation45_spill] sm:$0xff] }
 0x2c9   :  { %11956 = vmatprep.subr.bf16.mxu0 %v14834_v30  ;;  %v2001_v24 = vmul.f32 0.5, %v14835_v35  ;;  %v14844_v35 = vld [vmem:[#allocation52_spill] sm:$0xff] }
 0x2cb   :  { %10841 = vmatmul.mubr.f32.vlgmr.msra.gmra.mrb[4].mxu0 %v13470_v46 }
 0x2cc   :  { %11958 = vmatpush3.bf16.msk.msra.mxu0 %vm13500_vm11, %v14786_v18  ;;  %10851 = vmatprep.mubr.msk.f32.mxu0 %vm12777_vm9, %v14819_v49 }
 0x2cd   :  { %11959 = vmatprep.subr.bf16.mxu0 %v14834_v30 }
 0x2d0   :  { %11961 = vmatpush3.bf16.msk.msra.mxu0 %vm13522_vm10, %v14786_v18 }
 0x2d1   :  { %11962 = vmatprep.subr.bf16.mxu0 %v14834_v30 }
 0x2d3   :  { %10852 = vmatmul.mubr.f32.vlgmr.msra.gmra.mrb[4].mxu0 %v13477_v15 }
 0x2d4   :  { %11964 = vmatpush3.bf16.msra.mxu0 %v11963_v47  ;;  %10862 = vmatprep.mubr.msk.f32.mxu0 %vm12777_vm9, %v14819_v49 }
 0x2d5   :  { %11965 = vmatprep.subr.bf16.mxu0 %v14834_v30 }
 0x2d8   :  { %11967 = vmatpush3.bf16.msra.mxu0 %v11966_v5  ;;  %v14843_v5 = vld [vmem:[#allocation51_spill] sm:$0xff] }
 0x2d9   :  { %11968 = vmatprep.subr.bf16.mxu0 %v14834_v30 }
 0x2db   :  { %10863 = vmatmul.mubr.f32.vlgmr.msra.gmra.mrb[4].mxu0 %v13467_v16 }
 0x2dc   :  { %11970 = vmatpush3.bf16.msk.msra.mxu0 %vm13500_vm11, %v14786_v18  ;;  %v10956_v48 = vpop.f32.mrb[8].mxu1  ;;  %10873 = vmatprep.mubr.msk.f32.mxu0 %vm12777_vm9, %v14819_v49 }
 0x2dd   :  { %v2619_v47 = vadd.f32 %v10956_v48, %v2001_v24  ;;  %v2596_v41 = vpop.f32.mrb[9].mxu1  ;;  %11971 = vmatprep.subr.bf16.mxu0 %v14834_v30 }
 0x2de   :  { %v2618_v33 = vadd.f32 %v2596_v41, %v2000_v52  ;;  %v14845_v52 = vld [vmem:[#allocation46_spill] sm:$0xff] }
 0x2df   :  { %v13571_v2 = vadd.f32 %v2619_v47, %v14837_v34 }
 0x2e0   :  { %v13575_v26 = vadd.f32 %v2618_v33, %v14840_v29  ;;  %11973 = vmatpush3.bf16.msk.msra.mxu0 %vm13522_vm10, %v14786_v18  ;;  %v10959_v59 = vpop.f32.mrb[10].mxu1  ;;  %v14847_v33 = vld [vmem:[#allocation48_spill] sm:$0xff] }
 0x2e1   :  { %14838 = vst [vmem:[#allocation45_spill] sm:$0xff] %v13571_v2  ;;  %v2639_v53 = vadd.f32 %v14843_v5, %v13571_v2  ;;  %v2621_v12 = vadd.f32 %v10959_v59, %v2003_v37  ;;  %v2608_v56 = vpop.f32.mrb[11].mxu1  ;;  %v14849_v37 = vld [vmem:[#allocation42_spill] sm:$0xff] }
 0x2e2   :  { %14841 = vst [vmem:[#allocation47_spill] sm:$0xff] %v13575_v26  ;;  %v2638_v24 = vadd.f32 %v14844_v35, %v13575_v26  ;;  %v2620_v48 = vadd.f32 %v2608_v56, %v2002_v8 }
 0x2e3   :  { %vm2643_vm12 = vcmp.gt.f32.partialorder %v2639_v53, 0.5  ;;  %v4459_v50 = vmul.f32 0.75, %v2639_v53  ;;  %v13586_v47 = vadd.f32 %v2621_v12, %v14845_v52  ;;  %10874 = vmatmul.mubr.f32.vlgmr.msra.gmra.mrb[4].mxu0 %v13467_v16 }
 0x2e4   :  { %v9821_v45 = vsel %vm2643_vm12, 1.0, %v14819_v49  ;;  %vm2642_vm11 = vcmp.gt.f32.partialorder %v2638_v24, 0.5  ;;  %v4458_v41 = vmul.f32 0.75, %v2638_v24  ;;  %v13591_v54 = vadd.f32 %v2620_v48, %v14847_v33  ;;  %10968 = vmatprep.mubr.f32.mxu0 %v14849_v37 }
 0x2e5   :  { %14846 = vst [vmem:[#allocation49_spill] sm:$0xff] %v13586_v47  ;;  %v2776_v59 = vsub.f32 %v9821_v45, %v9821_v45  ;;  %v9820_v10 = vsel %vm2642_vm11, 1.0, %v14819_v49  ;;  %vm13595_vm1 = vmpackc.low %vm2643_vm12, %vm2642_vm11  ;;  %v2641_v5 = vadd.f32 %v13332_v23, %v13586_v47  ;;  %vm4455_vm5 = vcmp.gt.f32.partialorder %v9821_v45, 0.0 }
 0x2e6   :  { %14848 = vst [vmem:[#allocation50_spill] sm:$0xff] %v13591_v54  ;;  %v2769_v53 = vsub.f32 %v9820_v10, %v9820_v10  ;;  %v2640_v12 = vadd.f32 %v13337_v6, %v13591_v54  ;;  %12023 = vmatprep.subr.msk.bf16.mxu0 %vm13595_vm1, %v14786_v18  ;;  %v13606_v56 = vsel %vm4455_vm5, 0.0, %v4459_v50  ;;  %vm4454_vm3 = vcmp.gt.f32.partialorder %v9820_v10, 0.0  ;;  %v14865_v50 = vld [vmem:[#allocation56_spill] sm:$0xff] }
 0x2e7   :  { %14852 = vst [vmem:[#allocation51_spill] sm:$0xff] %v13606_v56  ;;  %vm2645_vm6 = vcmp.gt.f32.partialorder %v2641_v5, 0.5  ;;  %12025 = vmatpush3.bf16.msk.msra.mxu0 %vm13595_vm1, %v14786_v18  ;;  %v2777_v35 = vand.u32 4294901760, %v2776_v59  ;;  %v13611_v24 = vsel %vm4454_vm3, 0.0, %v4458_v41  ;;  %v4461_v48 = vmul.f32 0.75, %v2641_v5 }
 0x2e8   :  { %14853 = vst [vmem:[#allocation52_spill] sm:$0xff] %v13611_v24  ;;  %v9823_v23 = vsel %vm2645_vm6, 1.0, %v14819_v49  ;;  %vm2644_vm10 = vcmp.gt.f32.partialorder %v2640_v12, 0.5  ;;  %v2770_v6 = vand.u32 4294901760, %v2769_v53  ;;  %v12038_v33 = vpack.c.bf16 %v2776_v59, %v2769_v53 }
 0x2e9   :  { %v2790_v45 = vsub.f32 %v9823_v23, %v9823_v23  ;;  %v9822_v37 = vsel %vm2644_vm10, 1.0, %v14819_v49  ;;  %vm13615_vm14 = vmpackc.low %vm2645_vm6, %vm2644_vm10  ;;  %v2778_v10 = vsub.f32 %v2776_v59, %v2777_v35  ;;  %v4460_v56 = vmul.f32 0.75, %v2640_v12 }
 0x2ea   :  { %v2783_v52 = vsub.f32 %v9822_v37, %v9822_v37  ;;  %12027 = vmatprep.subr.msk.bf16.mxu0 %vm13615_vm14, %v14786_v18  ;;  %v2771_v41 = vsub.f32 %v2769_v53, %v2770_v6  ;;  %v12054_v24 = vpack.c.bf16 %v2777_v35, %v2770_v6  ;;  %vm4457_vm0 = vcmp.gt.f32.partialorder %v9823_v23, 0.0 }
 0x2eb   :  { %12029 = vmatpush3.bf16.msk.msra.mxu0 %vm13615_vm14, %v14786_v18  ;;  %v2779_v5 = vand.u32 4294901760, %v2778_v10  ;;  %v2791_v54 = vand.u32 4294901760, %v2790_v45  ;;  %v13625_v26 = vsel %vm4457_vm0, 0.0, %v4461_v48  ;;  %vm4456_vm12 = vcmp.gt.f32.partialorder %v9822_v37, 0.0  ;;  %v14863_v37 = vld [vmem:[#allocation24_spill] sm:$0xff] }
 0x2ec   :  { %v2772_v29 = vand.u32 4294901760, %v2771_v41  ;;  %v2784_v47 = vand.u32 4294901760, %v2783_v52  ;;  %v12042_v34 = vpack.c.bf16 %v2790_v45, %v2783_v52  ;;  %v13628_v35 = vsel %vm4456_vm12, 0.0, %v4460_v56 }
 0x2ed   :  { %v2792_v59 = vsub.f32 %v2790_v45, %v2791_v54  ;;  %v2654_v41 = vmul.f32 0.5, %v14865_v50 }
 0x2ee   :  { %10969 = vmatmul.mubr.f32.vlgmr.msra.gmra.mrb[6].mxu0 %v13277_v57  ;;  %v12030_v12 = vpack.c.bf16 %v2779_v5, %v2772_v29  ;;  %v2785_v2 = vsub.f32 %v2783_v52, %v2784_v47  ;;  %v12058_v53 = vpack.c.bf16 %v2791_v54, %v2784_v47  ;;  %v14858_v29 = vld [vmem:[#allocation23_spill] sm:$0xff]  ;;  %v14859_v52 = vld [vmem:[#allocation26_spill] sm:$0xff]  ;;  %v14860_v47 = vld [vmem:[#allocation20_spill] sm:$0xff] }
 0x2ef   :  { %10971 = vmatprep.mubr.f32.mxu0 %v13330_v55  ;;  %v2793_v6 = vand.u32 4294901760, %v2792_v59  ;;  %v14862_v54 = vld [vmem:[#allocation21_spill] sm:$0xff] }
 0x2f0   :  { %12031 = vmatprep.subr.bf16.mxu0 %v12030_v12  ;;  %v2786_v10 = vand.u32 4294901760, %v2785_v2 }
 0x2f1   :  { %12033 = vmatpush3.bf16.msra.mxu0 %v12030_v12 }
 0x2f2   :  { %10972 = vmatmul.mubr.f32.gmra.mrb[8].mxu0 %v13334_v58  ;;  %v12034_v23 = vpack.c.bf16 %v2793_v6, %v2786_v10  ;;  %v14867_v10 = vld [vmem:[#allocation59_spill] sm:$0xff] }
 0x2f3   :  { %10982 = vmatprep.mubr.f32.mxu0 %v13217_v22 }
 0x2f4   :  { %12035 = vmatprep.subr.bf16.mxu0 %v12034_v23 }
 0x2f5   :  { %12037 = vmatpush3.bf16.msra.mxu0 %v12034_v23  ;;  %v2657_v23 = vmul.f32 0.5, %v14867_v10  ;;  %v14873_v10 = vld [vmem:[#allocation58_spill] sm:$0xff] }
 0x2f6   :  { %12039 = vmatprep.subr.bf16.mxu0 %v12038_v33 }
 0x2f8   :  { %10983 = vmatmul.mubr.f32.vlgmr.msra.gmra.mrb[6].mxu0 %v13237_v39 }
 0x2f9   :  { %12041 = vmatpush3.bf16.msra.mxu0 %v12038_v33  ;;  %10985 = vmatprep.mubr.f32.mxu0 %v13246_v7  ;;  %v14861_v33 = vld [vmem:[#allocation22_spill] sm:$0xff] }
 0x2fa   :  { %12043 = vmatprep.subr.bf16.mxu0 %v12042_v34 }
 0x2fc   :  { %10986 = vmatmul.mubr.f32.gmra.mrb[8].mxu0 %v13252_v32 }
 0x2fd   :  { %12045 = vmatpush3.bf16.msra.mxu0 %v12042_v34  ;;  %10996 = vmatprep.mubr.f32.mxu0 %v13220_v9  ;;  %v14868_v34 = vld [vmem:[#allocation54_spill] sm:$0xff] }
 0x2fe   :  { %12047 = vmatprep.subr.msk.bf16.mxu0 %vm13595_vm1, %v14786_v18 }
 0x300   :  { %10997 = vmatmul.mubr.f32.vlgmr.msra.gmra.mrb[6].mxu0 %v13244_v13 }
 0x301   :  { %12049 = vmatpush3.bf16.msk.msra.mxu0 %vm13595_vm1, %v14786_v18  ;;  %10999 = vmatprep.mubr.f32.mxu0 %v13255_v11 }
 0x302   :  { %12051 = vmatprep.subr.msk.bf16.mxu0 %vm13615_vm14, %v14786_v18 }
 0x304   :  { %11000 = vmatmul.mubr.f32.gmra.mrb[8].mxu0 %v13264_v27 }
 0x305   :  { %12053 = vmatpush3.bf16.msk.msra.mxu0 %vm13615_vm14, %v14786_v18  ;;  %11010 = vmatprep.mubr.f32.mxu0 %v13223_v28 }
 0x306   :  { %12055 = vmatprep.subr.bf16.mxu0 %v12054_v24 }
 0x308   :  { %11011 = vmatmul.mubr.f32.vlgmr.msra.gmra.mrb[6].mxu0 %v13250_v42 }
 0x309   :  { %12057 = vmatpush3.bf16.msra.mxu0 %v12054_v24  ;;  %11013 = vmatprep.mubr.f32.mxu0 %v13268_v19  ;;  %v14864_v24 = vld [vmem:[#allocation55_spill] sm:$0xff] }
 0x30a   :  { %12059 = vmatprep.subr.bf16.mxu0 %v12058_v53  ;;  %v2655_v48 = vmul.f32 0.5, %v14864_v24  ;;  %v14871_v24 = vld [vmem:[#allocation62_spill] sm:$0xff] }
 0x30c   :  { %11014 = vmatmul.mubr.f32.gmra.mrb[8].mxu0 %v13280_v38 }
 0x30d   :  { %12061 = vmatpush3.bf16.msra.mxu0 %v12058_v53  ;;  %11024 = vmatprep.mubr.f32.mxu0 %v13217_v22  ;;  %v14866_v53 = vld [vmem:[#allocation53_spill] sm:$0xff] }
 0x30e   :  { %12063 = vmatprep.subr.msk.bf16.mxu0 %vm13595_vm1, %v14786_v18 }
 0x310   :  { %11025 = vmatmul.mubr.f32.vlgmr.msra.gmra.mrb[6].mxu0 %v13237_v39 }
 0x311   :  { %12065 = vmatpush3.bf16.msk.msra.mxu0 %vm13595_vm1, %v14786_v18  ;;  %11027 = vmatprep.mubr.f32.mxu0 %v13246_v7 }
 0x312   :  { %12067 = vmatprep.subr.msk.bf16.mxu0 %vm13615_vm14, %v14786_v18 }
 0x314   :  { %11028 = vmatmul.mubr.f32.gmra.mrb[8].mxu0 %v13252_v32 }
 0x315   :  { %12069 = vmatpush3.bf16.msk.msra.mxu0 %vm13615_vm14, %v14786_v18  ;;  %11038 = vmatprep.mubr.f32.mxu0 %v13217_v22 }
 0x316   :  { %12107 = vmatprep.subr.msk.bf16.mxu0 %vm13077_vm15, %v14786_v18 }
 0x318   :  { %11039 = vmatmul.mubr.f32.vlgmr.msra.gmra.mrb[6].mxu0 %v13237_v39 }
 0x319   :  { %12109 = vmatpush3.bf16.msk.msra.mxu0 %vm13077_vm15, %v14786_v18  ;;  %11041 = vmatprep.mubr.f32.mxu0 %v13246_v7 }
 0x31a   :  { %12111 = vmatprep.subr.msk.bf16.mxu0 %vm13099_vm4, %v14786_v18 }
 0x31c   :  { %11042 = vmatmul.mubr.f32.gmra.mrb[8].mxu0 %v13252_v32 }
 0x31d   :  { %12113 = vmatpush3.bf16.msk.msra.mxu0 %vm13099_vm4, %v14786_v18  ;;  %11118 = vmatprep.mubr.f32.mxu0 %v12908_v25 }
 0x31e   :  { %12115 = vmatprep.subr.bf16.mxu0 %v14858_v29 }
 0x320   :  { %11119 = vmatmul.mubr.f32.vlgmr.msra.gmra.mrb[10].mxu0 %v13011_v36 }
 0x321   :  { %12117 = vmatpush3.bf16.msra.mxu0 %v14858_v29  ;;  %11121 = vmatprep.mubr.f32.mxu0 %v13021_v40 }
 0x322   :  { %12119 = vmatprep.subr.bf16.mxu0 %v14859_v52 }
 0x324   :  { %11122 = vmatmul.mubr.f32.gmra.mrb[12].mxu0 %v13025_v44 }
 0x325   :  { %12121 = vmatpush3.bf16.msra.mxu0 %v14859_v52  ;;  %11132 = vmatprep.mubr.f32.mxu0 %v12885_v17  ;;  %v14869_v52 = vld [vmem:[#allocation60_spill] sm:$0xff] }
 0x326   :  { %12123 = vmatprep.subr.bf16.mxu0 %v14860_v47 }
 0x328   :  { %11133 = vmatmul.mubr.f32.vlgmr.msra.gmra.mrb[10].mxu0 %v12935_v60 }
 0x329   :  { %12125 = vmatpush3.bf16.msra.mxu0 %v14860_v47  ;;  %11135 = vmatprep.mubr.f32.mxu0 %v12937_v61  ;;  %v2656_v47 = vmul.f32 0.5, %v14869_v52 }
 0x32a   :  { %12127 = vmatprep.subr.bf16.mxu0 %v14861_v33 }
 0x32c   :  { %11136 = vmatmul.mubr.f32.gmra.mrb[12].mxu0 %v12939_v62 }
 0x32d   :  { %12129 = vmatpush3.bf16.msra.mxu0 %v14861_v33  ;;  %11146 = vmatprep.mubr.f32.mxu0 %v12894_v20  ;;  %v14870_v33 = vld [vmem:[#allocation61_spill] sm:$0xff] }
 0x32e   :  { %12131 = vmatprep.subr.msk.bf16.mxu0 %vm13077_vm15, %v14786_v18 }
 0x330   :  { %11147 = vmatmul.mubr.f32.vlgmr.msra.gmra.mrb[10].mxu0 %v12942_v63 }
 0x331   :  { %12133 = vmatpush3.bf16.msk.msra.mxu0 %vm13077_vm15, %v14786_v18  ;;  %11149 = vmatprep.mubr.f32.mxu0 %v12945_v0 }
 0x332   :  { %12135 = vmatprep.subr.msk.bf16.mxu0 %vm13099_vm4, %v14786_v18 }
 0x334   :  { %11150 = vmatmul.mubr.f32.gmra.mrb[12].mxu0 %v12948_v1 }
 0x335   :  { %12137 = vmatpush3.bf16.msk.msra.mxu0 %vm13099_vm4, %v14786_v18  ;;  %11160 = vmatprep.mubr.f32.mxu0 %v12898_v21 }
 0x336   :  { %12139 = vmatprep.subr.bf16.mxu0 %v14862_v54 }
 0x338   :  { %11161 = vmatmul.mubr.f32.vlgmr.msra.gmra.mrb[10].mxu0 %v12953_v3 }
 0x339   :  { %12141 = vmatpush3.bf16.msra.mxu0 %v14862_v54  ;;  %11163 = vmatprep.mubr.f32.mxu0 %v12956_v4 }
 0x33a   :  { %12143 = vmatprep.subr.bf16.mxu0 %v14863_v37 }
 0x33c   :  { %11164 = vmatmul.mubr.f32.gmra.mrb[12].mxu0 %v14818_v43 }
 0x33d   :  { %12145 = vmatpush3.bf16.msra.mxu0 %v14863_v37  ;;  %11174 = vmatprep.mubr.f32.mxu0 %v12885_v17 }
 0x33e   :  { %12147 = vmatprep.subr.msk.bf16.mxu0 %vm13077_vm15, %v14786_v18 }
 0x340   :  { %11175 = vmatmul.mubr.f32.vlgmr.msra.gmra.mrb[10].mxu0 %v12935_v60 }
 0x341   :  { %12149 = vmatpush3.bf16.msk.msra.mxu0 %vm13077_vm15, %v14786_v18  ;;  %11177 = vmatprep.mubr.f32.mxu0 %v12937_v61 }
 0x342   :  { %12151 = vmatprep.subr.msk.bf16.mxu0 %vm13099_vm4, %v14786_v18 }
 0x344   :  { %11178 = vmatmul.mubr.f32.gmra.mrb[12].mxu0 %v12939_v62 }
 0x345   :  { %12153 = vmatpush3.bf16.msk.msra.mxu0 %vm13099_vm4, %v14786_v18  ;;  %11188 = vmatprep.mubr.f32.mxu0 %v12885_v17 }
 0x346   :  { %12202 = vmatprep.subr.bf16.mxu0 %v14834_v30 }
 0x348   :  { %11189 = vmatmul.mubr.f32.vlgmr.msra.gmra.mrb[10].mxu0 %v12935_v60 }
 0x349   :  { %11191 = vmatprep.mubr.f32.mxu0 %v12937_v61 }
 0x34c   :  { %11192 = vmatmul.mubr.f32.gmra.mrb[12].mxu0 %v12939_v62 }
 0x34d   :  { %11286 = vmatprep.mubr.msk.f32.mxu0 %vm12777_vm9, %v14819_v49 }
 0x3b6   :  { %v13751_v8 = vpop.f32.mrb[4].mxu0 }
 0x3b7   :  { %v10875_v56 = vpop.f32.mrb[5].mxu0 }
 0x3eb   :  { %v11040_v45 = vpop.f32.mrb[6].mxu0 }
 0x3ec   :  { %v3273_v5 = vadd.f32 %v11040_v45, %v2655_v48  ;;  %v3250_v59 = vpop.f32.mrb[7].mxu0 }
 0x3ed   :  { %v3272_v12 = vadd.f32 %v3250_v59, %v2654_v41  ;;  %v14872_v41 = vld [vmem:[#allocation57_spill] sm:$0xff] }
 0x3ee   :  { %v13756_v6 = vadd.f32 %v3273_v5, %v14866_v53 }
 0x3ef   :  { %v13760_v2 = vadd.f32 %v3272_v12, %v14868_v34  ;;  %v11043_v29 = vpop.f32.mrb[8].mxu0 }
 0x3f0   :  { %v3293_v54 = vadd.f32 %v14870_v33, %v13756_v6  ;;  %v3275_v37 = vadd.f32 %v11043_v29, %v2657_v23  ;;  %v3262_v56 = vpop.f32.mrb[9].mxu0 }
 0x3f1   :  { %v3292_v48 = vadd.f32 %v14871_v24, %v13760_v2  ;;  %v3274_v45 = vadd.f32 %v3262_v56, %v2656_v47 }
 0x3f2   :  { %vm3297_vm15 = vcmp.gt.f32.partialorder %v3293_v54, 0.5  ;;  %v5113_v50 = vmul.f32 0.75, %v3293_v54  ;;  %v13768_v5 = vadd.f32 %v3275_v37, %v14872_v41 }
 0x3f3   :  { %v9837_v59 = vsel %vm3297_vm15, 1.0, %v14819_v49  ;;  %vm3296_vm4 = vcmp.gt.f32.partialorder %v3292_v48, 0.5  ;;  %v5112_v12 = vmul.f32 0.75, %v3292_v48  ;;  %v13772_v52 = vadd.f32 %v3274_v45, %v14873_v10 }
 0x3f4   :  { %v3397_v43 = vsub.f32 %v9837_v59, %v9837_v59  ;;  %v9836_v23 = vsel %vm3296_vm4, 1.0, %v14819_v49  ;;  %v3295_v29 = vadd.f32 %v13531_v51, %v13768_v5  ;;  %vm13777_vm11 = vmpackc.low %vm3297_vm15, %vm3296_vm4  ;;  %vm5109_vm1 = vcmp.gt.f32.partialorder %v9837_v59, 0.0 }
 0x3f5   :  { %v3390_v33 = vsub.f32 %v9836_v23, %v9836_v23  ;;  %v3294_v54 = vadd.f32 %v13536_v14, %v13772_v52  ;;  %12072 = vmatpush3.bf16.msk.msra.mxu1 %vm13777_vm11, %v14786_v18  ;;  %v13786_v37 = vsel %vm5109_vm1, 0.0, %v5113_v50  ;;  %vm5108_vm5 = vcmp.gt.f32.partialorder %v9836_v23, 0.0 }
 0x3f6   :  { %vm3299_vm3 = vcmp.gt.f32.partialorder %v3295_v29, 0.5  ;;  %12073 = vmatprep.subr.bf16.mxu1 %v14834_v30  ;;  %v3398_v51 = vand.u32 4294901760, %v3397_v43  ;;  %v13789_v56 = vsel %vm5108_vm5, 0.0, %v5112_v12  ;;  %v5115_v48 = vmul.f32 0.75, %v3295_v29 }
 0x3f7   :  { %v9839_v24 = vsel %vm3299_vm3, 1.0, %v14819_v49  ;;  %vm3298_vm6 = vcmp.gt.f32.partialorder %v3294_v54, 0.5  ;;  %v3391_v45 = vand.u32 4294901760, %v3390_v33  ;;  %v12083_v23 = vpack.c.bf16 %v3397_v43, %v3390_v33 }
 0x3f8   :  { %v3411_v59 = vsub.f32 %v9839_v24, %v9839_v24  ;;  %v9838_v14 = vsel %vm3298_vm6, 1.0, %v14819_v49  ;;  %vm13793_vm10 = vmpackc.low %vm3299_vm3, %vm3298_vm6  ;;  %v3399_v50 = vsub.f32 %v3397_v43, %v3398_v51  ;;  %v5114_v21 = vmul.f32 0.75, %v3294_v54 }
 0x3f9   :  { %v3404_v3 = vsub.f32 %v9838_v14, %v9838_v14  ;;  %12075 = vmatpush3.bf16.msk.msra.mxu1 %vm13793_vm10, %v14786_v18  ;;  %v3392_v12 = vsub.f32 %v3390_v33, %v3391_v45  ;;  %v12095_v1 = vpack.c.bf16 %v3398_v51, %v3391_v45  ;;  %vm5111_vm14 = vcmp.gt.f32.partialorder %v9839_v24, 0.0 }
 0x3fa   :  { %12076 = vmatprep.subr.bf16.mxu1 %v14834_v30  ;;  %v3400_v29 = vand.u32 4294901760, %v3399_v50  ;;  %v3412_v0 = vand.u32 4294901760, %v3411_v59  ;;  %v13801_v61 = vsel %vm5111_vm14, 0.0, %v5115_v48  ;;  %vm5110_vm0 = vcmp.gt.f32.partialorder %v9838_v14, 0.0 }
 0x3fb   :  { %v3393_v63 = vand.u32 4294901760, %v3392_v12  ;;  %v3405_v20 = vand.u32 4294901760, %v3404_v3  ;;  %v12086_v62 = vpack.c.bf16 %v3411_v59, %v3404_v3  ;;  %v13806_v51 = vsel %vm5110_vm0, 0.0, %v5114_v21  ;;  %v14883_v12 = vld [vmem:[#allocation44_spill] sm:$0xff] }
 0x3fc   :  { %11053 = vmatmul.mubr.f32.vlgmr.msra.gmra.mrb[12].mxu1 %v13514_v31  ;;  %v3413_v43 = vsub.f32 %v3411_v59, %v3412_v0  ;;  %v14880_v59 = vld [vmem:[#allocation43_spill] sm:$0xff] }
 0x3fd   :  { %v12077_v54 = vpack.c.bf16 %v3400_v29, %v3393_v63  ;;  %v3406_v60 = vsub.f32 %v3404_v3, %v3405_v20  ;;  %11063 = vmatprep.mubr.msk.f32.mxu1 %vm12777_vm9, %v14819_v49  ;;  %v12098_v33 = vpack.c.bf16 %v3412_v0, %v3405_v20  ;;  %v14878_v20 = vld [vmem:[#allocation45_spill] sm:$0xff] }
 0x3fe   :  { %v3414_v45 = vand.u32 4294901760, %v3413_v43  ;;  %v3829_v21 = vmul.f32 0.5, %v14878_v20 }
 0x3ff   :  { %12078 = vmatpush3.bf16.msra.mxu1 %v12077_v54  ;;  %v3407_v24 = vand.u32 4294901760, %v3406_v60  ;;  %v14885_v54 = vld [vmem:[#allocation50_spill] sm:$0xff] }
 0x400   :  { %12079 = vmatprep.subr.bf16.mxu1 %v14834_v30 }
 0x401   :  { %v12080_v50 = vpack.c.bf16 %v3414_v45, %v3407_v24  ;;  %v14886_v45 = vld [vmem:[#allocation51_spill] sm:$0xff] }
 0x403   :  { %12081 = vmatpush3.bf16.msra.mxu1 %v12080_v50 }
 0x404   :  { %12082 = vmatprep.subr.bf16.mxu1 %v14834_v30 }
 0x406   :  { %11064 = vmatmul.mubr.f32.vlgmr.msra.gmra.mrb[14].mxu1 %v13467_v16 }
 0x407   :  { %12084 = vmatpush3.bf16.msra.mxu1 %v12083_v23  ;;  %11074 = vmatprep.mubr.msk.f32.mxu1 %vm12777_vm9, %v14819_v49 }
 0x408   :  { %12085 = vmatprep.subr.bf16.mxu1 %v14834_v30 }
 0x40b   :  { %12087 = vmatpush3.bf16.msra.mxu1 %v12086_v62  ;;  %v14879_v62 = vld [vmem:[#allocation47_spill] sm:$0xff] }
 0x40c   :  { %12088 = vmatprep.subr.bf16.mxu1 %v14834_v30  ;;  %v3828_v63 = vmul.f32 0.5, %v14879_v62 }
 0x40e   :  { %11075 = vmatmul.mubr.f32.vlgmr.msra.gmra.mrb[16].mxu1 %v13470_v46 }
 0x40f   :  { %12090 = vmatpush3.bf16.msk.msra.mxu1 %vm13777_vm11, %v14786_v18  ;;  %11085 = vmatprep.mubr.msk.f32.mxu1 %vm12777_vm9, %v14819_v49 }
 0x410   :  { %12091 = vmatprep.subr.bf16.mxu1 %v14834_v30 }
 0x413   :  { %12093 = vmatpush3.bf16.msk.msra.mxu1 %vm13793_vm10, %v14786_v18 }
 0x414   :  { %12094 = vmatprep.subr.bf16.mxu1 %v14834_v30 }
 0x416   :  { %11086 = vmatmul.mubr.f32.vlgmr.msra.gmra.mrb[18].mxu1 %v13477_v15 }
 0x417   :  { %12096 = vmatpush3.bf16.msra.mxu1 %v12095_v1  ;;  %11096 = vmatprep.mubr.msk.f32.mxu1 %vm12777_vm9, %v14819_v49  ;;  %v14882_v1 = vld [vmem:[#allocation49_spill] sm:$0xff] }
 0x418   :  { %12097 = vmatprep.subr.bf16.mxu1 %v14834_v30  ;;  %v3831_v23 = vmul.f32 0.5, %v14882_v1  ;;  %v14890_v1 = vld [vmem:[#allocation48_spill] sm:$0xff] }
 0x41b   :  { %12099 = vmatpush3.bf16.msra.mxu1 %v12098_v33  ;;  %v11190_v60 = vpop.f32.mrb[10].mxu0  ;;  %v3830_v33 = vmul.f32 0.5, %v14885_v54 }
 0x41c   :  { %v4447_v0 = vadd.f32 %v11190_v60, %v3829_v21  ;;  %v4424_v3 = vpop.f32.mrb[11].mxu0  ;;  %12100 = vmatprep.subr.bf16.mxu1 %v14834_v30  ;;  %v14887_v21 = vld [vmem:[#allocation52_spill] sm:$0xff] }
 0x41d   :  { %v4446_v48 = vadd.f32 %v4424_v3, %v3828_v63  ;;  %v14888_v63 = vld [vmem:[#allocation46_spill] sm:$0xff] }
 0x41e   :  { %v13834_v14 = vadd.f32 %v4447_v0, %v14880_v59  ;;  %11097 = vmatmul.mubr.f32.vlgmr.msra.gmra.mrb[20].mxu1 %v13467_v16 }
 0x41f   :  { %v13839_v29 = vadd.f32 %v4446_v48, %v14883_v12  ;;  %12102 = vmatpush3.bf16.msk.msra.mxu1 %vm13777_vm11, %v14786_v18  ;;  %v11193_v43 = vpop.f32.mrb[12].mxu0  ;;  %11107 = vmatprep.mubr.msk.f32.mxu1 %vm12777_vm9, %v14819_v49 }
 0x420   :  { %14881 = vst [vmem:[#allocation18_spill] sm:$0xff] %v13834_v14  ;;  %v4467_v24 = vadd.f32 %v14886_v45, %v13834_v14  ;;  %v4449_v50 = vadd.f32 %v11193_v43, %v3831_v23  ;;  %v4436_v20 = vpop.f32.mrb[13].mxu0  ;;  %12103 = vmatprep.subr.bf16.mxu1 %v14834_v30 }
 0x421   :  { %14884 = vst [vmem:[#allocation19_spill] sm:$0xff] %v13839_v29  ;;  %v4466_v60 = vadd.f32 %v14887_v21, %v13839_v29  ;;  %v4448_v62 = vadd.f32 %v4436_v20, %v3830_v33 }
 0x422   :  { %vm4471_vm12 = vcmp.gt.f32.partialorder %v4467_v24, 0.5  ;;  %v6287_v47 = vmul.f32 0.75, %v4467_v24  ;;  %v13853_v0 = vadd.f32 %v4449_v50, %v14888_v63 }
 0x423   :  { %v9870_v3 = vsel %vm4471_vm12, 1.0, %v14819_v49  ;;  %vm4470_vm15 = vcmp.gt.f32.partialorder %v4466_v60, 0.5  ;;  %v6286_v48 = vmul.f32 0.75, %v4466_v60  ;;  %v13857_v54 = vadd.f32 %v4448_v62, %v14890_v1  ;;  %12105 = vmatpush3.bf16.msk.msra.mxu1 %vm13793_vm10, %v14786_v18 }
 0x424   :  { %14889 = vst [vmem:[#allocation23_spill] sm:$0xff] %v13853_v0  ;;  %v4604_v23 = vsub.f32 %v9870_v3, %v9870_v3  ;;  %v9869_v43 = vsel %vm4470_vm15, 1.0, %v14819_v49  ;;  %vm13863_vm4 = vmpackc.low %vm4471_vm12, %vm4470_vm15  ;;  %v4469_v45 = vadd.f32 %v13625_v26, %v13853_v0  ;;  %vm6283_vm11 = vcmp.gt.f32.partialorder %v9870_v3, 0.0 }
 0x425   :  { %14891 = vst [vmem:[#allocation26_spill] sm:$0xff] %v13857_v54  ;;  %v4597_v24 = vsub.f32 %v9869_v43, %v9869_v43  ;;  %v4468_v50 = vadd.f32 %v13628_v35, %v13857_v54  ;;  %12155 = vmatprep.subr.msk.bf16.mxu1 %vm13863_vm4, %v14786_v18  ;;  %v13874_v4 = vsel %vm6283_vm11, 0.0, %v6287_v47  ;;  %vm6282_vm1 = vcmp.gt.f32.partialorder %v9869_v43, 0.0  ;;  %v14896_v35 = vld [vmem:[#allocation42_spill] sm:$0xff] }
 0x426   :  { %14894 = vst [vmem:[#allocation20_spill] sm:$0xff] %v13874_v4  ;;  %vm4473_vm5 = vcmp.gt.f32.partialorder %v4469_v45, 0.5  ;;  %11108 = vmatmul.mubr.f32.vlgmr.msra.gmra.mrb[22].mxu1 %v13467_v16  ;;  %v4605_v20 = vand.u32 4294901760, %v4604_v23  ;;  %v13877_v21 = vsel %vm6282_vm1, 0.0, %v6286_v48  ;;  %v6289_v60 = vmul.f32 0.75, %v4469_v45 }
 0x427   :  { %14895 = vst [vmem:[#allocation22_spill] sm:$0xff] %v13877_v21  ;;  %v9872_v26 = vsel %vm4473_vm5, 1.0, %v14819_v49  ;;  %vm4472_vm3 = vcmp.gt.f32.partialorder %v4468_v50, 0.5  ;;  %12157 = vmatpush3.bf16.msk.msra.mxu1 %vm13863_vm4, %v14786_v18  ;;  %11202 = vmatprep.mubr.f32.mxu1 %v14896_v35  ;;  %v4598_v62 = vand.u32 4294901760, %v4597_v24  ;;  %v12170_v1 = vpack.c.bf16 %v4604_v23, %v4597_v24 }
 0x428   :  { %v4618_v47 = vsub.f32 %v9872_v26, %v9872_v26  ;;  %v9871_v3 = vsel %vm4472_vm3, 1.0, %v14819_v49  ;;  %vm13885_vm6 = vmpackc.low %vm4473_vm5, %vm4472_vm3  ;;  %v4606_v48 = vsub.f32 %v4604_v23, %v4605_v20  ;;  %v6288_v21 = vmul.f32 0.75, %v4468_v50 }
 0x429   :  { %v4611_v63 = vsub.f32 %v9871_v3, %v9871_v3  ;;  %12159 = vmatprep.subr.msk.bf16.mxu1 %vm13885_vm6, %v14786_v18  ;;  %v4599_v45 = vsub.f32 %v4597_v24, %v4598_v62  ;;  %v12186_v4 = vpack.c.bf16 %v4605_v20, %v4598_v62  ;;  %vm6285_vm10 = vcmp.gt.f32.partialorder %v9872_v26, 0.0 }
 0x42a   :  { %v4607_v54 = vand.u32 4294901760, %v4606_v48  ;;  %v4619_v12 = vand.u32 4294901760, %v4618_v47  ;;  %v13895_v14 = vsel %vm6285_vm10, 0.0, %v6289_v60  ;;  %vm6284_vm14 = vcmp.gt.f32.partialorder %v9871_v3, 0.0  ;;  %v13949_v60 = vpop.permute.xlu0 %1480 }
 0x42b   :  { %12161 = vmatpush3.bf16.msk.msra.mxu1 %vm13885_vm6, %v14786_v18  ;;  %v4600_v0 = vand.u32 4294901760, %v4599_v45  ;;  %v4612_v59 = vand.u32 4294901760, %v4611_v63  ;;  %v12174_v29 = vpack.c.bf16 %v4618_v47, %v4611_v63  ;;  %v13897_v44 = vsel %vm6284_vm14, 0.0, %v6288_v21  ;;  %14899 = vst [vmem:[#allocation21_spill] sm:$0xff] %v13949_v60 }
 0x42c   :  { %v4620_v23 = vsub.f32 %v4618_v47, %v4619_v12  ;;  %v12514_v62 = vadd.f32 %v13751_v8, %v13949_v60 }
 0x42d   :  { %v12162_v50 = vpack.c.bf16 %v4607_v54, %v4600_v0  ;;  %v4613_v17 = vsub.f32 %v4611_v63, %v4612_v59  ;;  %v12190_v35 = vpack.c.bf16 %v4619_v12, %v4612_v59 }
 0x42e   :  { %11203 = vmatmul.mubr.f32.vlgmr.msra.gmra.mrb[24].mxu1 %v13277_v57  ;;  %v4621_v24 = vand.u32 4294901760, %v4620_v23  ;;  %vm1972_vm0 = vcmp.gt.f32.partialorder %v12514_v62, 0.5  ;;  %v3308_v45 = vmul.f32 0.5, %v12514_v62 }
 0x42f   :  { %12163 = vmatprep.subr.bf16.mxu1 %v12162_v50  ;;  %11205 = vmatprep.mubr.f32.mxu1 %v13330_v55  ;;  %v4614_v20 = vand.u32 4294901760, %v4613_v17  ;;  %v9803_v43 = vsel %vm1972_vm0, 1.0, %v14819_v49 }
 0x430   :  { %12165 = vmatpush3.bf16.msra.mxu1 %v12162_v50  ;;  %vm3796_vm12 = vcmp.gt.f32.partialorder %v9803_v43, 0.0 }
 0x431   :  { %v12166_v26 = vpack.c.bf16 %v4621_v24, %v4614_v20  ;;  %v3797_v24 = vmul.f32 0.75, %v12514_v62 }
 0x432   :  { %11206 = vmatmul.mubr.f32.gmra.mrb[26].mxu1 %v13334_v58 }
 0x433   :  { %12167 = vmatprep.subr.bf16.mxu1 %v12166_v26  ;;  %11216 = vmatprep.mubr.f32.mxu1 %v13217_v22 }
 0x434   :  { %12169 = vmatpush3.bf16.msra.mxu1 %v12166_v26 }
 0x435   :  { %12171 = vmatprep.subr.bf16.mxu1 %v12170_v1 }
 0x437   :  { %11217 = vmatmul.mubr.f32.vlgmr.msra.gmra.mrb[24].mxu1 %v13237_v39 }
 0x438   :  { %12173 = vmatpush3.bf16.msra.mxu1 %v12170_v1  ;;  %11219 = vmatprep.mubr.f32.mxu1 %v13246_v7 }
 0x439   :  { %12175 = vmatprep.subr.bf16.mxu1 %v12174_v29 }
 0x43b   :  { %11220 = vmatmul.mubr.f32.gmra.mrb[26].mxu1 %v13252_v32 }
 0x43c   :  { %12177 = vmatpush3.bf16.msra.mxu1 %v12174_v29  ;;  %11230 = vmatprep.mubr.f32.mxu1 %v13220_v9 }
 0x43d   :  { %12179 = vmatprep.subr.msk.bf16.mxu1 %vm13863_vm4, %v14786_v18 }
 0x43f   :  { %11231 = vmatmul.mubr.f32.vlgmr.msra.gmra.mrb[24].mxu1 %v13244_v13 }
 0x440   :  { %12181 = vmatpush3.bf16.msk.msra.mxu1 %vm13863_vm4, %v14786_v18  ;;  %11233 = vmatprep.mubr.f32.mxu1 %v13255_v11 }
 0x441   :  { %12183 = vmatprep.subr.msk.bf16.mxu1 %vm13885_vm6, %v14786_v18 }
 0x443   :  { %11234 = vmatmul.mubr.f32.gmra.mrb[26].mxu1 %v13264_v27 }
 0x444   :  { %12185 = vmatpush3.bf16.msk.msra.mxu1 %vm13885_vm6, %v14786_v18  ;;  %11244 = vmatprep.mubr.f32.mxu1 %v13223_v28 }
 0x445   :  { %12187 = vmatprep.subr.bf16.mxu1 %v12186_v4 }
 0x447   :  { %11245 = vmatmul.mubr.f32.vlgmr.msra.gmra.mrb[24].mxu1 %v13250_v42 }
 0x448   :  { %12189 = vmatpush3.bf16.msra.mxu1 %v12186_v4  ;;  %11247 = vmatprep.mubr.f32.mxu1 %v13268_v19 }
 0x449   :  { %12191 = vmatprep.subr.bf16.mxu1 %v12190_v35 }
 0x44b   :  { %11248 = vmatmul.mubr.f32.gmra.mrb[26].mxu1 %v13280_v38 }
 0x44c   :  { %12193 = vmatpush3.bf16.msra.mxu1 %v12190_v35  ;;  %11258 = vmatprep.mubr.f32.mxu1 %v13217_v22 }
 0x44d   :  { %12195 = vmatprep.subr.msk.bf16.mxu1 %vm13863_vm4, %v14786_v18 }
 0x44f   :  { %11259 = vmatmul.mubr.f32.vlgmr.msra.gmra.mrb[24].mxu1 %v13237_v39 }
 0x450   :  { %12197 = vmatpush3.bf16.msk.msra.mxu1 %vm13863_vm4, %v14786_v18  ;;  %11261 = vmatprep.mubr.f32.mxu1 %v13246_v7 }
 0x451   :  { %12199 = vmatprep.subr.msk.bf16.mxu1 %vm13885_vm6, %v14786_v18 }
 0x453   :  { %11262 = vmatmul.mubr.f32.gmra.mrb[26].mxu1 %v13252_v32 }
 0x454   :  { %12201 = vmatpush3.bf16.msk.msra.mxu1 %vm13885_vm6, %v14786_v18  ;;  %11272 = vmatprep.mubr.f32.mxu1 %v13217_v22 }
 0x455   :  { %12208 = vmatprep.subr.bf16.mxu1 %v14834_v30 }
 0x457   :  { %11273 = vmatmul.mubr.f32.vlgmr.msra.gmra.mrb[24].mxu1 %v13237_v39 }
 0x458   :  { %11275 = vmatprep.mubr.f32.mxu1 %v13246_v7 }
 0x45b   :  { %11276 = vmatmul.mubr.f32.gmra.mrb[26].mxu1 %v13252_v32 }
 0x45c   :  { %11297 = vmatprep.mubr.msk.f32.mxu1 %vm12777_vm9, %v14819_v49 }
 0x4cf   :  { %v3384_v17 = vpop.f32.mrb[12].mxu1 }
 0x4d0   :  { %v11054_v59 = vpop.f32.mrb[13].mxu1 }
 0x4d9   :  { %v3475_v12 = vpop.f32.mrb[14].mxu1 }
 0x4da   :  { %v3476_v29 = vadd.f32 %v3475_v12, %v3384_v17  ;;  %v11065_v63 = vpop.f32.mrb[15].mxu1  ;;  %v3798_v17 = vsel %vm3796_vm12, 0.0, %v3797_v24 }
 0x4e1   :  { %v3555_v0 = vpop.f32.mrb[16].mxu1 }
 0x4e2   :  { %v3556_v1 = vadd.f32 %v3555_v0, %v3476_v29  ;;  %v11076_v54 = vpop.f32.mrb[17].mxu1  ;;  %v4483_v29 = vmul.f32 0.5, %v13756_v6  ;;  %v4482_v0 = vmul.f32 0.5, %v13760_v2 }
 0x4e9   :  { %v3632_v33 = vpop.f32.mrb[18].mxu1 }
 0x4ea   :  { %v3633_v4 = vadd.f32 %v3632_v33, %v3556_v1  ;;  %v11087_v21 = vpop.f32.mrb[19].mxu1 }
 0x4eb   :  { %v4485_v21 = vmul.f32 0.5, %v13768_v5 }
 0x4f1   :  { %v3715_v35 = vpop.f32.mrb[20].mxu1 }
 0x4f2   :  { %v3716_v47 = vadd.f32 %v3715_v35, %v3633_v4  ;;  %v11098_v3 = vpop.f32.mrb[21].mxu1 }
 0x4f9   :  { %v3790_v48 = vpop.f32.mrb[22].mxu1 }
 0x4fa   :  { %v3791_v23 = vadd.f32 %v3790_v48, %v3716_v47  ;;  %v11109_v50 = vpop.f32.mrb[23].mxu1  ;;  %v4484_v47 = vmul.f32 0.5, %v13772_v52 }
 0x4fc   :  { %v3794_v20 = vadd.f32 %v3791_v23, %v3308_v45 }
 0x4fe   :  { %v13955_v26 = vadd.f32 %v3794_v20, %v13949_v60 }
 0x500   :  { %v13958_v59 = vadd.f32 %v3798_v17, %v13955_v26 }
 0x502   :  { %vm3800_vm15 = vcmp.gt.f32.partialorder %v13958_v59, 0.5 }
 0x503   :  { %v13962_v8 = vsel %vm3800_vm15, 1.0, %v14819_v49 }
 0x504   :  { %v13965_v12 = vadd.f32 %v13962_v8, %v9803_v43 }
 0x52a   :  { %v11274_v63 = vpop.f32.mrb[24].mxu1 }
 0x52b   :  { %v5101_v1 = vadd.f32 %v11274_v63, %v4483_v29  ;;  %v5078_v54 = vpop.f32.mrb[25].mxu1 }
 0x52c   :  { %v5100_v33 = vadd.f32 %v5078_v54, %v4482_v0 }
 0x52d   :  { %v13970_v4 = vadd.f32 %v5101_v1, %v14866_v53 }
 0x52e   :  { %v13974_v35 = vadd.f32 %v5100_v33, %v14868_v34  ;;  %v11277_v62 = vpop.f32.mrb[26].mxu1 }
 0x52f   :  { %v5121_v6 = vadd.f32 %v13786_v37, %v13970_v4  ;;  %v5103_v3 = vadd.f32 %v11277_v62, %v4485_v21  ;;  %v5090_v43 = vpop.f32.mrb[27].mxu1 }
 0x530   :  { %v5120_v2 = vadd.f32 %v13789_v56, %v13974_v35  ;;  %v5102_v48 = vadd.f32 %v5090_v43, %v4484_v47  ;;  %v14907_v56 = vld [vmem:[#allocation34_spill] sm:$0xff]  ;;  %v14911_v47 = vld [vmem:[#allocation28_spill] sm:$0xff] }
 0x531   :  { %vm5125_vm4 = vcmp.gt.f32.partialorder %v5121_v6, 0.5  ;;  %v6941_v45 = vmul.f32 0.75, %v5121_v6  ;;  %v13982_v23 = vadd.f32 %v5103_v3, %v14872_v41 }
 0x532   :  { %v9886_v5 = vsel %vm5125_vm4, 1.0, %v14819_v49  ;;  %vm5124_vm11 = vcmp.gt.f32.partialorder %v5120_v2, 0.5  ;;  %v6940_v50 = vmul.f32 0.75, %v5120_v2  ;;  %v13986_v52 = vadd.f32 %v5102_v48, %v14873_v10 }
 0x533   :  { %v5225_v24 = vsub.f32 %v9886_v5, %v9886_v5  ;;  %v9885_v37 = vsel %vm5124_vm11, 1.0, %v14819_v49  ;;  %v5123_v20 = vadd.f32 %v13801_v61, %v13982_v23  ;;  %vm13991_vm1 = vmpackc.low %vm5125_vm4, %vm5124_vm11  ;;  %vm6937_vm5 = vcmp.gt.f32.partialorder %v9886_v5, 0.0 }
 0x534   :  { %v5218_v17 = vsub.f32 %v9885_v37, %v9885_v37  ;;  %v5122_v29 = vadd.f32 %v13806_v51, %v13986_v52  ;;  %12204 = vmatpush3.bf16.msk.msra.mxu0 %vm13991_vm1, %v14786_v18  ;;  %v14000_v63 = vsel %vm6937_vm5, 0.0, %v6941_v45  ;;  %vm6936_vm3 = vcmp.gt.f32.partialorder %v9885_v37, 0.0 }
 0x535   :  { %vm5127_vm6 = vcmp.gt.f32.partialorder %v5123_v20, 0.5  ;;  %v6943_v0 = vmul.f32 0.75, %v5123_v20  ;;  %12205 = vmatprep.subr.bf16.mxu0 %v14834_v30  ;;  %v5226_v61 = vand.u32 4294901760, %v5225_v24  ;;  %v14003_v1 = vsel %vm6936_vm3, 0.0, %v6940_v50 }
 0x536   :  { %v9888_v54 = vsel %vm5127_vm6, 1.0, %v14819_v49  ;;  %vm5126_vm10 = vcmp.gt.f32.partialorder %v5122_v29, 0.5  ;;  %v6942_v33 = vmul.f32 0.75, %v5122_v29  ;;  %v12215_v21 = vpack.c.bf16 %v5225_v24, %v5218_v17 }
 0x537   :  { %v5239_v51 = vsub.f32 %v9888_v54, %v9888_v54  ;;  %v9887_v62 = vsel %vm5126_vm10, 1.0, %v14819_v49  ;;  %vm14007_vm14 = vmpackc.low %vm5127_vm6, %vm5126_vm10  ;;  %v5219_v6 = vand.u32 4294901760, %v5218_v17  ;;  %v5227_v3 = vsub.f32 %v5225_v24, %v5226_v61 }
 0x538   :  { %v5232_v43 = vsub.f32 %v9887_v62, %v9887_v62  ;;  %12207 = vmatpush3.bf16.msk.msra.mxu0 %vm14007_vm14, %v14786_v18  ;;  %vm6939_vm0 = vcmp.gt.f32.partialorder %v9888_v54, 0.0  ;;  %vm6938_vm12 = vcmp.gt.f32.partialorder %v9887_v62, 0.0  ;;  %v14909_v62 = vld [vmem:[#allocation42_spill] sm:$0xff] }
 0x539   :  { %12214 = vmatprep.subr.bf16.mxu0 %v14834_v30  ;;  %v5220_v2 = vsub.f32 %v5218_v17, %v5219_v6  ;;  %v5228_v48 = vand.u32 4294901760, %v5227_v3  ;;  %v5240_v45 = vand.u32 4294901760, %v5239_v51  ;;  %v12227_v5 = vpack.c.bf16 %v5226_v61, %v5219_v6  ;;  %v14910_v3 = vld [vmem:[#allocation5_spill] sm:$0xff] }
 0x53a   :  { %v12218_v50 = vpack.c.bf16 %v5239_v51, %v5232_v43  ;;  %v5233_v37 = vand.u32 4294901760, %v5232_v43  ;;  %v14015_v20 = vsel %vm6939_vm0, 0.0, %v6943_v0  ;;  %v14018_v10 = vsel %vm6938_vm12, 0.0, %v6942_v33 }
 0x53b   :  { %11287 = vmatmul.mubr.f32.vlgmr.msra.gmra.mrb[14].mxu0 %v13514_v31  ;;  %v5221_v24 = vand.u32 4294901760, %v5220_v2  ;;  %v5241_v29 = vsub.f32 %v5239_v51, %v5240_v45  ;;  %v14908_v51 = vld [vmem:[#allocation17_spill] sm:$0xff] }
 0x53c   :  { %12216 = vmatpush3.bf16.msra.mxu0 %v12215_v21  ;;  %v5234_v41 = vsub.f32 %v5232_v43, %v5233_v37  ;;  %11308 = vmatprep.mubr.msk.f32.mxu0 %vm12777_vm9, %v14819_v49  ;;  %v12230_v17 = vpack.c.bf16 %v5240_v45, %v5233_v37  ;;  %v14906_v21 = vld [vmem:[#allocation32_spill] sm:$0xff]  ;;  %v14913_v2 = vld [vmem:[#allocation9_spill] sm:$0xff]  ;;  %v14915_v45 = vld [vmem:[#allocation10_spill] sm:$0xff] }
 0x53d   :  { %v12209_v54 = vpack.c.bf16 %v5228_v48, %v5221_v24  ;;  %12217 = vmatprep.subr.bf16.mxu0 %v14834_v30  ;;  %v5242_v61 = vand.u32 4294901760, %v5241_v29  ;;  %v14912_v43 = vld [vmem:[#allocation8_spill] sm:$0xff]  ;;  %v14914_v48 = vld [vmem:[#allocation30_spill] sm:$0xff]  ;;  %v14919_v24 = vld [vmem:[#allocation13_spill] sm:$0xff] }
 0x53e   :  { %v5235_v6 = vand.u32 4294901760, %v5234_v41  ;;  %v14918_v37 = vld [vmem:[#allocation12_spill] sm:$0xff]  ;;  %v14920_v29 = vld [vmem:[#allocation7_spill] sm:$0xff] }
 0x53f   :  { %12210 = vmatpush3.bf16.msra.mxu1 %v12209_v54  ;;  %v14922_v54 = vld [vmem:[#allocation14_spill] sm:$0xff] }
 0x540   :  { %12219 = vmatpush3.bf16.msra.mxu0 %v12218_v50  ;;  %12211 = vmatprep.subr.bf16.mxu1 %v14834_v30  ;;  %v12212_v0 = vpack.c.bf16 %v5242_v61, %v5235_v6  ;;  %v14917_v50 = vld [vmem:[#allocation11_spill] sm:$0xff] }
 0x541   :  { %12226 = vmatprep.subr.bf16.mxu0 %v14834_v30  ;;  %v14923_v61 = vld [vmem:[#allocation15_spill] sm:$0xff] }
 0x542   :  { %v14924_v6 = vld [vmem:[#allocation31_spill] sm:$0xff] }
 0x543   :  { %12213 = vmatpush3.bf16.msra.mxu1 %v12212_v0  ;;  %11309 = vmatmul.mubr.f32.vlgmr.msra.gmra.mrb[16].mxu0 %v13470_v46  ;;  %v14925_v0 = vld [vmem:[#allocation16_spill] sm:$0xff] }
 0x544   :  { %12228 = vmatpush3.bf16.msra.mxu0 %v12227_v5  ;;  %12220 = vmatprep.subr.bf16.mxu1 %v14834_v30  ;;  %v14916_v5 = vld [vmem:[#allocation6_spill] sm:$0xff] }
 0x545   :  { %12229 = vmatprep.subr.bf16.mxu0 %v14834_v30  ;;  %11330 = vmatprep.mubr.msk.f32.mxu0 %vm12777_vm9, %v14819_v49 }
 0x546   :  { %11298 = vmatmul.mubr.f32.vlgmr.msra.gmra.mrb[28].mxu1 %v13467_v16 }
 0x547   :  { %12222 = vmatpush3.bf16.msk.msra.mxu1 %vm13991_vm1, %v14786_v18  ;;  %11319 = vmatprep.mubr.msk.f32.mxu1 %vm12777_vm9, %v14819_v49 }
 0x548   :  { %12231 = vmatpush3.bf16.msra.mxu0 %v12230_v17  ;;  %12223 = vmatprep.subr.bf16.mxu1 %v14834_v30  ;;  %v14921_v17 = vld [vmem:[#allocation29_spill] sm:$0xff] }
 0x549   :  { %12239 = vmatprep.subr.msk.bf16.mxu0 %vm13126_vm8, %v14786_v18 }
 0x54b   :  { %12225 = vmatpush3.bf16.msk.msra.mxu1 %vm14007_vm14, %v14786_v18  ;;  %11331 = vmatmul.mubr.f32.vlgmr.msra.gmra.mrb[18].mxu0 %v13467_v16 }
 0x54c   :  { %12241 = vmatpush3.bf16.msk.msra.mxu0 %vm13126_vm8, %v14786_v18  ;;  %12232 = vmatprep.subr.bf16.mxu1 %v14834_v30 }
 0x54d   :  { %12243 = vmatprep.subr.msk.bf16.mxu0 %vm13148_vm13, %v14786_v18  ;;  %11352 = vmatprep.mubr.f32.mxu0 %v12908_v25 }
 0x54e   :  { %11320 = vmatmul.mubr.f32.vlgmr.msra.gmra.mrb[30].mxu1 %v13477_v15 }
 0x54f   :  { %12234 = vmatpush3.bf16.msk.msra.mxu1 %vm13991_vm1, %v14786_v18  ;;  %11341 = vmatprep.mubr.msk.f32.mxu1 %vm12777_vm9, %v14819_v49 }
 0x550   :  { %12245 = vmatpush3.bf16.msk.msra.mxu0 %vm13148_vm13, %v14786_v18  ;;  %12235 = vmatprep.subr.bf16.mxu1 %v14834_v30 }
 0x551   :  { %12247 = vmatprep.subr.bf16.mxu0 %v14906_v21 }
 0x553   :  { %12237 = vmatpush3.bf16.msk.msra.mxu1 %vm14007_vm14, %v14786_v18  ;;  %11353 = vmatmul.mubr.f32.vlgmr.msra.gmra.mrb[20].mxu0 %v13011_v36 }
 0x554   :  { %12249 = vmatpush3.bf16.msra.mxu0 %v14906_v21  ;;  %11355 = vmatprep.mubr.f32.mxu0 %v13021_v40 }
 0x555   :  { %12251 = vmatprep.subr.bf16.mxu0 %v14907_v56 }
 0x556   :  { %11342 = vmatmul.mubr.f32.vlgmr.msra.gmra.mrb[32].mxu1 %v13467_v16 }
 0x557   :  { %11356 = vmatmul.mubr.f32.gmra.mrb[22].mxu0 %v14908_v51  ;;  %11436 = vmatprep.mubr.f32.mxu1 %v14909_v62 }
 0x558   :  { %12253 = vmatpush3.bf16.msra.mxu0 %v14907_v56  ;;  %11366 = vmatprep.mubr.f32.mxu0 %v14910_v3 }
 0x559   :  { %12255 = vmatprep.subr.bf16.mxu0 %v14911_v47 }
 0x55b   :  { %11367 = vmatmul.mubr.f32.vlgmr.msra.gmra.mrb[20].mxu0 %v14912_v43 }
 0x55c   :  { %12257 = vmatpush3.bf16.msra.mxu0 %v14911_v47  ;;  %11369 = vmatprep.mubr.f32.mxu0 %v14913_v2 }
 0x55d   :  { %12259 = vmatprep.subr.bf16.mxu0 %v14914_v48 }
 0x55f   :  { %11370 = vmatmul.mubr.f32.gmra.mrb[22].mxu0 %v14915_v45 }
 0x560   :  { %12261 = vmatpush3.bf16.msra.mxu0 %v14914_v48  ;;  %11380 = vmatprep.mubr.f32.mxu0 %v14916_v5  ;;  %v5136_v5 = vmul.f32 0.5, %v13955_v26 }
 0x561   :  { %12263 = vmatprep.subr.msk.bf16.mxu0 %vm13126_vm8, %v14786_v18 }
 0x563   :  { %11381 = vmatmul.mubr.f32.vlgmr.msra.gmra.mrb[20].mxu0 %v14917_v50 }
 0x564   :  { %12265 = vmatpush3.bf16.msk.msra.mxu0 %vm13126_vm8, %v14786_v18  ;;  %11383 = vmatprep.mubr.f32.mxu0 %v14918_v37 }
 0x565   :  { %12267 = vmatprep.subr.msk.bf16.mxu0 %vm13148_vm13, %v14786_v18 }
 0x567   :  { %11384 = vmatmul.mubr.f32.gmra.mrb[22].mxu0 %v14919_v24 }
 0x568   :  { %12269 = vmatpush3.bf16.msk.msra.mxu0 %vm13148_vm13, %v14786_v18  ;;  %11394 = vmatprep.mubr.f32.mxu0 %v14920_v29 }
 0x569   :  { %12271 = vmatprep.subr.bf16.mxu0 %v14921_v17 }
 0x56b   :  { %11395 = vmatmul.mubr.f32.vlgmr.msra.gmra.mrb[20].mxu0 %v14922_v54 }
 0x56c   :  { %12273 = vmatpush3.bf16.msra.mxu0 %v14921_v17  ;;  %11397 = vmatprep.mubr.f32.mxu0 %v14923_v61 }
 0x56d   :  { %12275 = vmatprep.subr.bf16.mxu0 %v14924_v6 }
 0x56f   :  { %11398 = vmatmul.mubr.f32.gmra.mrb[22].mxu0 %v14925_v0 }
 0x570   :  { %12277 = vmatpush3.bf16.msra.mxu0 %v14924_v6  ;;  %11408 = vmatprep.mubr.f32.mxu0 %v14910_v3 }
 0x571   :  { %12279 = vmatprep.subr.msk.bf16.mxu0 %vm13126_vm8, %v14786_v18 }
 0x573   :  { %11409 = vmatmul.mubr.f32.vlgmr.msra.gmra.mrb[20].mxu0 %v14912_v43 }
 0x574   :  { %12281 = vmatpush3.bf16.msk.msra.mxu0 %vm13126_vm8, %v14786_v18  ;;  %11411 = vmatprep.mubr.f32.mxu0 %v14913_v2  ;;  %vm5624_vm8 = vcmp.gt.f32.partialorder %v13962_v8, 0.0  ;;  %v14929_v8 = vld [vmem:[#allocation19_spill] sm:$0xff] }
 0x575   :  { %12283 = vmatprep.subr.msk.bf16.mxu0 %vm13148_vm13, %v14786_v18 }
 0x577   :  { %11412 = vmatmul.mubr.f32.gmra.mrb[22].mxu0 %v14915_v45 }
 0x578   :  { %12285 = vmatpush3.bf16.msk.msra.mxu0 %vm13148_vm13, %v14786_v18  ;;  %11422 = vmatprep.mubr.f32.mxu0 %v14910_v3 }
 0x579   :  { %12334 = vmatprep.subr.bf16.mxu0 %v14834_v30 }
 0x57b   :  { %11423 = vmatmul.mubr.f32.vlgmr.msra.gmra.mrb[20].mxu0 %v14912_v43  ;;  %v5625_v43 = vmul.f32 0.75, %v13958_v59  ;;  %v14928_v59 = vld [vmem:[#allocation18_spill] sm:$0xff] }
 0x57c   :  { %11425 = vmatprep.mubr.f32.mxu0 %v14913_v2 }
 0x57f   :  { %11426 = vmatmul.mubr.f32.gmra.mrb[22].mxu0 %v14915_v45 }
 0x580   :  { %11520 = vmatprep.mubr.msk.f32.mxu0 %vm12777_vm9, %v14819_v49 }
 0x60e   :  { %v5212_v41 = vpop.f32.mrb[14].mxu0 }
 0x60f   :  { %v11288_v21 = vpop.f32.mrb[15].mxu0 }
 0x616   :  { %v5383_v56 = vpop.f32.mrb[16].mxu0 }
 0x617   :  { %v11310_v47 = vpop.f32.mrb[17].mxu0 }
 0x619   :  { %v5303_v48 = vpop.f32.mrb[28].mxu1 }
 0x61a   :  { %v5304_v33 = vadd.f32 %v5303_v48, %v5212_v41  ;;  %v11299_v17 = vpop.f32.mrb[29].mxu1  ;;  %v14933_v48 = vld [vmem:[#allocation44_spill] sm:$0xff] }
 0x61c   :  { %v5384_v6 = vadd.f32 %v5383_v56, %v5304_v33  ;;  %v5626_v56 = vsel %vm5624_vm8, 0.0, %v5625_v43 }
 0x61e   :  { %v5543_v0 = vpop.f32.mrb[18].mxu0 }
 0x61f   :  { %v11332_v61 = vpop.f32.mrb[19].mxu0 }
 0x621   :  { %v5460_v54 = vpop.f32.mrb[30].mxu1 }
 0x622   :  { %v5461_v29 = vadd.f32 %v5460_v54, %v5384_v6  ;;  %v11321_v24 = vpop.f32.mrb[31].mxu1  ;;  %v14935_v6 = vld [vmem:[#allocation26_spill] sm:$0xff] }
 0x624   :  { %v5544_v37 = vadd.f32 %v5543_v0, %v5461_v29  ;;  %v14930_v29 = vld [vmem:[#allocation43_spill] sm:$0xff] }
 0x625   :  { %v14932_v0 = vld [vmem:[#allocation23_spill] sm:$0xff] }
 0x626   :  { %v5659_v47 = vmul.f32 0.5, %v14932_v0 }
 0x629   :  { %v5618_v50 = vpop.f32.mrb[32].mxu1 }
 0x62a   :  { %v5619_v45 = vadd.f32 %v5618_v50, %v5544_v37  ;;  %v11343_v2 = vpop.f32.mrb[33].mxu1 }
 0x62b   :  { %v5657_v2 = vmul.f32 0.5, %v14928_v59 }
 0x62c   :  { %v5622_v21 = vadd.f32 %v5619_v45, %v5136_v5  ;;  %v5656_v5 = vmul.f32 0.5, %v14929_v8 }
 0x62e   :  { %v14133_v41 = vadd.f32 %v5622_v21, %v13949_v60  ;;  %v14936_v21 = vld [vmem:[#allocation20_spill] sm:$0xff] }
 0x630   :  { %v14136_v61 = vadd.f32 %v5626_v56, %v14133_v41 }
 0x632   :  { %vm5628_vm13 = vcmp.gt.f32.partialorder %v14136_v61, 0.5 }
 0x633   :  { %v14140_v24 = vsel %vm5628_vm13, 1.0, %v14819_v49 }
 0x634   :  { %14926 = vst [vmem:[#allocation24_spill] sm:$0xff] %v14140_v24  ;;  %v14144_v26 = vadd.f32 %v14140_v24, %v13965_v12  ;;  %v5658_v12 = vmul.f32 0.5, %v14935_v6 }
 0x636   :  { %14927 = vst [vmem:[#allocation55_spill] sm:$0xff] %v14144_v26 }
 0x64e   :  { %v11424_v45 = vpop.f32.mrb[20].mxu0 }
 0x64f   :  { %v6275_v50 = vadd.f32 %v11424_v45, %v5657_v2  ;;  %v6252_v37 = vpop.f32.mrb[21].mxu0  ;;  %v14937_v2 = vld [vmem:[#allocation22_spill] sm:$0xff] }
 0x650   :  { %v6274_v43 = vadd.f32 %v6252_v37, %v5656_v5 }
 0x651   :  { %v14149_v54 = vadd.f32 %v6275_v50, %v14930_v29  ;;  %v14938_v50 = vld [vmem:[#allocation46_spill] sm:$0xff] }
 0x652   :  { %v14153_v33 = vadd.f32 %v6274_v43, %v14933_v48  ;;  %v11427_v17 = vpop.f32.mrb[22].mxu0  ;;  %v14940_v48 = vld [vmem:[#allocation48_spill] sm:$0xff] }
 0x653   :  { %14931 = vst [vmem:[#allocation56_spill] sm:$0xff] %v14149_v54  ;;  %v6295_v56 = vadd.f32 %v14936_v21, %v14149_v54  ;;  %v6277_v59 = vadd.f32 %v11427_v17, %v5659_v47  ;;  %v6264_v26 = vpop.f32.mrb[23].mxu0  ;;  %v6313_v17 = vmul.f32 0.5, %v13982_v23 }
 0x654   :  { %14934 = vst [vmem:[#allocation53_spill] sm:$0xff] %v14153_v33  ;;  %v6294_v45 = vadd.f32 %v14937_v2, %v14153_v33  ;;  %v6276_v8 = vadd.f32 %v6264_v26, %v5658_v12 }
 0x655   :  { %vm6299_vm15 = vcmp.gt.f32.partialorder %v6295_v56, 0.5  ;;  %v8107_v5 = vmul.f32 0.75, %v6295_v56  ;;  %v14161_v37 = vadd.f32 %v6277_v59, %v14938_v50 }
 0x656   :  { %v9919_v43 = vsel %vm6299_vm15, 1.0, %v14819_v49  ;;  %vm6298_vm4 = vcmp.gt.f32.partialorder %v6294_v45, 0.5  ;;  %v8106_v0 = vmul.f32 0.75, %v6294_v45  ;;  %v14165_v6 = vadd.f32 %v6276_v8, %v14940_v48 }
 0x657   :  { %14939 = vst [vmem:[#allocation59_spill] sm:$0xff] %v14161_v37  ;;  %v6432_v29 = vsub.f32 %v9919_v43, %v9919_v43  ;;  %v9918_v47 = vsel %vm6298_vm4, 1.0, %v14819_v49  ;;  %vm14168_vm11 = vmpackc.low %vm6299_vm15, %vm6298_vm4  ;;  %v6297_v26 = vadd.f32 %v13895_v14, %v14161_v37  ;;  %vm8103_vm1 = vcmp.gt.f32.partialorder %v9919_v43, 0.0 }
 0x658   :  { %14941 = vst [vmem:[#allocation54_spill] sm:$0xff] %v14165_v6  ;;  %v6425_v12 = vsub.f32 %v9918_v47, %v9918_v47  ;;  %v6296_v21 = vadd.f32 %v13897_v44, %v14165_v6  ;;  %12287 = vmatprep.subr.msk.bf16.mxu1 %vm14168_vm11, %v14786_v18  ;;  %v14179_v56 = vsel %vm8103_vm1, 0.0, %v8107_v5  ;;  %vm8102_vm5 = vcmp.gt.f32.partialorder %v9918_v47, 0.0 }
 0x659   :  { %14944 = vst [vmem:[#allocation60_spill] sm:$0xff] %v14179_v56  ;;  %vm6301_vm3 = vcmp.gt.f32.partialorder %v6297_v26, 0.5  ;;  %12289 = vmatpush3.bf16.msk.msra.mxu1 %vm14168_vm11, %v14786_v18  ;;  %v6433_v59 = vand.u32 4294901760, %v6432_v29  ;;  %v14184_v2 = vsel %vm8102_vm5, 0.0, %v8106_v0  ;;  %v8109_v45 = vmul.f32 0.75, %v6297_v26 }
 0x65a   :  { %14945 = vst [vmem:[#allocation61_spill] sm:$0xff] %v14184_v2  ;;  %v9921_v14 = vsel %vm6301_vm3, 1.0, %v14819_v49  ;;  %vm6300_vm6 = vcmp.gt.f32.partialorder %v6296_v21, 0.5  ;;  %v6426_v44 = vand.u32 4294901760, %v6425_v12  ;;  %v12302_v48 = vpack.c.bf16 %v6432_v29, %v6425_v12 }
 0x65b   :  { %v6446_v8 = vsub.f32 %v9921_v14, %v9921_v14  ;;  %v9920_v43 = vsel %vm6300_vm6, 1.0, %v14819_v49  ;;  %vm14188_vm10 = vmpackc.low %vm6301_vm3, %vm6300_vm6  ;;  %v6434_v47 = vsub.f32 %v6432_v29, %v6433_v59  ;;  %v8108_v56 = vmul.f32 0.75, %v6296_v21 }
 0x65c   :  { %v6439_v50 = vsub.f32 %v9920_v43, %v9920_v43  ;;  %12291 = vmatprep.subr.msk.bf16.mxu1 %vm14188_vm10, %v14786_v18  ;;  %v6427_v0 = vsub.f32 %v6425_v12, %v6426_v44  ;;  %v12318_v2 = vpack.c.bf16 %v6433_v59, %v6426_v44  ;;  %vm8105_vm14 = vcmp.gt.f32.partialorder %v9921_v14, 0.0 }
 0x65d   :  { %12293 = vmatpush3.bf16.msk.msra.mxu1 %vm14188_vm10, %v14786_v18  ;;  %v6435_v26 = vand.u32 4294901760, %v6434_v47  ;;  %v6447_v6 = vand.u32 4294901760, %v6446_v8  ;;  %v14198_v60 = vsel %vm8105_vm14, 0.0, %v8109_v45  ;;  %vm8104_vm0 = vcmp.gt.f32.partialorder %v9920_v43, 0.0 }
 0x65e   :  { %v6428_v37 = vand.u32 4294901760, %v6427_v0  ;;  %v6440_v33 = vand.u32 4294901760, %v6439_v50  ;;  %v12306_v54 = vpack.c.bf16 %v6446_v8, %v6439_v50  ;;  %v14201_v59 = vsel %vm8104_vm0, 0.0, %v8108_v56 }
 0x65f   :  { %v6448_v29 = vsub.f32 %v6446_v8, %v6447_v6  ;;  %v6312_v45 = vmul.f32 0.5, %v13986_v52 }
 0x660   :  { %11437 = vmatmul.mubr.f32.vlgmr.msra.gmra.mrb[34].mxu1 %v13277_v57  ;;  %v12294_v21 = vpack.c.bf16 %v6435_v26, %v6428_v37  ;;  %v6441_v24 = vsub.f32 %v6439_v50, %v6440_v33  ;;  %v12322_v12 = vpack.c.bf16 %v6447_v6, %v6440_v33  ;;  %v14948_v26 = vld [vmem:[#allocation57_spill] sm:$0xff] }
 0x661   :  { %11439 = vmatprep.mubr.f32.mxu1 %v13330_v55  ;;  %v6449_v44 = vand.u32 4294901760, %v6448_v29 }
 0x662   :  { %12295 = vmatprep.subr.bf16.mxu1 %v12294_v21  ;;  %v6442_v47 = vand.u32 4294901760, %v6441_v24  ;;  %v6311_v24 = vmul.f32 0.5, %v13970_v4 }
 0x663   :  { %12297 = vmatpush3.bf16.msra.mxu1 %v12294_v21 }
 0x664   :  { %11440 = vmatmul.mubr.f32.gmra.mrb[36].mxu1 %v13334_v58  ;;  %v12298_v14 = vpack.c.bf16 %v6449_v44, %v6442_v47 }
 0x665   :  { %11450 = vmatprep.mubr.f32.mxu1 %v13217_v22 }
 0x666   :  { %12299 = vmatprep.subr.bf16.mxu1 %v12298_v14 }
 0x667   :  { %12301 = vmatpush3.bf16.msra.mxu1 %v12298_v14 }
 0x668   :  { %12303 = vmatprep.subr.bf16.mxu1 %v12302_v48 }
 0x66a   :  { %11451 = vmatmul.mubr.f32.vlgmr.msra.gmra.mrb[34].mxu1 %v13237_v39 }
 0x66b   :  { %12305 = vmatpush3.bf16.msra.mxu1 %v12302_v48  ;;  %11453 = vmatprep.mubr.f32.mxu1 %v13246_v7  ;;  %v6310_v48 = vmul.f32 0.5, %v13974_v35 }
 0x66c   :  { %12307 = vmatprep.subr.bf16.mxu1 %v12306_v54 }
 0x66e   :  { %11454 = vmatmul.mubr.f32.gmra.mrb[36].mxu1 %v13252_v32 }
 0x66f   :  { %12309 = vmatpush3.bf16.msra.mxu1 %v12306_v54  ;;  %11464 = vmatprep.mubr.f32.mxu1 %v13220_v9 }
 0x670   :  { %12311 = vmatprep.subr.msk.bf16.mxu1 %vm14168_vm11, %v14786_v18 }
 0x672   :  { %11465 = vmatmul.mubr.f32.vlgmr.msra.gmra.mrb[34].mxu1 %v13244_v13 }
 0x673   :  { %12313 = vmatpush3.bf16.msk.msra.mxu1 %vm14168_vm11, %v14786_v18  ;;  %11467 = vmatprep.mubr.f32.mxu1 %v13255_v11 }
 0x674   :  { %12315 = vmatprep.subr.msk.bf16.mxu1 %vm14188_vm10, %v14786_v18 }
 0x676   :  { %11468 = vmatmul.mubr.f32.gmra.mrb[36].mxu1 %v13264_v27 }
 0x677   :  { %12317 = vmatpush3.bf16.msk.msra.mxu1 %vm14188_vm10, %v14786_v18  ;;  %11478 = vmatprep.mubr.f32.mxu1 %v13223_v28 }
 0x678   :  { %12319 = vmatprep.subr.bf16.mxu1 %v12318_v2 }
 0x67a   :  { %11479 = vmatmul.mubr.f32.vlgmr.msra.gmra.mrb[34].mxu1 %v13250_v42 }
 0x67b   :  { %12321 = vmatpush3.bf16.msra.mxu1 %v12318_v2  ;;  %11481 = vmatprep.mubr.f32.mxu1 %v13268_v19 }
 0x67c   :  { %12323 = vmatprep.subr.bf16.mxu1 %v12322_v12 }
 0x67e   :  { %11482 = vmatmul.mubr.f32.gmra.mrb[36].mxu1 %v13280_v38 }
 0x67f   :  { %12325 = vmatpush3.bf16.msra.mxu1 %v12322_v12  ;;  %11492 = vmatprep.mubr.f32.mxu1 %v13217_v22  ;;  %v14949_v12 = vld [vmem:[#allocation58_spill] sm:$0xff] }
 0x680   :  { %12327 = vmatprep.subr.msk.bf16.mxu1 %vm14168_vm11, %v14786_v18 }
 0x682   :  { %11493 = vmatmul.mubr.f32.vlgmr.msra.gmra.mrb[34].mxu1 %v13237_v39 }
 0x683   :  { %12329 = vmatpush3.bf16.msk.msra.mxu1 %vm14168_vm11, %v14786_v18  ;;  %11495 = vmatprep.mubr.f32.mxu1 %v13246_v7 }
 0x684   :  { %12331 = vmatprep.subr.msk.bf16.mxu1 %vm14188_vm10, %v14786_v18 }
 0x686   :  { %11496 = vmatmul.mubr.f32.gmra.mrb[36].mxu1 %v13252_v32 }
 0x687   :  { %12333 = vmatpush3.bf16.msk.msra.mxu1 %vm14188_vm10, %v14786_v18  ;;  %11506 = vmatprep.mubr.f32.mxu1 %v13217_v22 }
 0x688   :  { %12340 = vmatprep.subr.bf16.mxu1 %v14834_v30 }
 0x68a   :  { %11507 = vmatmul.mubr.f32.vlgmr.msra.gmra.mrb[34].mxu1 %v13237_v39 }
 0x68b   :  { %11509 = vmatprep.mubr.f32.mxu1 %v13246_v7 }
 0x68e   :  { %11510 = vmatmul.mubr.f32.gmra.mrb[36].mxu1 %v13252_v32 }
 0x68f   :  { %11531 = vmatprep.mubr.msk.f32.mxu1 %vm12777_vm9, %v14819_v49 }
 0x75d   :  { %v11508_v54 = vpop.f32.mrb[34].mxu1 }
 0x75e   :  { %v6929_v33 = vadd.f32 %v11508_v54, %v6311_v24  ;;  %v6906_v50 = vpop.f32.mrb[35].mxu1 }
 0x75f   :  { %v6928_v37 = vadd.f32 %v6906_v50, %v6310_v48 }
 0x760   :  { %v14255_v6 = vadd.f32 %v6929_v33, %v14866_v53 }
 0x761   :  { %v14259_v56 = vadd.f32 %v6928_v37, %v14868_v34  ;;  %v11511_v2 = vpop.f32.mrb[36].mxu1 }
 0x762   :  { %v6949_v4 = vadd.f32 %v14000_v63, %v14255_v6  ;;  %v6931_v8 = vadd.f32 %v11511_v2, %v6313_v17  ;;  %v6918_v43 = vpop.f32.mrb[37].mxu1 }
 0x763   :  { %v6948_v35 = vadd.f32 %v14003_v1, %v14259_v56  ;;  %v6930_v5 = vadd.f32 %v6918_v43, %v6312_v45  ;;  %v14958_v1 = vld [vmem:[#allocation35_spill] sm:$0xff]  ;;  %v14965_v45 = vld [vmem:[#allocation12_spill] sm:$0xff] }
 0x764   :  { %vm6953_vm12 = vcmp.gt.f32.partialorder %v6949_v4, 0.5  ;;  %v8761_v0 = vmul.f32 0.75, %v6949_v4  ;;  %v14267_v29 = vadd.f32 %v6931_v8, %v14948_v26 }
 0x765   :  { %v9935_v23 = vsel %vm6953_vm12, 1.0, %v14819_v49  ;;  %vm6952_vm8 = vcmp.gt.f32.partialorder %v6948_v35, 0.5  ;;  %v8760_v21 = vmul.f32 0.75, %v6948_v35  ;;  %v14271_v52 = vadd.f32 %v6930_v5, %v14949_v12 }
 0x766   :  { %v7053_v44 = vsub.f32 %v9935_v23, %v9935_v23  ;;  %v9934_v63 = vsel %vm6952_vm8, 1.0, %v14819_v49  ;;  %v6951_v47 = vadd.f32 %v14015_v20, %v14267_v29  ;;  %vm14276_vm13 = vmpackc.low %vm6953_vm12, %vm6952_vm8  ;;  %vm8757_vm15 = vcmp.gt.f32.partialorder %v9935_v23, 0.0 }
 0x767   :  { %v7046_v14 = vsub.f32 %v9934_v63, %v9934_v63  ;;  %v6950_v24 = vadd.f32 %v14018_v10, %v14271_v52  ;;  %12336 = vmatpush3.bf16.msk.msra.mxu0 %vm14276_vm13, %v14786_v18  ;;  %v14285_v54 = vsel %vm8757_vm15, 0.0, %v8761_v0  ;;  %vm8756_vm4 = vcmp.gt.f32.partialorder %v9934_v63, 0.0 }
 0x768   :  { %vm6955_vm11 = vcmp.gt.f32.partialorder %v6951_v47, 0.5  ;;  %v8763_v48 = vmul.f32 0.75, %v6951_v47  ;;  %12337 = vmatprep.subr.bf16.mxu0 %v14834_v30  ;;  %v7054_v20 = vand.u32 4294901760, %v7053_v44  ;;  %v14288_v33 = vsel %vm8756_vm4, 0.0, %v8760_v21 }
 0x769   :  { %v9937_v50 = vsel %vm6955_vm11, 1.0, %v14819_v49  ;;  %vm6954_vm1 = vcmp.gt.f32.partialorder %v6950_v24, 0.5  ;;  %v8762_v37 = vmul.f32 0.75, %v6950_v24  ;;  %v12347_v17 = vpack.c.bf16 %v7053_v44, %v7046_v14 }
 0x76a   :  { %v7067_v10 = vsub.f32 %v9937_v50, %v9937_v50  ;;  %v9936_v2 = vsel %vm6954_vm1, 1.0, %v14819_v49  ;;  %vm14292_vm5 = vmpackc.low %vm6955_vm11, %vm6954_vm1  ;;  %v7047_v4 = vand.u32 4294901760, %v7046_v14  ;;  %v7055_v8 = vsub.f32 %v7053_v44, %v7054_v20 }
 0x76b   :  { %v7060_v43 = vsub.f32 %v9936_v2, %v9936_v2  ;;  %12339 = vmatpush3.bf16.msk.msra.mxu0 %vm14292_vm5, %v14786_v18  ;;  %vm8759_vm3 = vcmp.gt.f32.partialorder %v9937_v50, 0.0  ;;  %vm8758_vm6 = vcmp.gt.f32.partialorder %v9936_v2, 0.0  ;;  %v14962_v2 = vld [vmem:[#allocation10_spill] sm:$0xff] }
 0x76c   :  { %12346 = vmatprep.subr.bf16.mxu0 %v14834_v30  ;;  %v7048_v35 = vsub.f32 %v7046_v14, %v7047_v4  ;;  %v7056_v5 = vand.u32 4294901760, %v7055_v8  ;;  %v7068_v0 = vand.u32 4294901760, %v7067_v10  ;;  %v12359_v23 = vpack.c.bf16 %v7054_v20, %v7047_v4  ;;  %v14966_v8 = vld [vmem:[#allocation13_spill] sm:$0xff] }
 0x76d   :  { %v12350_v21 = vpack.c.bf16 %v7067_v10, %v7060_v43  ;;  %v7061_v63 = vand.u32 4294901760, %v7060_v43  ;;  %v14300_v47 = vsel %vm8759_vm3, 0.0, %v8763_v48  ;;  %v14303_v12 = vsel %vm8758_vm6, 0.0, %v8762_v37 }
 0x76e   :  { %11521 = vmatmul.mubr.f32.vlgmr.msra.gmra.mrb[24].mxu0 %v13514_v31  ;;  %v7049_v44 = vand.u32 4294901760, %v7048_v35  ;;  %v7069_v24 = vsub.f32 %v7067_v10, %v7068_v0  ;;  %v14959_v10 = vld [vmem:[#allocation8_spill] sm:$0xff]  ;;  %vm9288_vm6 = vcmask 64512  }
 0x76f   :  { %12348 = vmatpush3.bf16.msra.mxu0 %v12347_v17  ;;  %v7062_v26 = vsub.f32 %v7060_v43, %v7061_v63  ;;  %11542 = vmatprep.mubr.msk.f32.mxu0 %vm12777_vm9, %v14819_v49  ;;  %v12362_v14 = vpack.c.bf16 %v7068_v0, %v7061_v63  ;;  %v14956_v17 = vld [vmem:[#allocation38_spill] sm:$0xff]  ;;  %v14967_v43 = vld [vmem:[#allocation7_spill] sm:$0xff]  ;;  %v14968_v35 = vld [vmem:[#allocation36_spill] sm:$0xff] }
 0x770   :  { %v12341_v50 = vpack.c.bf16 %v7056_v5, %v7049_v44  ;;  %12349 = vmatprep.subr.bf16.mxu0 %v14834_v30  ;;  %v7070_v20 = vand.u32 4294901760, %v7069_v24  ;;  %v14969_v5 = vld [vmem:[#allocation14_spill] sm:$0xff]  ;;  %v14970_v0 = vld [vmem:[#allocation15_spill] sm:$0xff] }
 0x771   :  { %v7063_v4 = vand.u32 4294901760, %v7062_v26 }
 0x772   :  { %12342 = vmatpush3.bf16.msra.mxu1 %v12341_v50 }
 0x773   :  { %12351 = vmatpush3.bf16.msra.mxu0 %v12350_v21  ;;  %12343 = vmatprep.subr.bf16.mxu1 %v14834_v30  ;;  %v12344_v48 = vpack.c.bf16 %v7070_v20, %v7063_v4  ;;  %v14972_v21 = vld [vmem:[#allocation16_spill] sm:$0xff] }
 0x774   :  { %12358 = vmatprep.subr.bf16.mxu0 %v14834_v30 }
 0x776   :  { %12345 = vmatpush3.bf16.msra.mxu1 %v12344_v48  ;;  %11543 = vmatmul.mubr.f32.vlgmr.msra.gmra.mrb[26].mxu0 %v13470_v46 }
 0x777   :  { %12360 = vmatpush3.bf16.msra.mxu0 %v12359_v23  ;;  %12352 = vmatprep.subr.bf16.mxu1 %v14834_v30  ;;  %v14971_v23 = vld [vmem:[#allocation40_spill] sm:$0xff] }
 0x778   :  { %12361 = vmatprep.subr.bf16.mxu0 %v14834_v30  ;;  %11564 = vmatprep.mubr.msk.f32.mxu0 %vm12777_vm9, %v14819_v49 }
 0x779   :  { %11532 = vmatmul.mubr.f32.vlgmr.msra.gmra.mrb[38].mxu1 %v13467_v16 }
 0x77a   :  { %12354 = vmatpush3.bf16.msk.msra.mxu1 %vm14276_vm13, %v14786_v18  ;;  %11553 = vmatprep.mubr.msk.f32.mxu1 %vm12777_vm9, %v14819_v49 }
 0x77b   :  { %12363 = vmatpush3.bf16.msra.mxu0 %v12362_v14  ;;  %12355 = vmatprep.subr.bf16.mxu1 %v14834_v30 }
 0x77c   :  { %12371 = vmatprep.subr.msk.bf16.mxu0 %vm13171_vm2, %v14786_v18 }
 0x77e   :  { %12357 = vmatpush3.bf16.msk.msra.mxu1 %vm14292_vm5, %v14786_v18  ;;  %11565 = vmatmul.mubr.f32.vlgmr.msra.gmra.mrb[28].mxu0 %v13467_v16 }
 0x77f   :  { %12373 = vmatpush3.bf16.msk.msra.mxu0 %vm13171_vm2, %v14786_v18  ;;  %12364 = vmatprep.subr.bf16.mxu1 %v14834_v30 }
 0x780   :  { %12375 = vmatprep.subr.msk.bf16.mxu0 %vm13198_vm7, %v14786_v18  ;;  %11586 = vmatprep.mubr.f32.mxu0 %v12908_v25  ;;  %v14957_v25 = vld [vmem:[#allocation41_spill] sm:$0xff] }
 0x781   :  { %11554 = vmatmul.mubr.f32.vlgmr.msra.gmra.mrb[40].mxu1 %v13477_v15 }
 0x782   :  { %12366 = vmatpush3.bf16.msk.msra.mxu1 %vm14276_vm13, %v14786_v18  ;;  %11575 = vmatprep.mubr.msk.f32.mxu1 %vm12777_vm9, %v14819_v49 }
 0x783   :  { %12377 = vmatpush3.bf16.msk.msra.mxu0 %vm13198_vm7, %v14786_v18  ;;  %12367 = vmatprep.subr.bf16.mxu1 %v14834_v30 }
 0x784   :  { %12379 = vmatprep.subr.bf16.mxu0 %v14956_v17 }
 0x786   :  { %12369 = vmatpush3.bf16.msk.msra.mxu1 %vm14292_vm5, %v14786_v18  ;;  %11587 = vmatmul.mubr.f32.vlgmr.msra.gmra.mrb[30].mxu0 %v13011_v36  ;;  %v14960_v36 = vld [vmem:[#allocation9_spill] sm:$0xff] }
 0x787   :  { %12381 = vmatpush3.bf16.msra.mxu0 %v14956_v17  ;;  %11589 = vmatprep.mubr.f32.mxu0 %v13021_v40  ;;  %v14961_v40 = vld [vmem:[#allocation39_spill] sm:$0xff] }
 0x788   :  { %12383 = vmatprep.subr.bf16.mxu0 %v14957_v25 }
 0x789   :  { %11576 = vmatmul.mubr.f32.vlgmr.msra.gmra.mrb[42].mxu1 %v13467_v16 }
 0x78a   :  { %11590 = vmatmul.mubr.f32.gmra.mrb[32].mxu0 %v14908_v51  ;;  %11670 = vmatprep.mubr.f32.mxu1 %v14909_v62  ;;  %v14963_v51 = vld [vmem:[#allocation6_spill] sm:$0xff]  ;;  %v14964_v62 = vld [vmem:[#allocation11_spill] sm:$0xff] }
 0x78b   :  { %12385 = vmatpush3.bf16.msra.mxu0 %v14957_v25  ;;  %11600 = vmatprep.mubr.f32.mxu0 %v14910_v3 }
 0x78c   :  { %12387 = vmatprep.subr.bf16.mxu0 %v14958_v1 }
 0x78e   :  { %11601 = vmatmul.mubr.f32.vlgmr.msra.gmra.mrb[30].mxu0 %v14959_v10 }
 0x78f   :  { %12389 = vmatpush3.bf16.msra.mxu0 %v14958_v1  ;;  %11603 = vmatprep.mubr.f32.mxu0 %v14960_v36 }
 0x790   :  { %12391 = vmatprep.subr.bf16.mxu0 %v14961_v40 }
 0x792   :  { %11604 = vmatmul.mubr.f32.gmra.mrb[32].mxu0 %v14962_v2 }
 0x793   :  { %12393 = vmatpush3.bf16.msra.mxu0 %v14961_v40  ;;  %11614 = vmatprep.mubr.f32.mxu0 %v14963_v51  ;;  %v7453_v51 = vmul.f32 0.75, %v14136_v61  ;;  %v14976_v61 = vld [vmem:[#allocation56_spill] sm:$0xff] }
 0x794   :  { %12395 = vmatprep.subr.msk.bf16.mxu0 %vm13171_vm2, %v14786_v18 }
 0x796   :  { %11615 = vmatmul.mubr.f32.vlgmr.msra.gmra.mrb[30].mxu0 %v14964_v62 }
 0x797   :  { %12397 = vmatpush3.bf16.msk.msra.mxu0 %vm13171_vm2, %v14786_v18  ;;  %11617 = vmatprep.mubr.f32.mxu0 %v14965_v45  ;;  %v14973_v45 = vld [vmem:[#allocation24_spill] sm:$0xff] }
 0x798   :  { %12399 = vmatprep.subr.msk.bf16.mxu0 %vm13198_vm7, %v14786_v18 }
 0x79a   :  { %11618 = vmatmul.mubr.f32.gmra.mrb[32].mxu0 %v14966_v8  ;;  %v14974_v8 = vld [vmem:[#allocation21_spill] sm:$0xff] }
 0x79b   :  { %12401 = vmatpush3.bf16.msk.msra.mxu0 %vm13198_vm7, %v14786_v18  ;;  %11628 = vmatprep.mubr.f32.mxu0 %v14967_v43 }
 0x79c   :  { %12403 = vmatprep.subr.bf16.mxu0 %v14968_v35 }
 0x79e   :  { %11629 = vmatmul.mubr.f32.vlgmr.msra.gmra.mrb[30].mxu0 %v14969_v5 }
 0x79f   :  { %12405 = vmatpush3.bf16.msra.mxu0 %v14968_v35  ;;  %11631 = vmatprep.mubr.f32.mxu0 %v14970_v0 }
 0x7a0   :  { %12407 = vmatprep.subr.bf16.mxu0 %v14971_v23 }
 0x7a2   :  { %11632 = vmatmul.mubr.f32.gmra.mrb[32].mxu0 %v14972_v21  ;;  %v7477_v21 = vmul.f32 0.5, %v14976_v61 }
 0x7a3   :  { %12409 = vmatpush3.bf16.msra.mxu0 %v14971_v23  ;;  %11642 = vmatprep.mubr.f32.mxu0 %v14910_v3 }
 0x7a4   :  { %12411 = vmatprep.subr.msk.bf16.mxu0 %vm13171_vm2, %v14786_v18 }
 0x7a6   :  { %11643 = vmatmul.mubr.f32.vlgmr.msra.gmra.mrb[30].mxu0 %v14959_v10 }
 0x7a7   :  { %12413 = vmatpush3.bf16.msk.msra.mxu0 %vm13171_vm2, %v14786_v18  ;;  %11645 = vmatprep.mubr.f32.mxu0 %v14960_v36  ;;  %vm7452_vm2 = vcmp.gt.f32.partialorder %v14973_v45, 0.0 }
 0x7a8   :  { %12415 = vmatprep.subr.msk.bf16.mxu0 %vm13198_vm7, %v14786_v18  ;;  %v7454_v35 = vsel %vm7452_vm2, 0.0, %v7453_v51 }
 0x7aa   :  { %11646 = vmatmul.mubr.f32.gmra.mrb[32].mxu0 %v14962_v2 }
 0x7ab   :  { %12417 = vmatpush3.bf16.msk.msra.mxu0 %vm13198_vm7, %v14786_v18  ;;  %11656 = vmatprep.mubr.f32.mxu0 %v14910_v3 }
 0x7ac   :  { %12466 = vmatprep.subr.bf16.mxu0 %v14834_v30 }
 0x7ae   :  { %11657 = vmatmul.mubr.f32.vlgmr.msra.gmra.mrb[30].mxu0 %v14959_v10 }
 0x7af   :  { %11659 = vmatprep.mubr.f32.mxu0 %v14960_v36  ;;  %v6964_v36 = vmul.f32 0.5, %v14133_v41  ;;  %v14975_v41 = vld [vmem:[#allocation55_spill] sm:$0xff] }
 0x7b2   :  { %11660 = vmatmul.mubr.f32.gmra.mrb[32].mxu0 %v14962_v2 }
 0x7b3   :  { %11754 = vmatprep.mubr.msk.f32.mxu0 %vm12777_vm9, %v14819_v49 }
 0x841   :  { %v7040_v63 = vpop.f32.mrb[24].mxu0 }
 0x842   :  { %v11522_v44 = vpop.f32.mrb[25].mxu0 }
 0x843   :  { %v14977_v44 = vld [vmem:[#allocation53_spill] sm:$0xff] }
 0x849   :  { %v7211_v24 = vpop.f32.mrb[26].mxu0 }
 0x84a   :  { %v11544_v14 = vpop.f32.mrb[27].mxu0 }
 0x84c   :  { %v7131_v50 = vpop.f32.mrb[38].mxu1 }
 0x84d   :  { %v7132_v20 = vadd.f32 %v7131_v50, %v7040_v63  ;;  %v11533_v4 = vpop.f32.mrb[39].mxu1 }
 0x84e   :  { %v14978_v4 = vld [vmem:[#allocation43_spill] sm:$0xff] }
 0x84f   :  { %v7212_v48 = vadd.f32 %v7211_v24, %v7132_v20  ;;  %v7476_v24 = vmul.f32 0.5, %v14977_v44 }
 0x851   :  { %v7371_v3 = vpop.f32.mrb[28].mxu0 }
 0x852   :  { %v11566_v26 = vpop.f32.mrb[29].mxu0 }
 0x854   :  { %v7288_v37 = vpop.f32.mrb[40].mxu1 }
 0x855   :  { %v7289_v17 = vadd.f32 %v7288_v37, %v7212_v48  ;;  %v11555_v25 = vpop.f32.mrb[41].mxu1  ;;  %v14980_v37 = vld [vmem:[#allocation44_spill] sm:$0xff] }
 0x857   :  { %v7372_v1 = vadd.f32 %v7371_v3, %v7289_v17  ;;  %v14979_v3 = vld [vmem:[#allocation59_spill] sm:$0xff] }
 0x858   :  { %v7479_v26 = vmul.f32 0.5, %v14979_v3 }
 0x85c   :  { %v7446_v10 = vpop.f32.mrb[42].mxu1 }
 0x85d   :  { %v7447_v40 = vadd.f32 %v7446_v10, %v7372_v1  ;;  %v11577_v2 = vpop.f32.mrb[43].mxu1  ;;  %v14981_v1 = vld [vmem:[#allocation54_spill] sm:$0xff] }
 0x85e   :  { %v7478_v10 = vmul.f32 0.5, %v14981_v1 }
 0x85f   :  { %v7450_v62 = vadd.f32 %v7447_v40, %v6964_v36  ;;  %v14982_v36 = vld [vmem:[#allocation60_spill] sm:$0xff] }
 0x861   :  { %v14418_v43 = vadd.f32 %v7450_v62, %v14974_v8  ;;  %v14983_v62 = vld [vmem:[#allocation61_spill] sm:$0xff] }
 0x863   :  { %v14421_v5 = vadd.f32 %v7454_v35, %v14418_v43 }
 0x865   :  { %vm7456_vm7 = vcmp.gt.f32.partialorder %v14421_v5, 0.5 }
 0x866   :  { %v14425_v0 = vsel %vm7456_vm7, 1.0, %v14819_v49 }
 0x867   :  { %v14429_v23 = vadd.f32 %v14425_v0, %v14975_v41  ;;  %v14984_v41 = vld [vmem:[#allocation46_spill] sm:$0xff]  ;;  %vm9272_vm2 = vcmp.gt.f32.partialorder %v14425_v0, 0.0 }
 0x881   :  { %v11658_v63 = vpop.f32.mrb[30].mxu0 }
 0x882   :  { %v8095_v14 = vadd.f32 %v11658_v63, %v7477_v21  ;;  %v8072_v50 = vpop.f32.mrb[31].mxu0  ;;  %v14985_v63 = vld [vmem:[#allocation48_spill] sm:$0xff] }
 0x883   :  { %v8094_v20 = vadd.f32 %v8072_v50, %v7476_v24 }
 0x884   :  { %v8099_v48 = vadd.f32 %v8095_v14, %v14978_v4 }
 0x885   :  { %v8098_v17 = vadd.f32 %v8094_v20, %v14980_v37  ;;  %v11661_v25 = vpop.f32.mrb[32].mxu0 }
 0x886   :  { %v8115_v40 = vadd.f32 %v14982_v36, %v8099_v48  ;;  %v8097_v2 = vadd.f32 %v11661_v25, %v7479_v26  ;;  %v8084_v51 = vpop.f32.mrb[33].mxu0 }
 0x887   :  { %v8114_v45 = vadd.f32 %v14983_v62, %v8098_v17  ;;  %v8096_v35 = vadd.f32 %v8084_v51, %v7478_v10 }
 0x888   :  { %vm8119_vm10 = vcmp.gt.f32.partialorder %v8115_v40, 0.5  ;;  %v8101_v61 = vadd.f32 %v8097_v2, %v14984_v41 }
 0x889   :  { %v9968_v21 = vsel %vm8119_vm10, 1.0, %v14819_v49  ;;  %vm8118_vm14 = vcmp.gt.f32.partialorder %v8114_v45, 0.5  ;;  %v8100_v44 = vadd.f32 %v8096_v35, %v14985_v63 }
 0x88a   :  { %v8252_v24 = vsub.f32 %v9968_v21, %v9968_v21  ;;  %v9967_v14 = vsel %vm8118_vm14, 1.0, %v14819_v49  ;;  %vm14443_vm0 = vmpackc.low %vm8119_vm10, %vm8118_vm14  ;;  %v8117_v20 = vadd.f32 %v14198_v60, %v8101_v61  ;;  %vm9739_vm10 = vcmask 9216  }
 0x88b   :  { %v8245_v4 = vsub.f32 %v9967_v14, %v9967_v14  ;;  %v8116_v48 = vadd.f32 %v14201_v59, %v8100_v44  ;;  %12419 = vmatprep.subr.msk.bf16.mxu1 %vm14443_vm0, %v14786_v18 }
 0x88c   :  { %vm8121_vm12 = vcmp.gt.f32.partialorder %v8117_v20, 0.5  ;;  %12421 = vmatpush3.bf16.msk.msra.mxu1 %vm14443_vm0, %v14786_v18  ;;  %v8253_v3 = vand.u32 4294901760, %v8252_v24 }
 0x88d   :  { %v9970_v26 = vsel %vm8121_vm12, 1.0, %v14819_v49  ;;  %vm8120_vm8 = vcmp.gt.f32.partialorder %v8116_v48, 0.5  ;;  %v8246_v37 = vand.u32 4294901760, %v8245_v4  ;;  %v12434_v17 = vpack.c.bf16 %v8252_v24, %v8245_v4 }
 0x88e   :  { %v8266_v25 = vsub.f32 %v9970_v26, %v9970_v26  ;;  %v9969_v60 = vsel %vm8120_vm8, 1.0, %v14819_v49  ;;  %vm14457_vm13 = vmpackc.low %vm8121_vm12, %vm8120_vm8  ;;  %v8254_v1 = vsub.f32 %v8252_v24, %v8253_v3 }
 0x88f   :  { %v8259_v10 = vsub.f32 %v9969_v60, %v9969_v60  ;;  %12423 = vmatprep.subr.msk.bf16.mxu1 %vm14457_vm13, %v14786_v18  ;;  %v8247_v36 = vsub.f32 %v8245_v4, %v8246_v37  ;;  %v12450_v40 = vpack.c.bf16 %v8253_v3, %v8246_v37 }
 0x890   :  { %12425 = vmatpush3.bf16.msk.msra.mxu1 %vm14457_vm13, %v14786_v18  ;;  %v8255_v2 = vand.u32 4294901760, %v8254_v1  ;;  %v8267_v51 = vand.u32 4294901760, %v8266_v25 }
 0x891   :  { %v8248_v62 = vand.u32 4294901760, %v8247_v36  ;;  %v8260_v45 = vand.u32 4294901760, %v8259_v10  ;;  %v12438_v35 = vpack.c.bf16 %v8266_v25, %v8259_v10 }
 0x892   :  { %v8268_v41 = vsub.f32 %v8266_v25, %v8267_v51 }
 0x893   :  { %11671 = vmatmul.mubr.f32.vlgmr.msra.gmra.mrb[44].mxu1 %v13277_v57  ;;  %v12426_v61 = vpack.c.bf16 %v8255_v2, %v8248_v62  ;;  %v8261_v21 = vsub.f32 %v8259_v10, %v8260_v45  ;;  %v12454_v63 = vpack.c.bf16 %v8267_v51, %v8260_v45  ;;  %v8131_v57 = vmul.f32 0.5, %v14255_v6 }
 0x894   :  { %11673 = vmatprep.mubr.f32.mxu1 %v13330_v55  ;;  %v8269_v44 = vand.u32 4294901760, %v8268_v41 }
 0x895   :  { %12427 = vmatprep.subr.bf16.mxu1 %v12426_v61  ;;  %v8262_v24 = vand.u32 4294901760, %v8261_v21 }
 0x896   :  { %12429 = vmatpush3.bf16.msra.mxu1 %v12426_v61 }
 0x897   :  { %11674 = vmatmul.mubr.f32.gmra.mrb[46].mxu1 %v13334_v58  ;;  %v12430_v14 = vpack.c.bf16 %v8269_v44, %v8262_v24 }
 0x898   :  { %11684 = vmatprep.mubr.f32.mxu1 %v13217_v22 }
 0x899   :  { %12431 = vmatprep.subr.bf16.mxu1 %v12430_v14 }
 0x89a   :  { %12433 = vmatpush3.bf16.msra.mxu1 %v12430_v14 }
 0x89b   :  { %12435 = vmatprep.subr.bf16.mxu1 %v12434_v17 }
 0x89d   :  { %11685 = vmatmul.mubr.f32.vlgmr.msra.gmra.mrb[44].mxu1 %v13237_v39 }
 0x89e   :  { %12437 = vmatpush3.bf16.msra.mxu1 %v12434_v17  ;;  %11687 = vmatprep.mubr.f32.mxu1 %v13246_v7 }
 0x89f   :  { %12439 = vmatprep.subr.bf16.mxu1 %v12438_v35 }
 0x8a1   :  { %11688 = vmatmul.mubr.f32.gmra.mrb[46].mxu1 %v13252_v32 }
 0x8a2   :  { %12441 = vmatpush3.bf16.msra.mxu1 %v12438_v35  ;;  %11698 = vmatprep.mubr.f32.mxu1 %v13220_v9 }
 0x8a3   :  { %12443 = vmatprep.subr.msk.bf16.mxu1 %vm14443_vm0, %v14786_v18 }
 0x8a5   :  { %11699 = vmatmul.mubr.f32.vlgmr.msra.gmra.mrb[44].mxu1 %v13244_v13 }
 0x8a6   :  { %12445 = vmatpush3.bf16.msk.msra.mxu1 %vm14443_vm0, %v14786_v18  ;;  %11701 = vmatprep.mubr.f32.mxu1 %v13255_v11 }
 0x8a7   :  { %12447 = vmatprep.subr.msk.bf16.mxu1 %vm14457_vm13, %v14786_v18 }
 0x8a9   :  { %11702 = vmatmul.mubr.f32.gmra.mrb[46].mxu1 %v13264_v27 }
 0x8aa   :  { %12449 = vmatpush3.bf16.msk.msra.mxu1 %vm14457_vm13, %v14786_v18  ;;  %11712 = vmatprep.mubr.f32.mxu1 %v13223_v28  ;;  %v8133_v28 = vmul.f32 0.5, %v14267_v29 }
 0x8ab   :  { %12451 = vmatprep.subr.bf16.mxu1 %v12450_v40 }
 0x8ad   :  { %11713 = vmatmul.mubr.f32.vlgmr.msra.gmra.mrb[44].mxu1 %v13250_v42 }
 0x8ae   :  { %12453 = vmatpush3.bf16.msra.mxu1 %v12450_v40  ;;  %11715 = vmatprep.mubr.f32.mxu1 %v13268_v19  ;;  %v8130_v19 = vmul.f32 0.5, %v14259_v56  ;;  %v14990_v56 = vld [vmem:[#allocation57_spill] sm:$0xff] }
 0x8af   :  { %12455 = vmatprep.subr.bf16.mxu1 %v12454_v63 }
 0x8b1   :  { %11716 = vmatmul.mubr.f32.gmra.mrb[46].mxu1 %v13280_v38 }
 0x8b2   :  { %12457 = vmatpush3.bf16.msra.mxu1 %v12454_v63  ;;  %11726 = vmatprep.mubr.f32.mxu1 %v13217_v22 }
 0x8b3   :  { %12459 = vmatprep.subr.msk.bf16.mxu1 %vm14443_vm0, %v14786_v18 }
 0x8b5   :  { %11727 = vmatmul.mubr.f32.vlgmr.msra.gmra.mrb[44].mxu1 %v13237_v39 }
 0x8b6   :  { %12461 = vmatpush3.bf16.msk.msra.mxu1 %vm14443_vm0, %v14786_v18  ;;  %11729 = vmatprep.mubr.f32.mxu1 %v13246_v7 }
 0x8b7   :  { %12463 = vmatprep.subr.msk.bf16.mxu1 %vm14457_vm13, %v14786_v18 }
 0x8b9   :  { %11730 = vmatmul.mubr.f32.gmra.mrb[46].mxu1 %v13252_v32 }
 0x8ba   :  { %12465 = vmatpush3.bf16.msk.msra.mxu1 %vm14457_vm13, %v14786_v18  ;;  %11740 = vmatprep.mubr.f32.mxu1 %v13217_v22 }
 0x8bb   :  { %12472 = vmatprep.subr.bf16.mxu1 %v14834_v30 }
 0x8bd   :  { %11741 = vmatmul.mubr.f32.vlgmr.msra.gmra.mrb[44].mxu1 %v13237_v39 }
 0x8be   :  { %11743 = vmatprep.mubr.f32.mxu1 %v13246_v7 }
 0x8c1   :  { %11744 = vmatmul.mubr.f32.gmra.mrb[46].mxu1 %v13252_v32  ;;  %v8132_v32 = vmul.f32 0.5, %v14271_v52 }
 0x8c2   :  { %11765 = vmatprep.mubr.msk.f32.mxu1 %vm12777_vm9, %v14819_v49 }
 0x990   :  { %v11742_v11 = vpop.f32.mrb[44].mxu1 }
 0x991   :  { %v8749_v27 = vadd.f32 %v11742_v11, %v8131_v57  ;;  %v8726_v55 = vpop.f32.mrb[45].mxu1 }
 0x992   :  { %v8748_v9 = vadd.f32 %v8726_v55, %v8130_v19 }
 0x993   :  { %v8753_v22 = vadd.f32 %v8749_v27, %v14866_v53  ;;  %v14991_v53 = vld [vmem:[#allocation58_spill] sm:$0xff] }
 0x994   :  { %v8752_v39 = vadd.f32 %v8748_v9, %v14868_v34  ;;  %v11745_v7 = vpop.f32.mrb[46].mxu1 }
 0x995   :  { %v8769_v13 = vadd.f32 %v14285_v54, %v8753_v22  ;;  %v8751_v42 = vadd.f32 %v11745_v7, %v8133_v28  ;;  %v8738_v38 = vpop.f32.mrb[47].mxu1 }
 0x996   :  { %v8768_v58 = vadd.f32 %v14288_v33, %v8752_v39  ;;  %v8750_v6 = vadd.f32 %v8738_v38, %v8132_v32  ;;  %v8784_v32 = vmul.f32 0.5, %v14418_v43  ;;  %v9273_v38 = vmul.f32 0.75, %v14421_v5 }
 0x997   :  { %vm8773_vm15 = vcmp.gt.f32.partialorder %v8769_v13, 0.5  ;;  %v8755_v50 = vadd.f32 %v8751_v42, %v14990_v56 }
 0x998   :  { %v9984_v20 = vsel %vm8773_vm15, 1.0, %v14819_v49  ;;  %vm8772_vm4 = vcmp.gt.f32.partialorder %v8768_v58, 0.5  ;;  %v8754_v29 = vadd.f32 %v8750_v6, %v14991_v53 }
 0x999   :  { %v8873_v4 = vsub.f32 %v9984_v20, %v9984_v20  ;;  %v9983_v34 = vsel %vm8772_vm4, 1.0, %v14819_v49  ;;  %v8771_v52 = vadd.f32 %v14300_v47, %v8755_v50  ;;  %vm14530_vm11 = vmpackc.low %vm8773_vm15, %vm8772_vm4  ;;  %v9274_v50 = vsel %vm9272_vm2, 0.0, %v9273_v38 }
 0x99a   :  { %v8866_v48 = vsub.f32 %v9983_v34, %v9983_v34  ;;  %v8770_v33 = vadd.f32 %v14303_v12, %v8754_v29  ;;  %12468 = vmatpush3.bf16.msk.msra.mxu0 %vm14530_vm11, %v14786_v18 }
 0x99b   :  { %v8874_v3 = vand.u32 4294901760, %v8873_v4  ;;  %vm8775_vm1 = vcmp.gt.f32.partialorder %v8771_v52, 0.5  ;;  %12469 = vmatprep.subr.bf16.mxu0 %v14834_v30 }
 0x99c   :  { %v8867_v26 = vand.u32 4294901760, %v8866_v48  ;;  %v9986_v37 = vsel %vm8775_vm1, 1.0, %v14819_v49  ;;  %vm8774_vm5 = vcmp.gt.f32.partialorder %v8770_v33, 0.5  ;;  %v12479_v47 = vpack.c.bf16 %v8873_v4, %v8866_v48 }
 0x99d   :  { %v8887_v17 = vsub.f32 %v9986_v37, %v9986_v37  ;;  %v9985_v25 = vsel %vm8774_vm5, 1.0, %v14819_v49  ;;  %vm14541_vm3 = vmpackc.low %vm8775_vm1, %vm8774_vm5  ;;  %v8875_v12 = vsub.f32 %v8873_v4, %v8874_v3 }
 0x99e   :  { %v8880_v59 = vsub.f32 %v9985_v25, %v9985_v25  ;;  %12471 = vmatpush3.bf16.msk.msra.mxu0 %vm14541_vm3, %v14786_v18  ;;  %v8868_v1 = vsub.f32 %v8866_v48, %v8867_v26  ;;  %v12491_v10 = vpack.c.bf16 %v8874_v3, %v8867_v26  ;;  %v9286_v3 = vpop.permute.xlu1 %9285 }
 0x99f   :  { %v8888_v36 = vand.u32 4294901760, %v8887_v17  ;;  %12478 = vmatprep.subr.bf16.mxu0 %v14834_v30  ;;  %v8876_v40 = vand.u32 4294901760, %v8875_v12 }
 0x9a0   :  { %v8881_v2 = vand.u32 4294901760, %v8880_v59  ;;  %v8869_v51 = vand.u32 4294901760, %v8868_v1  ;;  %v12482_v62 = vpack.c.bf16 %v8887_v17, %v8880_v59 }
 0x9a1   :  { %11755 = vmatmul.mubr.f32.vlgmr.msra.gmra.mrb[34].mxu0 %v13514_v31  ;;  %v8889_v45 = vsub.f32 %v8887_v17, %v8888_v36 }
 0x9a2   :  { %12480 = vmatpush3.bf16.msra.mxu0 %v12479_v47  ;;  %v12473_v35 = vpack.c.bf16 %v8876_v40, %v8869_v51  ;;  %v8882_v41 = vsub.f32 %v8880_v59, %v8881_v2  ;;  %11776 = vmatprep.mubr.msk.f32.mxu0 %vm12777_vm9, %v14819_v49  ;;  %v12494_v61 = vpack.c.bf16 %v8888_v36, %v8881_v2 }
 0x9a3   :  { %12481 = vmatprep.subr.bf16.mxu0 %v14834_v30  ;;  %v8890_v21 = vand.u32 4294901760, %v8889_v45 }
 0x9a4   :  { %12474 = vmatpush3.bf16.msra.mxu1 %v12473_v35  ;;  %v8883_v63 = vand.u32 4294901760, %v8882_v41 }
 0x9a5   :  { %12475 = vmatprep.subr.bf16.mxu1 %v14834_v30 }
 0x9a6   :  { %12483 = vmatpush3.bf16.msra.mxu0 %v12482_v62  ;;  %v12476_v44 = vpack.c.bf16 %v8890_v21, %v8883_v63 }
 0x9a7   :  { %12490 = vmatprep.subr.bf16.mxu0 %v14834_v30 }
 0x9a8   :  { %12477 = vmatpush3.bf16.msra.mxu1 %v12476_v44 }
 0x9a9   :  { %11777 = vmatmul.mubr.f32.vlgmr.msra.gmra.mrb[36].mxu0 %v13470_v46  ;;  %12484 = vmatprep.subr.bf16.mxu1 %v14834_v30 }
 0x9aa   :  { %12492 = vmatpush3.bf16.msra.mxu0 %v12491_v10  ;;  %11798 = vmatprep.mubr.msk.f32.mxu0 %vm12777_vm9, %v14819_v49 }
 0x9ab   :  { %11766 = vmatmul.mubr.f32.vlgmr.msra.gmra.mrb[48].mxu1 %v13467_v16  ;;  %12493 = vmatprep.subr.bf16.mxu0 %v14834_v30 }
 0x9ac   :  { %12486 = vmatpush3.bf16.msk.msra.mxu1 %vm14530_vm11, %v14786_v18  ;;  %11787 = vmatprep.mubr.msk.f32.mxu1 %vm12777_vm9, %v14819_v49 }
 0x9ad   :  { %12487 = vmatprep.subr.bf16.mxu1 %v14834_v30 }
 0x9ae   :  { %12495 = vmatpush3.bf16.msra.mxu0 %v12494_v61 }
 0x9af   :  { %11817 = vmatprep.subr.mxu0 %v14819_v49 }
 0x9b0   :  { %12489 = vmatpush3.bf16.msk.msra.mxu1 %vm14541_vm3, %v14786_v18 }
 0x9b1   :  { %12496 = vmatprep.subr.bf16.mxu1 %v14834_v30  ;;  %11799 = vmatmul.mubr.f32.vlgmr.msra.gmra.mrb[38].mxu0 %v13467_v16 }
 0x9b2   :  { %11819 = vmatprep.mubr.msk.f32.mxu0 %vm12777_vm9, %v14819_v49 }
 0x9b3   :  { %11788 = vmatmul.mubr.f32.vlgmr.msra.gmra.mrb[50].mxu1 %v13477_v15 }
 0x9b4   :  { %12498 = vmatpush3.bf16.msk.msra.mxu1 %vm14530_vm11, %v14786_v18  ;;  %11809 = vmatprep.mubr.msk.f32.mxu1 %vm12777_vm9, %v14819_v49 }
 0x9b5   :  { %12499 = vmatprep.subr.bf16.mxu1 %v14834_v30 }
 0x9b8   :  { %12501 = vmatpush3.bf16.msk.msra.mxu1 %vm14541_vm3, %v14786_v18  ;;  %v9281_v18 = vld [vmem:[%s14631_s9] sm:$0x3]  ;;  %s12778_s9 = smov [#allocation2]  }
 0x9b9   :  { %11812 = vmatprep.subr.mxu1 %v14819_v49  ;;  %v9290_v28 = vsel %vm9288_vm6, %v9281_v18, 0  ;;  %s9747_s30 = sshll.u32 %s12778_s9, 4  ;;  %s9748_s30 = int_to_ptr.vmem [resolvable:$true] %s9747_s30 }
 0x9ba   :  { %v9358_v39 = vand.u32 4294901760, %v9290_v28  ;;  %s12749_s12 = scalar_lea.vmem %s9748_s30, 32  ;;  %p12754_p1 = scmp.lt.s32.totalorder %s9748_s30, %s9748_s30 }
 0x9bb   :  { %11810 = vmatmul.mubr.f32.vlgmr.msra.gmra.mrb[52].mxu1 %v13467_v16  ;;  %p12750_p0 = scmp.ne.s32.totalorder %s9748_s30, %s12749_s12  ;;  %p12755_p2 = scmp.lt.s32.totalorder %s12749_s12, %s12749_s12 }
 0x9bc   :  { %11814 = vmatprep.mubr.msk.f32.mxu1 %vm12777_vm9, %v14819_v49  ;;  %v9359_v58 = vsub.f32 %v9290_v28, %v9358_v39 }
 0x9bd   :  { %p12756_p3 = por %p12755_p2, %p12754_p1 }
 0x9be   :  { %v9360_v20 = vand.u32 4294901760, %v9359_v58 }
 0x9bf   :  { %p12757_p4 = pnand %p12756_p3, %p12750_p0 }
 0x9c0   :  { %v9361_v4 = vsub.f32 %v9359_v58, %v9360_v20 }
 0x9c2   :  { %v9362_v52 = vand.u32 4294901760, %v9361_v4 }
 0xa74   :  { %v8860_v46 = vpop.f32.mrb[34].mxu0 }
 0xa75   :  { %v11756_v15 = vpop.f32.mrb[35].mxu0 }
 0xa7c   :  { %v9031_v31 = vpop.f32.mrb[36].mxu0 }
 0xa7d   :  { %v11778_v24 = vpop.f32.mrb[37].mxu0 }
 0xa7e   :  { %v8951_v14 = vpop.f32.mrb[48].mxu1 }
 0xa7f   :  { %v8952_v57 = vadd.f32 %v8951_v14, %v8860_v46  ;;  %v11767_v11 = vpop.f32.mrb[49].mxu1 }
 0xa81   :  { %v9032_v19 = vadd.f32 %v9031_v31, %v8952_v57 }
 0xa84   :  { %v9191_v30 = vpop.f32.mrb[38].mxu0 }
 0xa85   :  { %v11800_v27 = vpop.f32.mrb[39].mxu0 }
 0xa86   :  { %v9108_v55 = vpop.f32.mrb[50].mxu1 }
 0xa87   :  { %v9109_v16 = vadd.f32 %v9108_v55, %v9032_v19  ;;  %v11789_v9 = vpop.f32.mrb[51].mxu1 }
 0xa89   :  { %v9192_v22 = vadd.f32 %v9191_v30, %v9109_v16 }
 0xa8e   :  { %v9266_v7 = vpop.f32.mrb[52].mxu1 }
 0xa8f   :  { %v9267_v13 = vadd.f32 %v9266_v7, %v9192_v22  ;;  %v11811_v42 = vpop.f32.mrb[53].mxu1 }
 0xa91   :  { %v9270_v6 = vadd.f32 %v9267_v13, %v8784_v32 }
 0xa93   :  { %v9271_v56 = vadd.f32 %v9270_v6, %v14974_v8 }
 0xa95   :  { %v9275_v53 = vadd.f32 %v9274_v50, %v9271_v56 }
 0xa97   :  { %vm9276_vm7 = vcmp.gt.f32.partialorder %v9275_v53, 0.5 }
 0xa98   :  { %v9999_v29 = vsel %vm9276_vm7, 1.0, %v14819_v49 }
 0xa99   :  { %v9279_v34 = vadd.f32 %v9999_v29, %v14429_v23 }
 0xa9b   :  { %v9280_v43 = vmul.f32 0.2, %v9279_v34 }
 0xa9d   :  { %v9293_v54 = vand.u32 4294901760, %v9280_v43 }
 0xa9f   :  { %11813 = vmatpush3.msra.mxu1 %v9293_v54  ;;  %v9370_v5 = vsub.f32 %v9280_v43, %v9293_v54 }
 0xaa0   :  { %11815 = vmatmul.mubr.f32.vlgmr.msra.gmra.mrb[54].mxu1 %v9362_v52 }
 0xaa1   :  { %v9371_v48 = vand.u32 4294901760, %v9370_v5 }
 0xaa3   :  { %v9372_v33 = vsub.f32 %v9370_v5, %v9371_v48 }
 0xaa5   :  { %v9373_v0 = vand.u32 4294901760, %v9372_v33 }
 0xaa7   :  { %11818 = vmatpush3.msra.mxu0 %v9373_v0 }
 0xaa8   :  { %11820 = vmatmul.mubr.f32.vlgmr.msra.gmra.mrb[40].mxu0 %v9358_v39  ;;  %11822 = vmatprep.subr.mxu0 %v14819_v49 }
 0xaa9   :  { %11823 = vmatpush3.msra.mxu0 %v9370_v5  ;;  %11824 = vmatprep.mubr.msk.f32.mxu0 %vm12777_vm9, %v14819_v49 }
 0xaaa   :  { %11827 = vmatprep.subr.mxu0 %v14819_v49 }
 0xab0   :  { %11825 = vmatmul.mubr.f32.vlgmr.msra.gmra.mrb[40].mxu0 %v9359_v58 }
 0xab1   :  { %11828 = vmatpush3.msra.mxu0 %v9293_v54  ;;  %11829 = vmatprep.mubr.msk.f32.mxu0 %vm12777_vm9, %v14819_v49 }
 0xab2   :  { %11832 = vmatprep.subr.mxu0 %v14819_v49 }
 0xab8   :  { %11830 = vmatmul.mubr.f32.vlgmr.msra.gmra.mrb[40].mxu0 %v9360_v20 }
 0xab9   :  { %11833 = vmatpush3.msra.mxu0 %v9371_v48  ;;  %11834 = vmatprep.mubr.msk.f32.mxu0 %vm12777_vm9, %v14819_v49 }
 0xaba   :  { %11837 = vmatprep.subr.mxu0 %v14819_v49 }
 0xac0   :  { %11835 = vmatmul.mubr.f32.vlgmr.msra.gmra.mrb[40].mxu0 %v9358_v39 }
 0xac1   :  { %11838 = vmatpush3.msra.mxu0 %v9293_v54  ;;  %11839 = vmatprep.mubr.msk.f32.mxu0 %vm12777_vm9, %v14819_v49 }
 0xac8   :  { %11840 = vmatmul.mubr.f32.vlgmr.msra.gmra.mrb[40].mxu0 %v9358_v39 }
 0xb73   :  { %v9364_v8 = vpop.f32.mrb[54].mxu1 }
 0xb74   :  { %v11816_v23 = vpop.f32.mrb[55].mxu1  ;;  %v9365_v26 = vadd.f32 %v9364_v8, %v9286_v3 }
 0xb9b   :  { %v9734_v37 = vpop.f32.mrb[40].mxu0 }
 0xb9c   :  { %v12516_v47 = vadd.f32 %v9734_v37, %v9365_v26  ;;  %v11841_v17 = vpop.f32.mrb[41].mxu0 }
 0xb9e   :  { %12747 = vtanh.f32 %v12516_v47 }
 0xba8   :  { %v12748_v25 = vpop.eup %12747 }
 0xba9   :  { %9740 = vst.msk [vmem:[#allocation2] sm:$0x3] %vm9739_vm10, %v12748_v25 }
 0xbaa   :  { %12760 = shalt.err (!%p12757_p4)
}
 0xbab   :  { %s12761_s1 = scalar_lea.hbm %s14633_s11, 32 }
 0xbac   :  { %p12762_p5 = scmp.ne.s32.totalorder %s14633_s11, %s12761_s1  ;;  %p12765_p6 = scmp.lt.u32.totalorder %s12761_s1, %s14633_s11 }
 0xbae   :  { %p12767_p7 = pnand %p12765_p6, %p12762_p5 }
 0xbb0   :  { %12770 = shalt.err (!%p12767_p7)
}
 0xbb1   :  { %9750 = dma.vmem_to_hbm [thread:$0]  %s9748_s30, 32, %s14633_s11, [#allocation3]  }
 0xbb2   :  { %12771 = dma.done.wait [#allocation3], 32  }
 0xbb3   :  { %12772 = vsyncadd [#allocation3], 4294967264 }
 0xbb4   :  { %9754 = vsyncpa [#allocation3], 1 }

</bundles_post_ra>
